<compile_context>
chip_gen: v5e
topology: v5e:2x2
jax: 0.10.0
libtpu: 0.0.40
codegen_flags: <defaults>
</compile_context>

<pallas_src>
import jax
import jax.numpy as jnp
from jax.experimental import pallas as pl
from jax.experimental.pallas import tpu as pltpu

BN_EPS = 1e-5
LANE = 128


def _round_up(v, m):
    return (v + m - 1) // m * m


# ------------------------------------------------------------------ kernel ---
def gnn_vn_kernel(x_ref, B_ref, SB_ref, AdT_ref, ea_ref,
                  WeA_ref, beA_ref, W1_ref, b1_ref, W2_ref, b2_ref,
                  vW1_ref, vb1_ref, vW2_ref, vb2_ref, out_ref):
    """Whole forward pass in one invocation: layers unrolled, everything VMEM-resident."""
    f32, bf16 = jnp.float32, jnp.bfloat16
    L = W1_ref.shape[0]
    GP = B_ref.shape[1]
    EP = SB_ref.shape[0] - GP
    DP = x_ref.shape[1]

    def mm(a, b):
        # Single-pass bf16 MXU matmul with f32 accumulation.
        return jnp.dot(a.astype(bf16), b.astype(bf16), preferred_element_type=f32)

    B = B_ref[...]      # (NP, GP)    bf16 one-hot of `batch`         (vn -> node broadcast)
    SB = SB_ref[...]    # (EP+GP, NP) bf16: rows [0,EP)   = one-hot of src  (x[src] gather)
                        #                   rows [EP,...) = batch one-hot^T (global_add_pool)
    AdT = AdT_ref[...]  # (NP, EP)    bf16 one-hot^T of dst node      (scatter-add)

    # Edge encoder hoisted out of the layer loop: ONE (EP, De)x(De, L*DP) MXU pass
    # (K = De is tiny, so batching the L layers amortises the MXU push/pop).
    # Per-layer slices below are taken at 128-lane boundaries (DP % 128 == 0).
    edge_emb_all = mm(ea_ref[...], WeA_ref[...]) + beA_ref[...]      # (EP, L*DP) f32

    h = x_ref[...]                       # (NP, DP) f32, carried node features
    vn = jnp.zeros((GP, DP), f32)        # virtual-node embedding, init = 0

    for l in range(L):                   # static unroll (L is small & static)
        # h_list[l] = h + vn_embedding[batch]; dead on layer 0 (vn == 0), so skipped.
        if l > 0:
            h = h + mm(B, vn)
        h_b = h.astype(bf16)

        # Fused gather + pool: the src-gather and pool matrices share h_b as RHS,
        # so they run as a single MXU pass; slices are sublane-aligned (EP % 8 == 0).
        gp = mm(SB, h_b)                                     # (EP+GP, DP)
        gathered = gp[:EP]                                   # x[src]

        # ---- GINConv (linear edge encoder; both BNs folded into the linears) ----
        edge_emb = edge_emb_all[:, l * DP:(l + 1) * DP]
        msg = jnp.maximum(gathered + edge_emb, 0.0)          # relu(x_src + e)
        agg = mm(AdT, msg)                                   # scatter-add to dst
        pre = h + agg                                        # (1+eps)*h with eps = 0
        z = jnp.maximum(mm(pre, W1_ref[l]) + b1_ref[l], 0.0)  # Lin + BN + ReLU (folded)
        h_out = mm(z, W2_ref[l]) + b2_ref[l]                 # Lin + outer BN (folded)

        if l != L - 1:
            h_out = jnp.maximum(h_out, 0.0)                  # ReLU except last layer
        h_new = h_out + h                                    # residual = True

        # ---- virtual-node update (module has exactly L-1 vn MLPs; skip last layer) ----
        if l != L - 1:
            pool = gp[EP:]                                   # global_add_pool(h_list[l])
            z1 = jnp.maximum(mm(pool + vn, vW1_ref[l]) + vb1_ref[l], 0.0)
            vn = vn + mm(z1, vW2_ref[l]) + vb2_ref[l]        # residual vn update
            # NOTE: vn rows for padded graphs g >= G become nonzero here
            # (relu(folded bias) != 0).  They are provably inert because the
            # corresponding columns of B / rows of B^T are identically zero --
            # do not change B's padding to anything other than zeros.

        h = h_new

    out_ref[...] = h                                         # JK = 'last'


# ----------------------------------------------------------------- wrapper ---
def _fold_bn(bn):
    # bn: (K, 4, C) rows = [gamma, beta, running_mean, running_var]
    gamma, beta, mean, var = bn[:, 0], bn[:, 1], bn[:, 2], bn[:, 3]
    scale = gamma * jax.lax.rsqrt(var + BN_EPS)              # (K, C)
    shift = beta - mean * scale
    return scale[:, None, :], shift[:, None, :]              # (K, 1, C)


def _pad_to(a, targets):
    # targets: {axis: padded_size}; zero padding appended at the end of the axis.
    widths = [(0, 0)] * a.ndim
    for ax, tgt in targets.items():
        widths[ax] = (0, tgt - a.shape[ax])
    return jnp.pad(a, widths)


def _nbytes(*arrs):
    return int(sum(a.size * a.dtype.itemsize for a in arrs))


def molecule_gnn_vn_forward(x, edge_index, edge_attr, batch, params, num_graphs=None):
    N, D = x.shape
    E = edge_index.shape[1]
    L = params["W1"].shape[0]
    H = params["W1"].shape[2]
    # NOTE: int(batch[-1]) forces host concretization; pass num_graphs under jit.
    G = int(batch[-1]) + 1 if num_graphs is None else num_graphs

    bf16 = jnp.bfloat16
    DP = _round_up(D, LANE)    # lane-dense feature dim
    HP = _round_up(H, LANE)    # lane-dense MLP hidden dim
    NP = _round_up(N, LANE)    # node count: lane/K dim of gather & pool matmuls
    EP = _round_up(E, LANE)    # edge count: lane/K dim of the scatter matmul
    GP = _round_up(G, LANE)    # graph count: lane/K dim of the vn broadcast matmul

    # Pad index arrays with -1: one_hot(-1) == all-zeros, so padded edges never gather
    # from / scatter to real nodes, and padded nodes never contribute to any pool.
    src = jnp.concatenate([edge_index[0].astype(jnp.int32),
                           -jnp.ones((EP - E,), jnp.int32)])
    dst = jnp.concatenate([edge_index[1].astype(jnp.int32),
                           -jnp.ones((EP - E,), jnp.int32)])
    batch_p = jnp.concatenate([batch.astype(jnp.int32),
                               -jnp.ones((NP - N,), jnp.int32)])

    # Dense one-hot gather/scatter/pool matrices in bf16 (exact for 0/1), lane-dense in
    # every dimension and pre-transposed so the kernel only ever does plain jnp.dot.
    # The src-gather and pool matrices are stacked to share one MXU pass (same RHS).
    As = jax.nn.one_hot(src, NP, dtype=bf16)                 # (EP, NP)
    BT = jax.nn.one_hot(batch_p, GP, dtype=bf16).T           # (GP, NP)
    SB = jnp.concatenate([As, BT], axis=0)                   # (EP+GP, NP)
    AdT = jax.nn.one_hot(dst, NP, dtype=bf16).T              # (NP, EP)
    Bm = jax.nn.one_hot(batch_p, GP, dtype=bf16)             # (NP, GP)

    # Fold inference BatchNorms into the adjacent Linears (eval mode => exact).
    s1, t1 = _fold_bn(params["bn1"])
    sL, tL = _fold_bn(params["bnL"])
    sv, tv = _fold_bn(params["vbn"])
    W1 = params["W1"] * s1
    b1 = params["b1"] * s1 + t1
    W2 = params["W2"] * sL
    b2 = params["b2"] * sL + tL
    vW1 = params["vW1"] * sv
    vb1 = params["vb1"] * sv + tv

    # Edge-encoder weights for all L layers concatenated along the output dim so the
    # kernel runs a single (EP, De)x(De, L*DP) matmul before the layer loop.
    WeA = jnp.concatenate([_pad_to(params["We"][l], {1: DP}) for l in range(L)],
                          axis=1).astype(bf16)               # (De, L*DP)
    beA = jnp.concatenate([_pad_to(params["be"][l], {1: DP}) for l in range(L)],
                          axis=1)                            # (1, L*DP) f32

    # Zero-pad feature dims to 128 lanes; weights bf16 (f32 accumulation in-kernel),
    # biases stay f32 (added after the f32 accumulation).  Padded lanes stay exactly 0.
    W1_p = _pad_to(W1, {1: DP, 2: HP}).astype(bf16)
    b1_p = _pad_to(b1, {2: HP})
    W2_p = _pad_to(W2, {1: HP, 2: DP}).astype(bf16)
    b2_p = _pad_to(b2, {2: DP})
    vW1_p = _pad_to(vW1, {1: DP, 2: DP}).astype(bf16)        # (L-1, DP, DP)
    vb1_p = _pad_to(vb1, {2: DP})
    vW2_p = _pad_to(params["vW2"], {1: DP, 2: DP}).astype(bf16)
    vb2_p = _pad_to(params["vb2"], {2: DP})

    x_p = _pad_to(x.astype(jnp.float32), {0: NP, 1: DP})
    ea_p = _pad_to(edge_attr, {0: EP}).astype(bf16)          # (EP, De); K = De stays tiny

    inputs = (x_p, Bm, SB, AdT, ea_p, WeA, beA, W1_p, b1_p, W2_p, b2_p,
              vW1_p, vb1_p, vW2_p, vb2_p)

    # VMEM budget: whole problem resident once (no grid, single scheduling window).
    # Derived from the physical VMEM size (v5e/v6e 128 MiB, v7x 64 MiB) instead of a
    # fixed 32 MiB cap; ~4x headroom over the resident inputs covers f32 intermediates.
    try:
        phys_vmem = int(pltpu.get_tpu_info().vmem_capacity_bytes)
    except Exception:
        phys_vmem = 64 * 1024 * 1024     # conservative: v7x per-TC (smallest generation)
    resident = _nbytes(*inputs) + NP * DP * 4                # + output tile
    vmem_limit = int(min(max(32 * 1024 * 1024, 4 * resident), int(0.75 * phys_vmem)))

    out = pl.pallas_call(
        gnn_vn_kernel,
        out_shape=jax.ShapeDtypeStruct((NP, DP), jnp.float32),
        # No grid: layers unrolled in-kernel, all operands VMEM-resident once
        # (default whole-array blocks, single-buffered).
        compiler_params=pltpu.CompilerParams(vmem_limit_bytes=vmem_limit),
    )(*inputs)

    return out[:N, :D]


# ------------------------------------------------------------ param init -----
def _make_bn(key, K, C):
    k1, k2, k3, k4 = jax.random.split(key, 4)
    gamma = 1.0 + 0.1 * jax.random.normal(k1, (K, 1, C), jnp.float32)
    beta = 0.1 * jax.random.normal(k2, (K, 1, C), jnp.float32)
    mean = 0.1 * jax.random.normal(k3, (K, 1, C), jnp.float32)
    var = 1.0 + 0.1 * jnp.abs(jax.random.normal(k4, (K, 1, C), jnp.float32))
    return jnp.concatenate([gamma, beta, mean, var], axis=1)  # (K, 4, C)


def init_params(key, L, D, De):
    ks = jax.random.split(key, 16)
    s = 0.1
    rn = lambda k, shape: s * jax.random.normal(k, shape, jnp.float32)
    return dict(
        We=rn(ks[0], (L, De, D)), be=rn(ks[1], (L, 1, D)),
        W1=rn(ks[2], (L, D, 2 * D)), b1=rn(ks[3], (L, 1, 2 * D)),
        bn1=_make_bn(ks[4], L, 2 * D),
        W2=rn(ks[5], (L, 2 * D, D)), b2=rn(ks[6], (L, 1, D)),
        bnL=_make_bn(ks[7], L, D),
        # The torch module has exactly L-1 virtual-node MLPs.
        vW1=rn(ks[8], (L - 1, D, D)), vb1=rn(ks[9], (L - 1, 1, D)),
        vbn=_make_bn(ks[10], L - 1, D),
        vW2=rn(ks[11], (L - 1, D, D)), vb2=rn(ks[12], (L - 1, 1, D)),
    )


# ----------------------------------------------------------- pure-JAX ref ----
def reference_forward(x, edge_index, edge_attr, batch, params, num_graphs):
    """Gold standard: original module math, unfolded params, f32 'highest' precision."""
    N, D = x.shape
    L = params["W1"].shape[0]
    G = num_graphs
    hp = jax.lax.Precision.HIGHEST
    dot = lambda a, b: jnp.dot(a, b, precision=hp)

    B = jax.nn.one_hot(batch, G, dtype=jnp.float32)
    Asrc = jax.nn.one_hot(edge_index[0], N, dtype=jnp.float32)
    Adst = jax.nn.one_hot(edge_index[1], N, dtype=jnp.float32)

    def bn(z, p):
        return (z - p[2]) / jnp.sqrt(p[3] + BN_EPS) * p[0] + p[1]

    h = x
    vn = jnp.zeros((G, D), jnp.float32)
    for l in range(L):
        h = h + dot(B, vn)
        ee = dot(edge_attr, params["We"][l]) + params["be"][l][0]
        msg = jax.nn.relu(dot(Asrc, h) + ee)
        agg = dot(Adst.T, msg)
        pre = h + agg                                   # GIN eps = 0
        z = jax.nn.relu(bn(dot(pre, params["W1"][l]) + params["b1"][l][0], params["bn1"][l]))
        hc = dot(z, params["W2"][l]) + params["b2"][l][0]
        hb = bn(hc, params["bnL"][l])
        ha = hb if l == L - 1 else jax.nn.relu(hb)
        h_new = ha + h
        if l != L - 1:
            pool = dot(B.T, h)
            z1 = jax.nn.relu(bn(dot(pool + vn, params["vW1"][l]) + params["vb1"][l][0],
                                params["vbn"][l]))
            vn = vn + dot(z1, params["vW2"][l]) + params["vb2"][l][0]
        h = h_new
    return h


# ------------------------------------------------------------------- main ----
if __name__ == "__main__":
    N, D, De, L, G = 32, 32, 8, 3, 2
    nodes_per_graph = N // G
    E_per = 32

    key = jax.random.PRNGKey(0)
    k_x, k_ea, k_e1, k_e2, k_p = jax.random.split(key, 5)

    x = 0.1 * jax.random.normal(k_x, (N, D), jnp.float32)
    edge_attr = 0.1 * jax.random.normal(k_ea, (E_per * G, De), jnp.float32)

    srcs = jax.random.randint(k_e1, (G, E_per), 0, nodes_per_graph)
    dsts = jax.random.randint(k_e2, (G, E_per), 0, nodes_per_graph)
    offsets = (jnp.arange(G) * nodes_per_graph)[:, None]
    edge_index = jnp.stack([(srcs + offsets).reshape(-1),
                            (dsts + offsets).reshape(-1)], axis=0).astype(jnp.int32)
    batch = jnp.repeat(jnp.arange(G, dtype=jnp.int32), nodes_per_graph)

    params = init_params(k_p, L, D, De)

    out = molecule_gnn_vn_forward(x, edge_index, edge_attr, batch, params, num_graphs=G)
    out = jax.block_until_ready(out)

    ref = reference_forward(x, edge_index, edge_attr, batch, params, num_graphs=G)
    assert out.shape == (N, D)
    err = float(jnp.max(jnp.abs(out - ref)))
    # Kernel uses bf16 MXU operands with f32 accumulation (standard TPU inference
    # numerics); reference is f32 / 'highest'.  Tolerance sized for that gap.
    assert bool(jnp.allclose(out, ref, rtol=2e-2, atol=2e-2)), \
        f"mismatch, max abs err = {err}"
    print("KERNEL_OK")
</pallas_src>

<mosaic_0001>
module attributes {stable_mosaic.version = 11 : i64} {
  func.func @gnn_vn_kernel(%arg0: memref<128x128xf32, #tpu.memory_space<vmem>>, %arg1: memref<128x128xbf16, #tpu.memory_space<vmem>>, %arg2: memref<256x128xbf16, #tpu.memory_space<vmem>>, %arg3: memref<128x128xbf16, #tpu.memory_space<vmem>>, %arg4: memref<128x8xbf16, #tpu.memory_space<vmem>>, %arg5: memref<8x384xbf16, #tpu.memory_space<vmem>>, %arg6: memref<1x384xf32, #tpu.memory_space<vmem>>, %arg7: memref<3x128x128xbf16, #tpu.memory_space<vmem>>, %arg8: memref<3x1x128xf32, #tpu.memory_space<vmem>>, %arg9: memref<3x128x128xbf16, #tpu.memory_space<vmem>>, %arg10: memref<3x1x128xf32, #tpu.memory_space<vmem>>, %arg11: memref<2x128x128xbf16, #tpu.memory_space<vmem>>, %arg12: memref<2x1x128xf32, #tpu.memory_space<vmem>>, %arg13: memref<2x128x128xbf16, #tpu.memory_space<vmem>>, %arg14: memref<2x1x128xf32, #tpu.memory_space<vmem>>, %arg15: memref<128x128xf32, #tpu.memory_space<vmem>>) attributes {dimension_semantics = [], scalar_prefetch = 0 : i64, scratch_operands = 0 : i64, tpu.core_type = #tpu.core_type<tc>} {
    %c0 = arith.constant 0 : index
    %c0_0 = arith.constant 0 : index
    %0 = vector.load %arg1[%c0, %c0_0] : memref<128x128xbf16, #tpu.memory_space<vmem>>, vector<128x128xbf16>
    %c0_1 = arith.constant 0 : index
    %c0_2 = arith.constant 0 : index
    %1 = vector.load %arg2[%c0_1, %c0_2] : memref<256x128xbf16, #tpu.memory_space<vmem>>, vector<256x128xbf16>
    %c0_3 = arith.constant 0 : index
    %c0_4 = arith.constant 0 : index
    %2 = vector.load %arg3[%c0_3, %c0_4] : memref<128x128xbf16, #tpu.memory_space<vmem>>, vector<128x128xbf16>
    %c0_5 = arith.constant 0 : index
    %c0_6 = arith.constant 0 : index
    %3 = vector.load %arg4[%c0_5, %c0_6] : memref<128x8xbf16, #tpu.memory_space<vmem>>, vector<128x8xbf16>
    %c0_7 = arith.constant 0 : index
    %c0_8 = arith.constant 0 : index
    %4 = vector.load %arg5[%c0_7, %c0_8] : memref<8x384xbf16, #tpu.memory_space<vmem>>, vector<8x384xbf16>
    %cst = arith.constant dense<0.000000e+00> : vector<128x384xf32>
    %5 = tpu.matmul %3, %4, %cst {dimension_numbers = #tpu.dot_dimension_numbers<[1], [0], [0], [1], [0, 0, 1, 1], [], []>} : vector<128x8xbf16>, vector<8x384xbf16>, vector<128x384xf32> -> vector<128x384xf32>
    %c0_9 = arith.constant 0 : index
    %c0_10 = arith.constant 0 : index
    %6 = vector.load %arg6[%c0_9, %c0_10] : memref<1x384xf32, #tpu.memory_space<vmem>>, vector<1x384xf32>
    %7 = vector.broadcast %6 : vector<1x384xf32> to vector<128x384xf32>
    %8 = arith.addf %5, %7 : vector<128x384xf32>
    %c0_11 = arith.constant 0 : index
    %c0_12 = arith.constant 0 : index
    %9 = vector.load %arg0[%c0_11, %c0_12] : memref<128x128xf32, #tpu.memory_space<vmem>>, vector<128x128xf32>
    %cst_13 = arith.constant 0.000000e+00 : f32
    %10 = vector.broadcast %cst_13 : f32 to vector<128x128xf32>
    %11 = arith.truncf %9 : vector<128x128xf32> to vector<128x128xbf16>
    %cst_14 = arith.constant dense<0.000000e+00> : vector<256x128xf32>
    %12 = tpu.matmul %1, %11, %cst_14 {dimension_numbers = #tpu.dot_dimension_numbers<[1], [0], [0], [1], [0, 0, 1, 1], [], []>} : vector<256x128xbf16>, vector<128x128xbf16>, vector<256x128xf32> -> vector<256x128xf32>
    %13 = vector.extract_strided_slice %12 {offsets = [0, 0], sizes = [128, 128], strides = [1, 1]} : vector<256x128xf32> to vector<128x128xf32>
    %14 = vector.extract_strided_slice %8 {offsets = [0, 0], sizes = [128, 128], strides = [1, 1]} : vector<128x384xf32> to vector<128x128xf32>
    %15 = arith.addf %13, %14 : vector<128x128xf32>
    %cst_15 = arith.constant 0.000000e+00 : f32
    %16 = vector.broadcast %cst_15 : f32 to vector<128x128xf32>
    %17 = arith.maximumf %15, %16 : vector<128x128xf32>
    %18 = arith.truncf %17 : vector<128x128xf32> to vector<128x128xbf16>
    %cst_16 = arith.constant dense<0.000000e+00> : vector<128x128xf32>
    %19 = tpu.matmul %2, %18, %cst_16 {dimension_numbers = #tpu.dot_dimension_numbers<[1], [0], [0], [1], [0, 0, 1, 1], [], []>} : vector<128x128xbf16>, vector<128x128xbf16>, vector<128x128xf32> -> vector<128x128xf32>
    %20 = arith.addf %9, %19 : vector<128x128xf32>
    %c0_17 = arith.constant 0 : index
    %c0_18 = arith.constant 0 : index
    %c0_19 = arith.constant 0 : index
    %21 = vector.load %arg7[%c0_17, %c0_18, %c0_19] : memref<3x128x128xbf16, #tpu.memory_space<vmem>>, vector<1x128x128xbf16>
    %22 = vector.shape_cast %21 : vector<1x128x128xbf16> to vector<128x128xbf16>
    %23 = arith.truncf %20 : vector<128x128xf32> to vector<128x128xbf16>
    %cst_20 = arith.constant dense<0.000000e+00> : vector<128x128xf32>
    %24 = tpu.matmul %23, %22, %cst_20 {dimension_numbers = #tpu.dot_dimension_numbers<[1], [0], [0], [1], [0, 0, 1, 1], [], []>} : vector<128x128xbf16>, vector<128x128xbf16>, vector<128x128xf32> -> vector<128x128xf32>
    %c0_21 = arith.constant 0 : index
    %c0_22 = arith.constant 0 : index
    %c0_23 = arith.constant 0 : index
    %25 = vector.load %arg8[%c0_21, %c0_22, %c0_23] : memref<3x1x128xf32, #tpu.memory_space<vmem>>, vector<1x1x128xf32>
    %26 = vector.shape_cast %25 : vector<1x1x128xf32> to vector<1x128xf32>
    %27 = vector.broadcast %26 : vector<1x128xf32> to vector<128x128xf32>
    %28 = arith.addf %24, %27 : vector<128x128xf32>
    %cst_24 = arith.constant 0.000000e+00 : f32
    %29 = vector.broadcast %cst_24 : f32 to vector<128x128xf32>
    %30 = arith.maximumf %28, %29 : vector<128x128xf32>
    %c0_25 = arith.constant 0 : index
    %c0_26 = arith.constant 0 : index
    %c0_27 = arith.constant 0 : index
    %31 = vector.load %arg9[%c0_25, %c0_26, %c0_27] : memref<3x128x128xbf16, #tpu.memory_space<vmem>>, vector<1x128x128xbf16>
    %32 = vector.shape_cast %31 : vector<1x128x128xbf16> to vector<128x128xbf16>
    %33 = arith.truncf %30 : vector<128x128xf32> to vector<128x128xbf16>
    %cst_28 = arith.constant dense<0.000000e+00> : vector<128x128xf32>
    %34 = tpu.matmul %33, %32, %cst_28 {dimension_numbers = #tpu.dot_dimension_numbers<[1], [0], [0], [1], [0, 0, 1, 1], [], []>} : vector<128x128xbf16>, vector<128x128xbf16>, vector<128x128xf32> -> vector<128x128xf32>
    %c0_29 = arith.constant 0 : index
    %c0_30 = arith.constant 0 : index
    %c0_31 = arith.constant 0 : index
    %35 = vector.load %arg10[%c0_29, %c0_30, %c0_31] : memref<3x1x128xf32, #tpu.memory_space<vmem>>, vector<1x1x128xf32>
    %36 = vector.shape_cast %35 : vector<1x1x128xf32> to vector<1x128xf32>
    %37 = vector.broadcast %36 : vector<1x128xf32> to vector<128x128xf32>
    %38 = arith.addf %34, %37 : vector<128x128xf32>
    %cst_32 = arith.constant 0.000000e+00 : f32
    %39 = vector.broadcast %cst_32 : f32 to vector<128x128xf32>
    %40 = arith.maximumf %38, %39 : vector<128x128xf32>
    %41 = arith.addf %40, %9 : vector<128x128xf32>
    %42 = vector.extract_strided_slice %12 {offsets = [128, 0], sizes = [128, 128], strides = [1, 1]} : vector<256x128xf32> to vector<128x128xf32>
    %43 = arith.addf %42, %10 : vector<128x128xf32>
    %c0_33 = arith.constant 0 : index
    %c0_34 = arith.constant 0 : index
    %c0_35 = arith.constant 0 : index
    %44 = vector.load %arg11[%c0_33, %c0_34, %c0_35] : memref<2x128x128xbf16, #tpu.memory_space<vmem>>, vector<1x128x128xbf16>
    %45 = vector.shape_cast %44 : vector<1x128x128xbf16> to vector<128x128xbf16>
    %46 = arith.truncf %43 : vector<128x128xf32> to vector<128x128xbf16>
    %cst_36 = arith.constant dense<0.000000e+00> : vector<128x128xf32>
    %47 = tpu.matmul %46, %45, %cst_36 {dimension_numbers = #tpu.dot_dimension_numbers<[1], [0], [0], [1], [0, 0, 1, 1], [], []>} : vector<128x128xbf16>, vector<128x128xbf16>, vector<128x128xf32> -> vector<128x128xf32>
    %c0_37 = arith.constant 0 : index
    %c0_38 = arith.constant 0 : index
    %c0_39 = arith.constant 0 : index
    %48 = vector.load %arg12[%c0_37, %c0_38, %c0_39] : memref<2x1x128xf32, #tpu.memory_space<vmem>>, vector<1x1x128xf32>
    %49 = vector.shape_cast %48 : vector<1x1x128xf32> to vector<1x128xf32>
    %50 = vector.broadcast %49 : vector<1x128xf32> to vector<128x128xf32>
    %51 = arith.addf %47, %50 : vector<128x128xf32>
    %cst_40 = arith.constant 0.000000e+00 : f32
    %52 = vector.broadcast %cst_40 : f32 to vector<128x128xf32>
    %53 = arith.maximumf %51, %52 : vector<128x128xf32>
    %c0_41 = arith.constant 0 : index
    %c0_42 = arith.constant 0 : index
    %c0_43 = arith.constant 0 : index
    %54 = vector.load %arg13[%c0_41, %c0_42, %c0_43] : memref<2x128x128xbf16, #tpu.memory_space<vmem>>, vector<1x128x128xbf16>
    %55 = vector.shape_cast %54 : vector<1x128x128xbf16> to vector<128x128xbf16>
    %56 = arith.truncf %53 : vector<128x128xf32> to vector<128x128xbf16>
    %cst_44 = arith.constant dense<0.000000e+00> : vector<128x128xf32>
    %57 = tpu.matmul %56, %55, %cst_44 {dimension_numbers = #tpu.dot_dimension_numbers<[1], [0], [0], [1], [0, 0, 1, 1], [], []>} : vector<128x128xbf16>, vector<128x128xbf16>, vector<128x128xf32> -> vector<128x128xf32>
    %58 = arith.addf %10, %57 : vector<128x128xf32>
    %c0_45 = arith.constant 0 : index
    %c0_46 = arith.constant 0 : index
    %c0_47 = arith.constant 0 : index
    %59 = vector.load %arg14[%c0_45, %c0_46, %c0_47] : memref<2x1x128xf32, #tpu.memory_space<vmem>>, vector<1x1x128xf32>
    %60 = vector.shape_cast %59 : vector<1x1x128xf32> to vector<1x128xf32>
    %61 = vector.broadcast %60 : vector<1x128xf32> to vector<128x128xf32>
    %62 = arith.addf %58, %61 : vector<128x128xf32>
    %63 = arith.truncf %62 : vector<128x128xf32> to vector<128x128xbf16>
    %cst_48 = arith.constant dense<0.000000e+00> : vector<128x128xf32>
    %64 = tpu.matmul %0, %63, %cst_48 {dimension_numbers = #tpu.dot_dimension_numbers<[1], [0], [0], [1], [0, 0, 1, 1], [], []>} : vector<128x128xbf16>, vector<128x128xbf16>, vector<128x128xf32> -> vector<128x128xf32>
    %65 = arith.addf %41, %64 : vector<128x128xf32>
    %66 = arith.truncf %65 : vector<128x128xf32> to vector<128x128xbf16>
    %cst_49 = arith.constant dense<0.000000e+00> : vector<256x128xf32>
    %67 = tpu.matmul %1, %66, %cst_49 {dimension_numbers = #tpu.dot_dimension_numbers<[1], [0], [0], [1], [0, 0, 1, 1], [], []>} : vector<256x128xbf16>, vector<128x128xbf16>, vector<256x128xf32> -> vector<256x128xf32>
    %68 = vector.extract_strided_slice %67 {offsets = [0, 0], sizes = [128, 128], strides = [1, 1]} : vector<256x128xf32> to vector<128x128xf32>
    %69 = vector.extract_strided_slice %8 {offsets = [0, 128], sizes = [128, 128], strides = [1, 1]} : vector<128x384xf32> to vector<128x128xf32>
    %70 = arith.addf %68, %69 : vector<128x128xf32>
    %cst_50 = arith.constant 0.000000e+00 : f32
    %71 = vector.broadcast %cst_50 : f32 to vector<128x128xf32>
    %72 = arith.maximumf %70, %71 : vector<128x128xf32>
    %73 = arith.truncf %72 : vector<128x128xf32> to vector<128x128xbf16>
    %cst_51 = arith.constant dense<0.000000e+00> : vector<128x128xf32>
    %74 = tpu.matmul %2, %73, %cst_51 {dimension_numbers = #tpu.dot_dimension_numbers<[1], [0], [0], [1], [0, 0, 1, 1], [], []>} : vector<128x128xbf16>, vector<128x128xbf16>, vector<128x128xf32> -> vector<128x128xf32>
    %75 = arith.addf %65, %74 : vector<128x128xf32>
    %c1 = arith.constant 1 : index
    %c0_52 = arith.constant 0 : index
    %c0_53 = arith.constant 0 : index
    %76 = vector.load %arg7[%c1, %c0_52, %c0_53] : memref<3x128x128xbf16, #tpu.memory_space<vmem>>, vector<1x128x128xbf16>
    %77 = vector.shape_cast %76 : vector<1x128x128xbf16> to vector<128x128xbf16>
    %78 = arith.truncf %75 : vector<128x128xf32> to vector<128x128xbf16>
    %cst_54 = arith.constant dense<0.000000e+00> : vector<128x128xf32>
    %79 = tpu.matmul %78, %77, %cst_54 {dimension_numbers = #tpu.dot_dimension_numbers<[1], [0], [0], [1], [0, 0, 1, 1], [], []>} : vector<128x128xbf16>, vector<128x128xbf16>, vector<128x128xf32> -> vector<128x128xf32>
    %c1_55 = arith.constant 1 : index
    %c0_56 = arith.constant 0 : index
    %c0_57 = arith.constant 0 : index
    %80 = vector.load %arg8[%c1_55, %c0_56, %c0_57] : memref<3x1x128xf32, #tpu.memory_space<vmem>>, vector<1x1x128xf32>
    %81 = vector.shape_cast %80 : vector<1x1x128xf32> to vector<1x128xf32>
    %82 = vector.broadcast %81 : vector<1x128xf32> to vector<128x128xf32>
    %83 = arith.addf %79, %82 : vector<128x128xf32>
    %cst_58 = arith.constant 0.000000e+00 : f32
    %84 = vector.broadcast %cst_58 : f32 to vector<128x128xf32>
    %85 = arith.maximumf %83, %84 : vector<128x128xf32>
    %c1_59 = arith.constant 1 : index
    %c0_60 = arith.constant 0 : index
    %c0_61 = arith.constant 0 : index
    %86 = vector.load %arg9[%c1_59, %c0_60, %c0_61] : memref<3x128x128xbf16, #tpu.memory_space<vmem>>, vector<1x128x128xbf16>
    %87 = vector.shape_cast %86 : vector<1x128x128xbf16> to vector<128x128xbf16>
    %88 = arith.truncf %85 : vector<128x128xf32> to vector<128x128xbf16>
    %cst_62 = arith.constant dense<0.000000e+00> : vector<128x128xf32>
    %89 = tpu.matmul %88, %87, %cst_62 {dimension_numbers = #tpu.dot_dimension_numbers<[1], [0], [0], [1], [0, 0, 1, 1], [], []>} : vector<128x128xbf16>, vector<128x128xbf16>, vector<128x128xf32> -> vector<128x128xf32>
    %c1_63 = arith.constant 1 : index
    %c0_64 = arith.constant 0 : index
    %c0_65 = arith.constant 0 : index
    %90 = vector.load %arg10[%c1_63, %c0_64, %c0_65] : memref<3x1x128xf32, #tpu.memory_space<vmem>>, vector<1x1x128xf32>
    %91 = vector.shape_cast %90 : vector<1x1x128xf32> to vector<1x128xf32>
    %92 = vector.broadcast %91 : vector<1x128xf32> to vector<128x128xf32>
    %93 = arith.addf %89, %92 : vector<128x128xf32>
    %cst_66 = arith.constant 0.000000e+00 : f32
    %94 = vector.broadcast %cst_66 : f32 to vector<128x128xf32>
    %95 = arith.maximumf %93, %94 : vector<128x128xf32>
    %96 = arith.addf %95, %65 : vector<128x128xf32>
    %97 = vector.extract_strided_slice %67 {offsets = [128, 0], sizes = [128, 128], strides = [1, 1]} : vector<256x128xf32> to vector<128x128xf32>
    %98 = arith.addf %97, %62 : vector<128x128xf32>
    %c1_67 = arith.constant 1 : index
    %c0_68 = arith.constant 0 : index
    %c0_69 = arith.constant 0 : index
    %99 = vector.load %arg11[%c1_67, %c0_68, %c0_69] : memref<2x128x128xbf16, #tpu.memory_space<vmem>>, vector<1x128x128xbf16>
    %100 = vector.shape_cast %99 : vector<1x128x128xbf16> to vector<128x128xbf16>
    %101 = arith.truncf %98 : vector<128x128xf32> to vector<128x128xbf16>
    %cst_70 = arith.constant dense<0.000000e+00> : vector<128x128xf32>
    %102 = tpu.matmul %101, %100, %cst_70 {dimension_numbers = #tpu.dot_dimension_numbers<[1], [0], [0], [1], [0, 0, 1, 1], [], []>} : vector<128x128xbf16>, vector<128x128xbf16>, vector<128x128xf32> -> vector<128x128xf32>
    %c1_71 = arith.constant 1 : index
    %c0_72 = arith.constant 0 : index
    %c0_73 = arith.constant 0 : index
    %103 = vector.load %arg12[%c1_71, %c0_72, %c0_73] : memref<2x1x128xf32, #tpu.memory_space<vmem>>, vector<1x1x128xf32>
    %104 = vector.shape_cast %103 : vector<1x1x128xf32> to vector<1x128xf32>
    %105 = vector.broadcast %104 : vector<1x128xf32> to vector<128x128xf32>
    %106 = arith.addf %102, %105 : vector<128x128xf32>
    %cst_74 = arith.constant 0.000000e+00 : f32
    %107 = vector.broadcast %cst_74 : f32 to vector<128x128xf32>
    %108 = arith.maximumf %106, %107 : vector<128x128xf32>
    %c1_75 = arith.constant 1 : index
    %c0_76 = arith.constant 0 : index
    %c0_77 = arith.constant 0 : index
    %109 = vector.load %arg13[%c1_75, %c0_76, %c0_77] : memref<2x128x128xbf16, #tpu.memory_space<vmem>>, vector<1x128x128xbf16>
    %110 = vector.shape_cast %109 : vector<1x128x128xbf16> to vector<128x128xbf16>
    %111 = arith.truncf %108 : vector<128x128xf32> to vector<128x128xbf16>
    %cst_78 = arith.constant dense<0.000000e+00> : vector<128x128xf32>
    %112 = tpu.matmul %111, %110, %cst_78 {dimension_numbers = #tpu.dot_dimension_numbers<[1], [0], [0], [1], [0, 0, 1, 1], [], []>} : vector<128x128xbf16>, vector<128x128xbf16>, vector<128x128xf32> -> vector<128x128xf32>
    %113 = arith.addf %62, %112 : vector<128x128xf32>
    %c1_79 = arith.constant 1 : index
    %c0_80 = arith.constant 0 : index
    %c0_81 = arith.constant 0 : index
    %114 = vector.load %arg14[%c1_79, %c0_80, %c0_81] : memref<2x1x128xf32, #tpu.memory_space<vmem>>, vector<1x1x128xf32>
    %115 = vector.shape_cast %114 : vector<1x1x128xf32> to vector<1x128xf32>
    %116 = vector.broadcast %115 : vector<1x128xf32> to vector<128x128xf32>
    %117 = arith.addf %113, %116 : vector<128x128xf32>
    %118 = arith.truncf %117 : vector<128x128xf32> to vector<128x128xbf16>
    %cst_82 = arith.constant dense<0.000000e+00> : vector<128x128xf32>
    %119 = tpu.matmul %0, %118, %cst_82 {dimension_numbers = #tpu.dot_dimension_numbers<[1], [0], [0], [1], [0, 0, 1, 1], [], []>} : vector<128x128xbf16>, vector<128x128xbf16>, vector<128x128xf32> -> vector<128x128xf32>
    %120 = arith.addf %96, %119 : vector<128x128xf32>
    %121 = arith.truncf %120 : vector<128x128xf32> to vector<128x128xbf16>
    %cst_83 = arith.constant dense<0.000000e+00> : vector<256x128xf32>
    %122 = tpu.matmul %1, %121, %cst_83 {dimension_numbers = #tpu.dot_dimension_numbers<[1], [0], [0], [1], [0, 0, 1, 1], [], []>} : vector<256x128xbf16>, vector<128x128xbf16>, vector<256x128xf32> -> vector<256x128xf32>
    %123 = vector.extract_strided_slice %122 {offsets = [0, 0], sizes = [128, 128], strides = [1, 1]} : vector<256x128xf32> to vector<128x128xf32>
    %124 = vector.extract_strided_slice %8 {offsets = [0, 256], sizes = [128, 128], strides = [1, 1]} : vector<128x384xf32> to vector<128x128xf32>
    %125 = arith.addf %123, %124 : vector<128x128xf32>
    %cst_84 = arith.constant 0.000000e+00 : f32
    %126 = vector.broadcast %cst_84 : f32 to vector<128x128xf32>
    %127 = arith.maximumf %125, %126 : vector<128x128xf32>
    %128 = arith.truncf %127 : vector<128x128xf32> to vector<128x128xbf16>
    %cst_85 = arith.constant dense<0.000000e+00> : vector<128x128xf32>
    %129 = tpu.matmul %2, %128, %cst_85 {dimension_numbers = #tpu.dot_dimension_numbers<[1], [0], [0], [1], [0, 0, 1, 1], [], []>} : vector<128x128xbf16>, vector<128x128xbf16>, vector<128x128xf32> -> vector<128x128xf32>
    %130 = arith.addf %120, %129 : vector<128x128xf32>
    %c2 = arith.constant 2 : index
    %c0_86 = arith.constant 0 : index
    %c0_87 = arith.constant 0 : index
    %131 = vector.load %arg7[%c2, %c0_86, %c0_87] : memref<3x128x128xbf16, #tpu.memory_space<vmem>>, vector<1x128x128xbf16>
    %132 = vector.shape_cast %131 : vector<1x128x128xbf16> to vector<128x128xbf16>
    %133 = arith.truncf %130 : vector<128x128xf32> to vector<128x128xbf16>
    %cst_88 = arith.constant dense<0.000000e+00> : vector<128x128xf32>
    %134 = tpu.matmul %133, %132, %cst_88 {dimension_numbers = #tpu.dot_dimension_numbers<[1], [0], [0], [1], [0, 0, 1, 1], [], []>} : vector<128x128xbf16>, vector<128x128xbf16>, vector<128x128xf32> -> vector<128x128xf32>
    %c2_89 = arith.constant 2 : index
    %c0_90 = arith.constant 0 : index
    %c0_91 = arith.constant 0 : index
    %135 = vector.load %arg8[%c2_89, %c0_90, %c0_91] : memref<3x1x128xf32, #tpu.memory_space<vmem>>, vector<1x1x128xf32>
    %136 = vector.shape_cast %135 : vector<1x1x128xf32> to vector<1x128xf32>
    %137 = vector.broadcast %136 : vector<1x128xf32> to vector<128x128xf32>
    %138 = arith.addf %134, %137 : vector<128x128xf32>
    %cst_92 = arith.constant 0.000000e+00 : f32
    %139 = vector.broadcast %cst_92 : f32 to vector<128x128xf32>
    %140 = arith.maximumf %138, %139 : vector<128x128xf32>
    %c2_93 = arith.constant 2 : index
    %c0_94 = arith.constant 0 : index
    %c0_95 = arith.constant 0 : index
    %141 = vector.load %arg9[%c2_93, %c0_94, %c0_95] : memref<3x128x128xbf16, #tpu.memory_space<vmem>>, vector<1x128x128xbf16>
    %142 = vector.shape_cast %141 : vector<1x128x128xbf16> to vector<128x128xbf16>
    %143 = arith.truncf %140 : vector<128x128xf32> to vector<128x128xbf16>
    %cst_96 = arith.constant dense<0.000000e+00> : vector<128x128xf32>
    %144 = tpu.matmul %143, %142, %cst_96 {dimension_numbers = #tpu.dot_dimension_numbers<[1], [0], [0], [1], [0, 0, 1, 1], [], []>} : vector<128x128xbf16>, vector<128x128xbf16>, vector<128x128xf32> -> vector<128x128xf32>
    %c2_97 = arith.constant 2 : index
    %c0_98 = arith.constant 0 : index
    %c0_99 = arith.constant 0 : index
    %145 = vector.load %arg10[%c2_97, %c0_98, %c0_99] : memref<3x1x128xf32, #tpu.memory_space<vmem>>, vector<1x1x128xf32>
    %146 = vector.shape_cast %145 : vector<1x1x128xf32> to vector<1x128xf32>
    %147 = vector.broadcast %146 : vector<1x128xf32> to vector<128x128xf32>
    %148 = arith.addf %144, %147 : vector<128x128xf32>
    %149 = arith.addf %148, %120 : vector<128x128xf32>
    %c0_100 = arith.constant 0 : index
    %c0_101 = arith.constant 0 : index
    %150 = vector.load %arg15[%c0_100, %c0_101] : memref<128x128xf32, #tpu.memory_space<vmem>>, vector<128x128xf32>
    tpu.vector_store %arg15[%c0_100, %c0_101], %149 {strides = array<i32>} : memref<128x128xf32, #tpu.memory_space<vmem>>, vector<128x128xf32>,
    return
  }
}

</mosaic_0001>

<bundles_post_ra>
// kernel: tpu_custom_call.1
= control target key start
LH: loop header
LB: loop body
LE: loop exit
PB: predicated region body
PF: predicated region fallthrough
CT: control target
= control target key end

     0   :  { %20 = vsyncpa [#allocation3], 0  ;;  %s4921_s0 = inlined_call_operand.hbm [shape: f32[128,128], index: 0, kind: input, shape index: {}]   ;;  %s4922_s1 = inlined_call_operand.vmem [shape: bf16[128,128], index: 1, kind: input, shape index: {}]   ;;  %s4923_s2 = inlined_call_operand.hbm [shape: bf16[256,128], index: 2, kind: input, shape index: {}]   ;;  %s4924_s3 = inlined_call_operand.hbm [shape: bf16[128,128], index: 3, kind: input, shape index: {}]   ;;  %s4925_s4 = inlined_call_operand.vmem [shape: bf16[128,8], index: 4, kind: input, shape index: {}]   ;;  %s4926_s5 = inlined_call_operand.hbm [shape: bf16[8,384], index: 5, kind: input, shape index: {}]   ;;  %s4927_s6 = inlined_call_operand.vmem [shape: f32[1,384], index: 6, kind: input, shape index: {}]   ;;  %s4928_s7 = inlined_call_operand.hbm [shape: bf16[3,128,128], index: 7, kind: input, shape index: {}]   ;;  %s4929_s8 = inlined_call_operand.vmem [shape: f32[3,1,128], index: 8, kind: input, shape index: {}]   ;;  %s4930_s9 = inlined_call_operand.hbm [shape: bf16[3,128,128], index: 9, kind: input, shape index: {}]   ;;  %s4931_s10 = inlined_call_operand.vmem [shape: f32[3,1,128], index: 10, kind: input, shape index: {}]   ;;  %s4932_s11 = inlined_call_operand.hbm [shape: bf16[2,128,128], index: 11, kind: input, shape index: {}]   ;;  %s4933_s12 = inlined_call_operand.vmem [shape: f32[2,1,128], index: 12, kind: input, shape index: {}]   ;;  %s4934_s13 = inlined_call_operand.hbm [shape: bf16[2,128,128], index: 13, kind: input, shape index: {}]   ;;  %s4935_s14 = inlined_call_operand.vmem [shape: f32[2,1,128], index: 14, kind: input, shape index: {}]   ;;  %s4936_s15 = inlined_call_operand.hbm [shape: f32[128,128], index: 15, kind: output, shape index: {}]  }
   0x1   :  { %21 = vsyncpa [#allocation6], 0 }
   0x2   :  { %22 = vsyncpa [#allocation9], 0 }
   0x3   :  { %23 = vsyncpa [#allocation12], 0 }
   0x4   :  { %24 = vsyncpa [#allocation15], 0  ;;  %s45_s20 = sshll.u32 %s4923_s2, 4  ;;  %s46_s20 = int_to_ptr.hbm [resolvable:$true] %s45_s20 }
   0x5   :  { %25 = vsyncpa [#allocation4], 0  ;;  %s3919_s21 = smov [#allocation5]   ;;  %s74_s25 = sshll.u32 %s4926_s5, 4  ;;  %s75_s25 = int_to_ptr.hbm [resolvable:$true] %s74_s25 }
   0x6   :  { %s47_s22 = sshll.u32 %s3919_s21, 4  ;;  %s3920_s26 = smov 64   ;;  %s48_s22 = int_to_ptr.vmem [resolvable:$true] %s47_s22 }
   0x7   :  { %s3921_s27 = smov 4   ;;  %s3922_s28 = smov [#allocation8]  }
   0x8   :  { %53 = dma.hbm_to_vmem [thread:$0]  %s46_s20, 2048, %s48_s22, [#allocation6], %s3920_s26, %s3920_s26, %s3921_s27  }
   0x9   :  { %s76_s29 = sshll.u32 %s3922_s28, 4  ;;  %s101_s16 = sshll.u32 %s4930_s9, 4  ;;  %s77_s29 = int_to_ptr.vmem [resolvable:$true] %s76_s29  ;;  %s102_s16 = int_to_ptr.hbm [resolvable:$true] %s101_s16 }
   0xa   :  { %79 = dma.hbm_to_vmem [thread:$0]  %s75_s25, 192, %s77_s29, [#allocation9]  }
   0xb   :  { %s30_s5 = sshll.u32 %s4921_s0, 4  ;;  %s3923_s19 = smov [#allocation11]   ;;  %s31_s5 = int_to_ptr.hbm [resolvable:$true] %s30_s5 }
   0xc   :  { %s103_s21 = sshll.u32 %s3923_s19, 4  ;;  %s3924_s20 = smov [#allocation2]   ;;  %s104_s21 = int_to_ptr.vmem [resolvable:$true] %s103_s21 }
   0xd   :  { %109 = dma.hbm_to_vmem [thread:$0]  %s102_s16, 3072, %s104_s21, [#allocation12], %s3920_s26, %s3920_s26, %s3921_s27  }
   0xe   :  { %s32_s22 = sshll.u32 %s3924_s20, 4  ;;  %s3925_s23 = smov 128   ;;  %s33_s22 = int_to_ptr.vmem [resolvable:$true] %s32_s22 }
   0xf   :  { %s3926_s9 = smov 8   ;;  %s58_s0 = sshll.u32 %s4924_s3, 4  ;;  %s59_s0 = int_to_ptr.hbm [resolvable:$true] %s58_s0 }
  0x10   :  { %38 = dma.hbm_to_vmem [thread:$0]  %s31_s5, 2048, %s33_s22, [#allocation3], %s3925_s23, %s3925_s23, %s3926_s9  }
  0x11   :  { %s3927_s28 = smov [#allocation7]   ;;  %s86_s16 = sshll.u32 %s4928_s7, 4  ;;  %s87_s16 = int_to_ptr.hbm [resolvable:$true] %s86_s16 }
  0x12   :  { %s60_s29 = sshll.u32 %s3927_s28, 4  ;;  %s3928_s17 = smov [#allocation10]   ;;  %s61_s29 = int_to_ptr.vmem [resolvable:$true] %s60_s29 }
  0x13   :  { %66 = dma.hbm_to_vmem [thread:$0]  %s59_s0, 1024, %s61_s29, [#allocation6], %s3920_s26, %s3920_s26, %s3921_s27  }
  0x14   :  { %s88_s18 = sshll.u32 %s3928_s17, 4  ;;  %s116_s21 = sshll.u32 %s4932_s11, 4  ;;  %s89_s18 = int_to_ptr.vmem [resolvable:$true] %s88_s18  ;;  %s117_s21 = int_to_ptr.hbm [resolvable:$true] %s116_s21 }
  0x15   :  { %94 = dma.hbm_to_vmem [thread:$0]  %s87_s16, 3072, %s89_s18, [#allocation9], %s3920_s26, %s3920_s26, %s3921_s27  }
  0x16   :  { %s131_s7 = sshll.u32 %s4934_s13, 4  ;;  %s3929_s22 = smov [#allocation13]   ;;  %s132_s7 = int_to_ptr.hbm [resolvable:$true] %s131_s7 }
  0x17   :  { %s118_s24 = sshll.u32 %s3929_s22, 4  ;;  %s3930_s25 = smov [#allocation14]   ;;  %s119_s24 = int_to_ptr.vmem [resolvable:$true] %s118_s24 }
  0x18   :  { %124 = dma.hbm_to_vmem [thread:$0]  %s117_s21, 2048, %s119_s24, [#allocation12], %s3920_s26, %s3920_s26, %s3921_s27  }
  0x19   :  { %s133_s11 = sshll.u32 %s3930_s25, 4  ;;  %s134_s11 = int_to_ptr.vmem [resolvable:$true] %s133_s11 }
  0x1a   :  { %139 = dma.hbm_to_vmem [thread:$0]  %s132_s7, 2048, %s134_s11, [#allocation15], %s3920_s26, %s3920_s26, %s3921_s27  }
  0x1b   :  { %3907 = dma.done.wait [#allocation3], 2048  }
  0x1c   :  { %3908 = vsyncadd [#allocation3], 4294965248 }
  0x1d   :  { %3909 = dma.done.wait [#allocation6], 3072  }
  0x1e   :  { %3910 = vsyncadd [#allocation6], 4294964224 }
  0x1f   :  { %3911 = dma.done.wait [#allocation9], 3264  }
  0x20   :  { %3912 = vsyncadd [#allocation9], 4294964032 }
  0x21   :  { %3913 = dma.done.wait [#allocation12], 5120  }
  0x22   :  { %3914 = vsyncadd [#allocation12], 4294962176 }
  0x23   :  { %3915 = dma.done.wait [#allocation15], 2048  }
  0x24   :  { %3916 = vsyncadd [#allocation15], 4294965248  ;;  %v4057_v0 = vld [vmem:[#allocation2 + $0x70] sm:$0xff]  ;;  %v4059_v1 = vld [vmem:[#allocation2 + $0x78] sm:$0xff]  ;;  %vm338_vm0 = vcmask 1043456   ;;  %vm313_vm1 = vcmask 64512  }
  0x25   :  { %4963 = vst [vmem:[#allocation23_spill] sm:$0xff] %v4057_v0  ;;  %v4061_v2 = vld [vmem:[#allocation2 + $0x60] sm:$0xff]  ;;  %v518_v3 = vpack.c.bf16 %v4059_v1, %v4057_v0  ;;  %v4065_v4 = vld [vmem:[#allocation2 + $0x68] sm:$0xff]  ;;  %v4069_v6 = vld [vmem:[#allocation2 + $0x50] sm:$0xff] }
  0x26   :  { %4964 = vst [vmem:[#allocation24_spill] sm:$0xff] %v4059_v1  ;;  %v517_v5 = vpack.c.bf16 %v4065_v4, %v4061_v2  ;;  %v4071_v7 = vld [vmem:[#allocation2 + $0x58] sm:$0xff]  ;;  %v4073_v8 = vld [vmem:[#allocation8] sm:$0xff]  ;;  %v4078_v11 = vld [vmem:[#allocation2 + $0x48] sm:$0xff] }
  0x27   :  { %4965 = vst [vmem:[#allocation25_spill] sm:$0xff] %v4061_v2  ;;  %615 = vmatpush.bf16.msra.mxu3 %v518_v3  ;;  %v307_v9 = vunpack.c.l.b16 %v4073_v8  ;;  %v4076_v10 = vld [vmem:[#allocation2 + $0x40] sm:$0xff]  ;;  %v516_v12 = vpack.c.bf16 %v4071_v7, %v4069_v6  ;;  %v4090_v17 = vld [vmem:[#allocation2 + $0x30] sm:$0xff]  ;;  %v4092_v18 = vld [vmem:[#allocation2 + $0x38] sm:$0xff] }
  0x28   :  { %4966 = vst [vmem:[#allocation26_spill] sm:$0xff] %v4065_v4  ;;  %v4086_v15 = vld [vmem:[%s4925_s4] sm:$0xff]  ;;  %v515_v16 = vpack.c.bf16 %v4078_v11, %v4076_v10  ;;  %v514_v19 = vpack.c.bf16 %v4092_v18, %v4090_v17  ;;  %v4100_v21 = vld [vmem:[#allocation2 + $0x28] sm:$0xff]  ;;  %v4104_v23 = vld [vmem:[#allocation2 + $0x10] sm:$0xff] }
  0x29   :  { %v310_v13 = vpack.c.b16 %v307_v9, %v307_v9  ;;  %v4098_v20 = vld [vmem:[#allocation2 + $0x20] sm:$0xff]  ;;  %v4106_v24 = vld [vmem:[#allocation2 + $0x18] sm:$0xff]  ;;  %v4112_v27 = vld [vmem:[#allocation2 + $0x8] sm:$0xff] }
  0x2a   :  { %v513_v22 = vpack.c.bf16 %v4100_v21, %v4098_v20  ;;  %v512_v25 = vpack.c.bf16 %v4106_v24, %v4104_v23  ;;  %v4110_v26 = vld [vmem:[#allocation2] sm:$0xff]  ;;  %v4117_v28 = vld [vmem:[%s4925_s4 + $0x8] sm:$0xff]  ;;  %v4126_v31 = vld [vmem:[%s4925_s4 + $0x10] sm:$0xff] }
  0x2b   :  { %616 = vmatpush.bf16.msra.mxu3 %v517_v5  ;;  %v340_v14 = vsel %vm338_vm0, %v310_v13, 0  ;;  %v511_v29 = vpack.c.bf16 %v4112_v27, %v4110_v26  ;;  %v3482_v30 = vld [vmem:[#allocation5] sm:$0xff]  ;;  %v3483_v32 = vld [vmem:[#allocation5 + $0x8] sm:$0xff]  ;;  %v4133_v33 = vld [vmem:[%s4925_s4 + $0x18] sm:$0xff] }
  0x2c   :  { %355 = vmatpush.bf16.msra.mxu0 %v340_v14  ;;  %v3484_v34 = vld [vmem:[#allocation5 + $0x10] sm:$0xff]  ;;  %v4140_v35 = vld [vmem:[%s4925_s4 + $0x20] sm:$0xff]  ;;  %v3485_v36 = vld [vmem:[#allocation5 + $0x18] sm:$0xff] }
  0x2d   :  { %v4147_v37 = vld [vmem:[%s4925_s4 + $0x28] sm:$0xff]  ;;  %v3486_v38 = vld [vmem:[#allocation5 + $0x20] sm:$0xff]  ;;  %v4154_v39 = vld [vmem:[%s4925_s4 + $0x30] sm:$0xff] }
  0x2e   :  { %v3487_v40 = vld [vmem:[#allocation5 + $0x28] sm:$0xff]  ;;  %v4161_v41 = vld [vmem:[%s4925_s4 + $0x38] sm:$0xff]  ;;  %v3488_v42 = vld [vmem:[#allocation5 + $0x30] sm:$0xff] }
  0x2f   :  { %617 = vmatpush.bf16.msra.mxu3 %v516_v12  ;;  %2996 = vmatmul.msk.bf16.vlgmr.msra.gmra.mxu0 %vm313_vm1, %v4086_v15  ;;  %v3489_v44 = vld [vmem:[#allocation5 + $0x38] sm:$0xff]  ;;  %v257_v47 = vld [vmem:[%s4927_s6] sm:$0x7] }
  0x30   :  { %v4170_v48 = vperm.slane %v257_v47, 0 }
  0x33   :  { %618 = vmatpush.bf16.msra.mxu3 %v515_v16 }
  0x37   :  { %619 = vmatpush.bf16.msra.mxu3 %v514_v19 }
  0x3b   :  { %620 = vmatpush.bf16.msra.mxu3 %v513_v22 }
  0x3f   :  { %621 = vmatpush.bf16.msra.mxu3 %v512_v25  ;;  %2997 = vmatmul.msk.bf16.gmra.mxu0 %vm313_vm1, %v4117_v28 }
  0x43   :  { %622 = vmatpush.bf16.msra.mxu3 %v511_v29 }
  0x46   :  { %623 = vmatmul.bf16.vlgmr.msra.gmra.mxu3 %v3482_v30 }
  0x4f   :  { %2998 = vmatmul.msk.bf16.gmra.mxu0 %vm313_vm1, %v4126_v31 }
  0x56   :  { %628 = vmatmul.bf16.gmra.mxu3 %v3483_v32 }
  0x5f   :  { %2999 = vmatmul.msk.bf16.gmra.mxu0 %vm313_vm1, %v4133_v33 }
  0x66   :  { %633 = vmatmul.bf16.gmra.mxu3 %v3484_v34 }
  0x6f   :  { %3000 = vmatmul.msk.bf16.gmra.mxu0 %vm313_vm1, %v4140_v35 }
  0x76   :  { %638 = vmatmul.bf16.gmra.mxu3 %v3485_v36 }
  0x7f   :  { %3001 = vmatmul.msk.bf16.gmra.mxu0 %vm313_vm1, %v4147_v37 }
  0x86   :  { %643 = vmatmul.bf16.gmra.mxu3 %v3486_v38 }
  0x8f   :  { %3002 = vmatmul.msk.bf16.gmra.mxu0 %vm313_vm1, %v4154_v39 }
  0x96   :  { %648 = vmatmul.bf16.gmra.mxu3 %v3487_v40 }
  0x9f   :  { %3003 = vmatmul.msk.bf16.gmra.mxu0 %vm313_vm1, %v4161_v41 }
  0xa6   :  { %653 = vmatmul.bf16.gmra.mxu3 %v3488_v42 }
  0xac   :  { %v357_v43 = vpop.f32.mrf.mxu0 }
  0xad   :  { %v358_v49 = vadd.f32 %v357_v43, %v4170_v48 }
  0xb4   :  { %v4165_v45 = vpop.f32.mrf.mxu0 }
  0xb6   :  { %658 = vmatmul.bf16.gmra.mxu3 %v3489_v44  ;;  %v3490_v44 = vld [vmem:[#allocation5 + $0x40] sm:$0xff] }
  0xbc   :  { %v362_v46 = vpop.f32.mrf.mxu0 }
  0xbd   :  { %v363_v55 = vadd.f32 %v362_v46, %v4170_v48 }
  0xc4   :  { %v4173_v50 = vpop.f32.mrf.mxu0 }
  0xc6   :  { %663 = vmatmul.bf16.gmra.mxu3 %v3490_v44 }
  0xc9   :  { %v624_v51 = vpop.f32.mrf.mxu3 }
  0xca   :  { %v4175_v52 = vadd.f32 %v624_v51, %v358_v49 }
  0xcc   :  { %v367_v53 = vpop.f32.mrf.mxu0 }
  0xcd   :  { %v368_v61 = vadd.f32 %v367_v53, %v4170_v48 }
  0xd1   :  { %v4177_v54 = vpop.f32.mrf.mxu3 }
  0xd4   :  { %v4180_v57 = vpop.f32.mrf.mxu0 }
  0xd9   :  { %v629_v56 = vpop.f32.mrf.mxu3 }
  0xda   :  { %v4182_v58 = vadd.f32 %v629_v56, %v363_v55  ;;  %v3491_v55 = vld [vmem:[#allocation5 + $0x48] sm:$0xff] }
  0xdb   :  { %668 = vmatmul.bf16.gmra.mxu3 %v3491_v55 }
  0xdc   :  { %v372_v60 = vpop.f32.mrf.mxu0 }
  0xdd   :  { %v373_v9 = vadd.f32 %v372_v60, %v4170_v48 }
  0xe1   :  { %v4184_v59 = vpop.f32.mrf.mxu3 }
  0xe4   :  { %v374_v3 = vpop.f32.mrf.mxu0 }
  0xe9   :  { %v634_v62 = vpop.f32.mrf.mxu3 }
  0xea   :  { %v4187_v63 = vadd.f32 %v634_v62, %v368_v61 }
  0xec   :  { %v377_v12 = vpop.f32.mrf.mxu0 }
  0xed   :  { %v378_v22 = vadd.f32 %v377_v12, %v4170_v48 }
  0xf1   :  { %v4189_v5 = vpop.f32.mrf.mxu3 }
  0xf4   :  { %v379_v19 = vpop.f32.mrf.mxu0 }
  0xf9   :  { %v639_v13 = vpop.f32.mrf.mxu3 }
  0xfa   :  { %v4192_v14 = vadd.f32 %v639_v13, %v373_v9 }
  0xfc   :  { %v382_v30 = vpop.f32.mrf.mxu0 }
 0x101   :  { %v641_v16 = vpop.f32.mrf.mxu3 }
 0x104   :  { %v384_v34 = vpop.f32.mrf.mxu0 }
 0x105   :  { %v385_v44 = vadd.f32 %v384_v34, %v4170_v48  ;;  %v375_v34 = vadd.f32 %v374_v3, %v4170_v48  ;;  %v726_v3 = vmax.f32 %v4192_v14, 0.0  ;;  %v3493_v14 = vld [vmem:[#allocation5 + $0x58] sm:$0xff] }
 0x109   :  { %v644_v25 = vpop.f32.mrf.mxu3 }
 0x10a   :  { %v712_v29 = vadd.f32 %v644_v25, %v378_v22  ;;  %v383_v22 = vadd.f32 %v382_v30, %v4170_v48  ;;  %v308_v25 = vunpack.c.h.b16 %v4073_v8 }
 0x10c   :  { %v387_v38 = vpop.f32.mrf.mxu0  ;;  %v311_v4 = vpack.c.b16 %v308_v25, %v308_v25  ;;  %v3500_v25 = vld [vmem:[#allocation7 + $0x10] sm:$0xff] }
 0x10d   :  { %v388_v56 = vadd.f32 %v387_v38, %v4170_v48 }
 0x111   :  { %v646_v32 = vpop.f32.mrf.mxu3 }
 0x114   :  { %v389_v42 = vpop.f32.mrf.mxu0 }
 0x115   :  { %v390_v60 = vadd.f32 %v389_v42, %v4170_v48 }
 0x119   :  { %v649_v36 = vpop.f32.mrf.mxu3 }
 0x11c   :  { %v392_v47 = vpop.f32.mrf.mxu0 }
 0x11d   :  { %v393_v51 = vadd.f32 %v392_v47, %v4170_v48 }
 0x121   :  { %v651_v40 = vpop.f32.mrf.mxu3 }
 0x122   :  { %v715_v38 = vadd.f32 %v651_v40, %v385_v44  ;;  %v3492_v40 = vld [vmem:[#allocation5 + $0x50] sm:$0xff]  ;;  %v3501_v44 = vld [vmem:[#allocation7 + $0x18] sm:$0xff] }
 0x123   :  { %673 = vmatmul.bf16.gmra.mxu3 %v3492_v40  ;;  %v3518_v40 = vld [vmem:[#allocation10 + $0x20] sm:$0xff] }
 0x124   :  { %v394_v53 = vpop.f32.mrf.mxu0  ;;  %v731_v55 = vmax.f32 %v715_v38, 0.0  ;;  %v3502_v38 = vld [vmem:[#allocation7 + $0x20] sm:$0xff] }
 0x125   :  { %v395_v61 = vadd.f32 %v394_v53, %v4170_v48  ;;  %v343_v53 = vsel %vm338_vm0, %v311_v4, 0 }
 0x126   :  { %404 = vmatpush.bf16.msra.mxu1 %v343_v53  ;;  %v3521_v53 = vld [vmem:[#allocation10 + $0x38] sm:$0xff] }
 0x129   :  { %v654_v43 = vpop.f32.mrf.mxu3  ;;  %3004 = vmatmul.msk.bf16.vlgmr.msra.gmra.mxu1 %vm313_vm1, %v4086_v15 }
 0x12a   :  { %v716_v47 = vadd.f32 %v654_v43, %v388_v56  ;;  %933 = vmatpush.bf16.msrb.mxu1 %v3521_v53 }
 0x131   :  { %v656_v46 = vpop.f32.mrf.mxu3 }
 0x132   :  { %v717_v12 = vadd.f32 %v656_v46, %v390_v60  ;;  %v732_v46 = vmax.f32 %v716_v47, 0.0  ;;  %v365_v60 = vadd.f32 %v4173_v50, %v4170_v48  ;;  %v722_v50 = vmax.f32 %v4182_v58, 0.0  ;;  %v3495_v58 = vld [vmem:[#allocation5 + $0x68] sm:$0xff]  ;;  %v3497_v47 = vld [vmem:[#allocation5 + $0x78] sm:$0xff] }
 0x133   :  { %678 = vmatmul.bf16.gmra.mxu3 %v3493_v14 }
 0x134   :  { %v733_v2 = vmax.f32 %v717_v12, 0.0 }
 0x136   :  { %v742_v8 = vpack.c.bf16 %v733_v2, %v732_v46  ;;  %v3535_v46 = vld [vmem:[#allocation13 + $0x28] sm:$0xff] }
 0x139   :  { %v659_v49 = vpop.f32.mrf.mxu3  ;;  %3005 = vmatmul.msk.bf16.gmra.mxu1 %vm313_vm1, %v4117_v28 }
 0x13a   :  { %v718_v62 = vadd.f32 %v659_v49, %v393_v51  ;;  %v380_v49 = vadd.f32 %v379_v19, %v4170_v48  ;;  %v714_v51 = vadd.f32 %v649_v36, %v383_v22  ;;  %v370_v19 = vadd.f32 %v4180_v57, %v4170_v48 }
 0x13b   :  { %v728_v36 = vmax.f32 %v712_v29, 0.0  ;;  %v360_v57 = vadd.f32 %v4165_v45, %v4170_v48  ;;  %v724_v29 = vmax.f32 %v4187_v63, 0.0  ;;  %v720_v22 = vmax.f32 %v4175_v52, 0.0  ;;  %v3498_v48 = vld [vmem:[#allocation7] sm:$0xff]  ;;  %v3499_v63 = vld [vmem:[#allocation7 + $0x8] sm:$0xff]  ;;  %v3496_v52 = vld [vmem:[#allocation5 + $0x70] sm:$0xff] }
 0x13c   :  { %v734_v1 = vmax.f32 %v718_v62, 0.0  ;;  %v713_v30 = vadd.f32 %v646_v32, %v380_v49  ;;  %v730_v43 = vmax.f32 %v714_v51, 0.0  ;;  %v709_v32 = vadd.f32 %v4189_v5, %v370_v19  ;;  %v3536_v49 = vld [vmem:[#allocation13 + $0x30] sm:$0xff]  ;;  %v3530_v19 = vld [vmem:[#allocation13] sm:$0xff] }
 0x13d   :  { %v705_v5 = vadd.f32 %v4177_v54, %v360_v57  ;;  %v3494_v54 = vld [vmem:[#allocation5 + $0x60] sm:$0xff] }
 0x13e   :  { %v741_v4 = vpack.c.bf16 %v731_v55, %v730_v43  ;;  %v3520_v51 = vld [vmem:[#allocation10 + $0x30] sm:$0xff]  ;;  %v3503_v55 = vld [vmem:[#allocation7 + $0x28] sm:$0xff] }
 0x13f   :  { %934 = vmatpush.bf16.msrb.mxu1 %v3520_v51  ;;  %v3532_v43 = vld [vmem:[#allocation13 + $0x10] sm:$0xff] }
 0x141   :  { %v661_v9 = vpop.f32.mrf.mxu3 }
 0x142   :  { %v719_v13 = vadd.f32 %v661_v9, %v395_v61  ;;  %v725_v61 = vmax.f32 %v709_v32, 0.0  ;;  %v3516_v32 = vld [vmem:[#allocation10 + $0x10] sm:$0xff] }
 0x143   :  { %683 = vmatmul.bf16.gmra.mxu3 %v3494_v54 }
 0x144   :  { %v735_v0 = vmax.f32 %v719_v13, 0.0  ;;  %v738_v12 = vpack.c.bf16 %v725_v61, %v724_v29  ;;  %v3505_v61 = vld [vmem:[#allocation7 + $0x38] sm:$0xff] }
 0x146   :  { %v743_v42 = vpack.c.bf16 %v735_v0, %v734_v1  ;;  %v711_v0 = vadd.f32 %v641_v16, %v375_v34  ;;  %v729_v1 = vmax.f32 %v713_v30, 0.0  ;;  %v707_v16 = vadd.f32 %v4184_v59, %v365_v60  ;;  %v3534_v30 = vld [vmem:[#allocation13 + $0x20] sm:$0xff]  ;;  %v3519_v34 = vld [vmem:[#allocation10 + $0x28] sm:$0xff] }
 0x147   :  { %v721_v59 = vmax.f32 %v705_v5, 0.0  ;;  %935 = vmatpush.bf16.msrb.mxu1 %v3519_v34  ;;  %v3514_v60 = vld [vmem:[#allocation10] sm:$0xff] }
 0x148   :  { %792 = vmatpush.bf16.msrb.mxu0 %v743_v42  ;;  %v727_v2 = vmax.f32 %v711_v0, 0.0  ;;  %v740_v56 = vpack.c.bf16 %v729_v1, %v728_v36  ;;  %v723_v9 = vmax.f32 %v707_v16, 0.0  ;;  %v3537_v42 = vld [vmem:[#allocation13 + $0x38] sm:$0xff]  ;;  %v3531_v1 = vld [vmem:[#allocation13 + $0x8] sm:$0xff] }
 0x149   :  { %v736_v45 = vpack.c.bf16 %v721_v59, %v720_v22  ;;  %3006 = vmatmul.msk.bf16.gmra.mxu1 %vm313_vm1, %v4126_v31  ;;  %v664_v0 = vpop.f32.mrf.mxu3  ;;  %v3504_v36 = vld [vmem:[#allocation7 + $0x30] sm:$0xff] }
 0x14a   :  { %v739_v62 = vpack.c.bf16 %v727_v2, %v726_v3  ;;  %v737_v13 = vpack.c.bf16 %v723_v9, %v722_v50 }
 0x14b   :  { %936 = vmatpush.bf16.msrb.mxu1 %v3518_v40 }
 0x14c   :  { %793 = vmatpush.bf16.msrb.mxu0 %v742_v8  ;;  %v3533_v8 = vld [vmem:[#allocation13 + $0x18] sm:$0xff] }
 0x150   :  { %794 = vmatpush.bf16.msrb.mxu0 %v741_v4  ;;  %v3517_v4 = vld [vmem:[#allocation10 + $0x18] sm:$0xff] }
 0x151   :  { %937 = vmatpush.bf16.msrb.mxu1 %v3517_v4  ;;  %v666_v2 = vpop.f32.mrf.mxu3 }
 0x153   :  { %688 = vmatmul.bf16.gmra.mxu3 %v3495_v58 }
 0x154   :  { %795 = vmatpush.bf16.msrb.mxu0 %v740_v56  ;;  %v3515_v56 = vld [vmem:[#allocation10 + $0x8] sm:$0xff] }
 0x155   :  { %938 = vmatpush.bf16.msrb.mxu1 %v3516_v32 }
 0x158   :  { %796 = vmatpush.bf16.msrb.mxu0 %v739_v62  ;;  %v256_v62 = vld [vmem:[#allocation8 + $0x8] sm:$0xf] }
 0x159   :  { %3007 = vmatmul.msk.bf16.gmra.mxu1 %vm313_vm1, %v4133_v33  ;;  %v309_v57 = vunpack.c.l.b16 %v256_v62 }
 0x15a   :  { %939 = vmatpush.bf16.msrb.mxu1 %v3515_v56 }
 0x15b   :  { %v312_v29 = vpack.c.b16 %v309_v57, %v309_v57  ;;  %v3544_v57 = vld [vmem:[#allocation14 + $0x30] sm:$0xff] }
 0x15c   :  { %797 = vmatpush.bf16.msrb.mxu0 %v738_v12 }
 0x15d   :  { %v346_v9 = vsel %vm338_vm0, %v312_v29, 0  ;;  %v3543_v29 = vld [vmem:[#allocation14 + $0x28] sm:$0xff] }
 0x15e   :  { %940 = vmatpush.bf16.msrb.mxu1 %v3514_v60  ;;  %v669_v3 = vpop.f32.mrf.mxu3  ;;  %453 = vmatpush.bf16.msra.mxu2 %v346_v9 }
 0x160   :  { %798 = vmatpush.bf16.msrb.mxu0 %v737_v13  ;;  %v1187_v13 = vpack.c.bf16 %v666_v2, %v664_v0 }
 0x161   :  { %3012 = vmatmul.msk.bf16.vlgmr.msra.gmra.mxu2 %vm313_vm1, %v4086_v15 }
 0x163   :  { %693 = vmatmul.bf16.gmra.mxu3 %v3496_v52 }
 0x164   :  { %799 = vmatpush.bf16.msrb.mxu0 %v736_v45 }
 0x166   :  { %v671_v5 = vpop.f32.mrf.mxu3 }
 0x167   :  { %800 = vmatmul.bf16.vlgmr.msrb.gmra.mxu0 %v3498_v48 }
 0x168   :  { %1247 = vmatpush.bf16.msra.mxu0 %v3537_v42 }
 0x169   :  { %3008 = vmatmul.msk.bf16.gmra.mxu1 %vm313_vm1, %v4140_v35 }
 0x16c   :  { %1248 = vmatpush.bf16.msra.mxu0 %v3536_v49 }
 0x170   :  { %1249 = vmatpush.bf16.msra.mxu0 %v3535_v46 }
 0x171   :  { %3013 = vmatmul.msk.bf16.gmra.mxu2 %vm313_vm1, %v4117_v28 }
 0x173   :  { %698 = vmatmul.bf16.gmra.mxu3 %v3497_v47 }
 0x174   :  { %1250 = vmatpush.bf16.msra.mxu0 %v3534_v30 }
 0x177   :  { %805 = vmatmul.bf16.gmra.mxu0 %v3499_v63 }
 0x178   :  { %1251 = vmatpush.bf16.msra.mxu0 %v3533_v8 }
 0x179   :  { %3009 = vmatmul.msk.bf16.gmra.mxu1 %vm313_vm1, %v4147_v37 }
 0x17c   :  { %1252 = vmatpush.bf16.msra.mxu0 %v3532_v43 }
 0x180   :  { %1253 = vmatpush.bf16.msra.mxu0 %v3531_v1 }
 0x181   :  { %3014 = vmatmul.msk.bf16.gmra.mxu2 %vm313_vm1, %v4126_v31 }
 0x184   :  { %1254 = vmatpush.bf16.msra.mxu0 %v3530_v19 }
 0x187   :  { %810 = vmatmul.bf16.gmra.mxu0 %v3500_v25  ;;  %v1188_v25 = vpack.c.bf16 %v671_v5, %v669_v3 }
 0x189   :  { %3010 = vmatmul.msk.bf16.gmra.mxu1 %vm313_vm1, %v4154_v39 }
 0x191   :  { %3015 = vmatmul.msk.bf16.gmra.mxu2 %vm313_vm1, %v4133_v33 }
 0x197   :  { %815 = vmatmul.bf16.gmra.mxu0 %v3501_v44 }
 0x199   :  { %3011 = vmatmul.msk.bf16.gmra.mxu1 %vm313_vm1, %v4161_v41 }
 0x1a1   :  { %3016 = vmatmul.msk.bf16.gmra.mxu2 %vm313_vm1, %v4140_v35  ;;  %v3545_v35 = vld [vmem:[#allocation14 + $0x38] sm:$0xff] }
 0x1a2   :  { %1388 = vmatpush.bf16.msra.mxu1 %v3545_v35 }
 0x1a6   :  { %v4234_v16 = vpop.f32.mrf.mxu1  ;;  %v674_v50 = vpop.f32.mrf.mxu3  ;;  %1389 = vmatpush.bf16.msra.mxu1 %v3544_v57 }
 0x1a7   :  { %820 = vmatmul.bf16.gmra.mxu0 %v3502_v38 }
 0x1aa   :  { %1390 = vmatpush.bf16.msra.mxu1 %v3543_v29 }
 0x1ae   :  { %v4237_v12 = vpop.f32.mrf.mxu1  ;;  %v676_v54 = vpop.f32.mrf.mxu3 }
 0x1af   :  { %v1189_v49 = vpack.c.bf16 %v676_v54, %v674_v50  ;;  %v3527_v54 = vld [vmem:[#allocation11 + $0x28] sm:$0xff] }
 0x1b1   :  { %3017 = vmatmul.msk.bf16.gmra.mxu2 %vm313_vm1, %v4147_v37 }
 0x1b6   :  { %v4241_v59 = vpop.f32.mrf.mxu1  ;;  %v679_v52 = vpop.f32.mrf.mxu3 }
 0x1b7   :  { %825 = vmatmul.bf16.gmra.mxu0 %v3503_v55 }
 0x1be   :  { %v4247_v63 = vpop.f32.mrf.mxu1  ;;  %v681_v28 = vpop.f32.mrf.mxu3 }
 0x1bf   :  { %v1190_v8 = vpack.c.bf16 %v681_v28, %v679_v52 }
 0x1c1   :  { %3018 = vmatmul.msk.bf16.gmra.mxu2 %vm313_vm1, %v4154_v39 }
 0x1c6   :  { %v4249_v44 = vpop.f32.mrf.mxu1  ;;  %v684_v51 = vpop.f32.mrf.mxu3 }
 0x1c7   :  { %830 = vmatmul.bf16.gmra.mxu0 %v3504_v36 }
 0x1ce   :  { %v4255_v42 = vpop.f32.mrf.mxu1  ;;  %v686_v34 = vpop.f32.mrf.mxu3 }
 0x1cf   :  { %v1191_v19 = vpack.c.bf16 %v686_v34, %v684_v51  ;;  %v3524_v51 = vld [vmem:[#allocation11 + $0x10] sm:$0xff] }
 0x1d1   :  { %3019 = vmatmul.msk.bf16.gmra.mxu2 %vm313_vm1, %v4161_v41 }
 0x1d6   :  { %v4257_v30 = vpop.f32.mrf.mxu1 }
 0x1d7   :  { %835 = vmatmul.bf16.gmra.mxu0 %v3505_v61 }
 0x1de   :  { %v4263_v43 = vpop.f32.mrf.mxu1 }
 0x1e4   :  { %v801_v14 = vpop.f32.mrf.mxu0 }
 0x1e5   :  { %v841_v45 = vadd.f32 %v801_v14, %v4110_v26  ;;  %v3542_v14 = vld [vmem:[#allocation14 + $0x20] sm:$0xff] }
 0x1e6   :  { %v4269_v4 = vpop.f32.mrf.mxu1  ;;  %1391 = vmatpush.bf16.msra.mxu1 %v3542_v14 }
 0x1e7   :  { %1255 = vmatmul.bf16.vlgmr.msra.gmra.mxu0 %v1187_v13 }
 0x1ec   :  { %v803_v22 = vpop.f32.mrf.mxu0 }
 0x1ed   :  { %v842_v48 = vadd.f32 %v803_v22, %v4112_v27  ;;  %v3528_v22 = vld [vmem:[#allocation11 + $0x30] sm:$0xff] }
 0x1ee   :  { %v4271_v32 = vpop.f32.mrf.mxu1 }
 0x1ef   :  { %v873_v58 = vpack.c.bf16 %v842_v48, %v841_v45  ;;  %v3541_v45 = vld [vmem:[#allocation14 + $0x18] sm:$0xff] }
 0x1f0   :  { %1392 = vmatpush.bf16.msra.mxu1 %v3541_v45 }
 0x1f1   :  { %941 = vmatmul.bf16.vlgmr.msrb.gmra.mxu1 %v873_v58  ;;  %v3526_v58 = vld [vmem:[#allocation11 + $0x20] sm:$0xff] }
 0x1f4   :  { %v806_v15 = vpop.f32.mrf.mxu0 }
 0x1f5   :  { %v843_v38 = vadd.f32 %v806_v15, %v4104_v23 }
 0x1f6   :  { %v4277_v61 = vpop.f32.mrf.mxu1 }
 0x1f7   :  { %1260 = vmatmul.bf16.gmra.mxu0 %v1188_v25  ;;  %v3539_v25 = vld [vmem:[#allocation14 + $0x8] sm:$0xff] }
 0x1fc   :  { %v808_v47 = vpop.f32.mrf.mxu0 }
 0x1fd   :  { %v844_v26 = vadd.f32 %v808_v47, %v4106_v24  ;;  %v3525_v47 = vld [vmem:[#allocation11 + $0x18] sm:$0xff] }
 0x1fe   :  { %v4283_v50 = vpop.f32.mrf.mxu1 }
 0x1ff   :  { %v874_v27 = vpack.c.bf16 %v844_v26, %v843_v38  ;;  %v4967_v38 = vld [vmem:[#allocation25_spill] sm:$0xff] }
 0x201   :  { %946 = vmatmul.bf16.gmra.mxu1 %v874_v27  ;;  %v4968_v27 = vld [vmem:[#allocation26_spill] sm:$0xff] }
 0x204   :  { %v811_v53 = vpop.f32.mrf.mxu0 }
 0x205   :  { %v845_v55 = vadd.f32 %v811_v53, %v4098_v20  ;;  %v3538_v53 = vld [vmem:[#allocation14] sm:$0xff] }
 0x206   :  { %v4285_v15 = vpop.f32.mrf.mxu1 }
 0x207   :  { %1265 = vmatmul.bf16.gmra.mxu0 %v1189_v49 }
 0x20c   :  { %v813_v46 = vpop.f32.mrf.mxu0 }
 0x20d   :  { %v846_v23 = vadd.f32 %v813_v46, %v4100_v21  ;;  %v689_v21 = vpop.f32.mrf.mxu3 }
 0x20f   :  { %v875_v24 = vpack.c.bf16 %v846_v23, %v845_v55  ;;  %v4291_v55 = vpop.f32.mrf.mxu1 }
 0x211   :  { %951 = vmatmul.bf16.gmra.mxu1 %v875_v24  ;;  %v3523_v24 = vld [vmem:[#allocation11 + $0x8] sm:$0xff] }
 0x214   :  { %v816_v31 = vpop.f32.mrf.mxu0 }
 0x215   :  { %v847_v0 = vadd.f32 %v816_v31, %v4090_v17  ;;  %v691_v36 = vpop.f32.mrf.mxu3 }
 0x216   :  { %v1192_v62 = vpack.c.bf16 %v691_v36, %v689_v21  ;;  %v4302_v36 = vld [vmem:[%s4933_s12] ss:$0 sm:$0xff] }
 0x217   :  { %1270 = vmatmul.bf16.gmra.mxu0 %v1190_v8  ;;  %v3522_v8 = vld [vmem:[#allocation11] sm:$0xff]  ;;  %v4293_v34 = vpop.f32.mrf.mxu1 }
 0x21c   :  { %v818_v40 = vpop.f32.mrf.mxu0 }
 0x21d   :  { %v848_v1 = vadd.f32 %v818_v40, %v4092_v18  ;;  %v694_v60 = vpop.f32.mrf.mxu3  ;;  %v4969_v40 = vld [vmem:[#allocation23_spill] sm:$0xff] }
 0x21f   :  { %v876_v20 = vpack.c.bf16 %v848_v1, %v847_v0  ;;  %v4970_v1 = vld [vmem:[#allocation24_spill] sm:$0xff] }
 0x221   :  { %956 = vmatmul.bf16.gmra.mxu1 %v876_v20 }
 0x224   :  { %v821_v33 = vpop.f32.mrf.mxu0 }
 0x225   :  { %v849_v56 = vadd.f32 %v821_v33, %v4076_v10  ;;  %v3529_v10 = vld [vmem:[#allocation11 + $0x38] sm:$0xff]  ;;  %v696_v9 = vpop.f32.mrf.mxu3 }
 0x226   :  { %1074 = vmatpush.bf16.msrb.mxu2 %v3529_v10 }
 0x227   :  { %1275 = vmatmul.bf16.gmra.mxu0 %v1191_v19  ;;  %v4297_v19 = vpop.f32.mrf.mxu1 }
 0x22a   :  { %1075 = vmatpush.bf16.msrb.mxu2 %v3528_v22 }
 0x22c   :  { %v823_v2 = vpop.f32.mrf.mxu0 }
 0x22d   :  { %v850_v17 = vadd.f32 %v823_v2, %v4078_v11  ;;  %v699_v39 = vpop.f32.mrf.mxu3 }
 0x22e   :  { %1076 = vmatpush.bf16.msrb.mxu2 %v3527_v54 }
 0x22f   :  { %v877_v18 = vpack.c.bf16 %v850_v17, %v849_v56 }
 0x231   :  { %961 = vmatmul.bf16.gmra.mxu1 %v877_v18 }
 0x232   :  { %1077 = vmatpush.bf16.msrb.mxu2 %v3526_v58 }
 0x234   :  { %v826_v3 = vpop.f32.mrf.mxu0 }
 0x235   :  { %v851_v11 = vadd.f32 %v826_v3, %v4069_v6  ;;  %v1193_v6 = vpack.c.bf16 %v696_v9, %v694_v60  ;;  %v701_v46 = vpop.f32.mrf.mxu3 }
 0x236   :  { %1078 = vmatpush.bf16.msrb.mxu2 %v3525_v47  ;;  %v1194_v31 = vpack.c.bf16 %v701_v46, %v699_v39 }
 0x237   :  { %1280 = vmatmul.bf16.gmra.mxu0 %v1192_v62  ;;  %v4309_v62 = vld [vmem:[%s4929_s8] ss:$0 sm:$0xff] }
 0x23a   :  { %1079 = vmatpush.bf16.msrb.mxu2 %v3524_v51 }
 0x23c   :  { %v828_v5 = vpop.f32.mrf.mxu0 }
 0x23d   :  { %v852_v37 = vadd.f32 %v828_v5, %v4071_v7  ;;  %v3540_v7 = vld [vmem:[#allocation14 + $0x10] sm:$0xff] }
 0x23e   :  { %1393 = vmatpush.bf16.msra.mxu1 %v3540_v7  ;;  %1080 = vmatpush.bf16.msrb.mxu2 %v3523_v24 }
 0x23f   :  { %v878_v13 = vpack.c.bf16 %v852_v37, %v851_v11 }
 0x241   :  { %966 = vmatmul.bf16.gmra.mxu1 %v878_v13 }
 0x242   :  { %1394 = vmatpush.bf16.msra.mxu1 %v3539_v25  ;;  %1081 = vmatpush.bf16.msrb.mxu2 %v3522_v8 }
 0x244   :  { %v831_v48 = vpop.f32.mrf.mxu0 }
 0x245   :  { %v853_v26 = vadd.f32 %v831_v48, %v4967_v38 }
 0x246   :  { %1395 = vmatpush.bf16.msra.mxu1 %v3538_v53 }
 0x247   :  { %1285 = vmatmul.bf16.gmra.mxu0 %v1193_v6 }
 0x24c   :  { %v833_v52 = vpop.f32.mrf.mxu0 }
 0x24d   :  { %v854_v28 = vadd.f32 %v833_v52, %v4968_v27 }
 0x24f   :  { %v879_v49 = vpack.c.bf16 %v854_v28, %v853_v26 }
 0x251   :  { %971 = vmatmul.bf16.gmra.mxu1 %v879_v49 }
 0x254   :  { %v836_v23 = vpop.f32.mrf.mxu0 }
 0x255   :  { %v855_v0 = vadd.f32 %v836_v23, %v4969_v40 }
 0x257   :  { %1290 = vmatmul.bf16.gmra.mxu0 %v1194_v31 }
 0x25c   :  { %v838_v41 = vpop.f32.mrf.mxu0 }
 0x25d   :  { %v856_v20 = vadd.f32 %v838_v41, %v4970_v1 }
 0x25f   :  { %v880_v21 = vpack.c.bf16 %v856_v20, %v855_v0 }
 0x261   :  { %976 = vmatmul.bf16.gmra.mxu1 %v880_v21 }
 0x264   :  { %v1256_v33 = vpop.f32.mrf.mxu0 }
 0x265   :  { %v1257_v2 = vadd.f32 %v4302_v36, %v1256_v33 }
 0x267   :  { %v1296_v35 = vmax.f32 %v1257_v2, 0.0 }
 0x26c   :  { %v1258_v56 = vpop.f32.mrf.mxu0 }
 0x26d   :  { %v1259_v17 = vadd.f32 %v4302_v36, %v1258_v56 }
 0x26e   :  { %v942_v18 = vpop.f32.mrf.mxu1 }
 0x26f   :  { %v1297_v60 = vmax.f32 %v1259_v17, 0.0  ;;  %v943_v29 = vadd.f32 %v4309_v62, %v942_v18 }
 0x271   :  { %v1328_v3 = vpack.c.bf16 %v1297_v60, %v1296_v35  ;;  %v982_v11 = vmax.f32 %v943_v29, 0.0 }
 0x273   :  { %1396 = vmatmul.bf16.vlgmr.msra.gmra.mxu1 %v1328_v3  ;;  %v4324_v3 = vpop.f32.mrf.mxu2 }
 0x274   :  { %v1261_v57 = vpop.f32.mrf.mxu0  ;;  %4971 = vst [vmem:[#allocation25_spill] sm:$0xff] %v4324_v3  ;;  %v3619_v3 = vld [vmem:[#allocation2 + $0x20] sm:$0xff] }
 0x275   :  { %v1262_v9 = vadd.f32 %v4302_v36, %v1261_v57 }
 0x276   :  { %v944_v5 = vpop.f32.mrf.mxu1 }
 0x277   :  { %v945_v10 = vadd.f32 %v4309_v62, %v944_v5  ;;  %v1298_v48 = vmax.f32 %v1262_v9, 0.0 }
 0x279   :  { %v983_v37 = vmax.f32 %v945_v10, 0.0 }
 0x27b   :  { %v1014_v14 = vpack.c.bf16 %v983_v37, %v982_v11 }
 0x27c   :  { %v1263_v13 = vpop.f32.mrf.mxu0 }
 0x27d   :  { %v1264_v22 = vadd.f32 %v4302_v36, %v1263_v13  ;;  %1082 = vmatmul.bf16.vlgmr.msrb.gmra.mxu2 %v1014_v14 }
 0x27e   :  { %v947_v45 = vpop.f32.mrf.mxu1 }
 0x27f   :  { %v1299_v54 = vmax.f32 %v1264_v22, 0.0  ;;  %v948_v58 = vadd.f32 %v4309_v62, %v947_v45  ;;  %v4329_v45 = vpop.f32.mrf.mxu2 }
 0x280   :  { %4972 = vst [vmem:[#allocation26_spill] sm:$0xff] %v4329_v45 }
 0x281   :  { %v1329_v6 = vpack.c.bf16 %v1299_v54, %v1298_v48  ;;  %v984_v52 = vmax.f32 %v948_v58, 0.0 }
 0x283   :  { %1401 = vmatmul.bf16.gmra.mxu1 %v1329_v6 }
 0x284   :  { %v1266_v7 = vpop.f32.mrf.mxu0 }
 0x285   :  { %v1267_v38 = vadd.f32 %v4302_v36, %v1266_v7 }
 0x286   :  { %v949_v39 = vpop.f32.mrf.mxu1 }
 0x287   :  { %v950_v25 = vadd.f32 %v4309_v62, %v949_v39  ;;  %v1300_v49 = vmax.f32 %v1267_v38, 0.0 }
 0x289   :  { %v985_v47 = vmax.f32 %v950_v25, 0.0 }
 0x28b   :  { %v1015_v26 = vpack.c.bf16 %v985_v47, %v984_v52  ;;  %v4333_v52 = vpop.f32.mrf.mxu2 }
 0x28c   :  { %v1268_v27 = vpop.f32.mrf.mxu0  ;;  %4973 = vst [vmem:[#allocation23_spill] sm:$0xff] %v4333_v52 }
 0x28d   :  { %v1269_v28 = vadd.f32 %v4302_v36, %v1268_v27  ;;  %1087 = vmatmul.bf16.gmra.mxu2 %v1015_v26 }
 0x28e   :  { %v952_v53 = vpop.f32.mrf.mxu1 }
 0x28f   :  { %v1301_v51 = vmax.f32 %v1269_v28, 0.0  ;;  %v953_v24 = vadd.f32 %v4309_v62, %v952_v53 }
 0x291   :  { %v1330_v46 = vpack.c.bf16 %v1301_v51, %v1300_v49  ;;  %v986_v41 = vmax.f32 %v953_v24, 0.0 }
 0x293   :  { %1406 = vmatmul.bf16.gmra.mxu1 %v1330_v46 }
 0x294   :  { %v1271_v23 = vpop.f32.mrf.mxu0 }
 0x295   :  { %v1272_v0 = vadd.f32 %v4302_v36, %v1271_v23  ;;  %v4337_v23 = vpop.f32.mrf.mxu2 }
 0x296   :  { %v954_v31 = vpop.f32.mrf.mxu1  ;;  %4974 = vst [vmem:[#allocation24_spill] sm:$0xff] %v4337_v23 }
 0x297   :  { %v955_v8 = vadd.f32 %v4309_v62, %v954_v31  ;;  %v1302_v2 = vmax.f32 %v1272_v0, 0.0 }
 0x299   :  { %v987_v40 = vmax.f32 %v955_v8, 0.0 }
 0x29b   :  { %v1016_v1 = vpack.c.bf16 %v987_v40, %v986_v41 }
 0x29c   :  { %v1273_v20 = vpop.f32.mrf.mxu0 }
 0x29d   :  { %v1274_v21 = vadd.f32 %v4302_v36, %v1273_v20  ;;  %1092 = vmatmul.bf16.gmra.mxu2 %v1016_v1 }
 0x29e   :  { %v957_v33 = vpop.f32.mrf.mxu1 }
 0x29f   :  { %v1303_v56 = vmax.f32 %v1274_v21, 0.0  ;;  %v958_v35 = vadd.f32 %v4309_v62, %v957_v33 }
 0x2a1   :  { %v1331_v17 = vpack.c.bf16 %v1303_v56, %v1302_v2  ;;  %v988_v29 = vmax.f32 %v958_v35, 0.0  ;;  %v4343_v2 = vpop.f32.mrf.mxu2 }
 0x2a2   :  { %4975 = vst [vmem:[#allocation27_spill] sm:$0xff] %v4343_v2 }
 0x2a3   :  { %1411 = vmatmul.bf16.gmra.mxu1 %v1331_v17 }
 0x2a4   :  { %v1276_v18 = vpop.f32.mrf.mxu0 }
 0x2a5   :  { %v1277_v10 = vadd.f32 %v4302_v36, %v1276_v18 }
 0x2a6   :  { %v959_v60 = vpop.f32.mrf.mxu1 }
 0x2a7   :  { %v960_v57 = vadd.f32 %v4309_v62, %v959_v60  ;;  %v1304_v13 = vmax.f32 %v1277_v10, 0.0 }
 0x2a9   :  { %v989_v5 = vmax.f32 %v960_v57, 0.0 }
 0x2ab   :  { %v1017_v11 = vpack.c.bf16 %v989_v5, %v988_v29  ;;  %v4347_v5 = vpop.f32.mrf.mxu2 }
 0x2ac   :  { %v1278_v37 = vpop.f32.mrf.mxu0  ;;  %4976 = vst [vmem:[#allocation28_spill] sm:$0xff] %v4347_v5  ;;  %v3618_v5 = vld [vmem:[#allocation2 + $0x10] sm:$0xff] }
 0x2ad   :  { %v1279_v9 = vadd.f32 %v4302_v36, %v1278_v37  ;;  %1097 = vmatmul.bf16.gmra.mxu2 %v1017_v11 }
 0x2ae   :  { %v962_v14 = vpop.f32.mrf.mxu1 }
 0x2af   :  { %v1305_v22 = vmax.f32 %v1279_v9, 0.0  ;;  %v963_v6 = vadd.f32 %v4309_v62, %v962_v14 }
 0x2b1   :  { %v1332_v48 = vpack.c.bf16 %v1305_v22, %v1304_v13  ;;  %v990_v39 = vmax.f32 %v963_v6, 0.0 }
 0x2b3   :  { %1416 = vmatmul.bf16.gmra.mxu1 %v1332_v48 }
 0x2b4   :  { %v1281_v54 = vpop.f32.mrf.mxu0 }
 0x2b5   :  { %v1282_v47 = vadd.f32 %v4302_v36, %v1281_v54 }
 0x2b6   :  { %v964_v7 = vpop.f32.mrf.mxu1 }
 0x2b7   :  { %v965_v58 = vadd.f32 %v4309_v62, %v964_v7  ;;  %v1306_v53 = vmax.f32 %v1282_v47, 0.0  ;;  %v4351_v7 = vpop.f32.mrf.mxu2 }
 0x2b8   :  { %4977 = vst [vmem:[#allocation29_spill] sm:$0xff] %v4351_v7 }
 0x2b9   :  { %v991_v25 = vmax.f32 %v965_v58, 0.0 }
 0x2bb   :  { %v1018_v38 = vpack.c.bf16 %v991_v25, %v990_v39 }
 0x2bc   :  { %v1283_v26 = vpop.f32.mrf.mxu0 }
 0x2bd   :  { %v1284_v27 = vadd.f32 %v4302_v36, %v1283_v26  ;;  %1102 = vmatmul.bf16.gmra.mxu2 %v1018_v38 }
 0x2be   :  { %v967_v28 = vpop.f32.mrf.mxu1 }
 0x2bf   :  { %v1307_v49 = vmax.f32 %v1284_v27, 0.0  ;;  %v968_v24 = vadd.f32 %v4309_v62, %v967_v28  ;;  %v4355_v27 = vpop.f32.mrf.mxu2 }
 0x2c0   :  { %4978 = vst [vmem:[#allocation30_spill] sm:$0xff] %v4355_v27 }
 0x2c1   :  { %v1333_v51 = vpack.c.bf16 %v1307_v49, %v1306_v53  ;;  %v992_v41 = vmax.f32 %v968_v24, 0.0 }
 0x2c3   :  { %1421 = vmatmul.bf16.gmra.mxu1 %v1333_v51 }
 0x2c4   :  { %v1286_v46 = vpop.f32.mrf.mxu0 }
 0x2c5   :  { %v1287_v0 = vadd.f32 %v4302_v36, %v1286_v46 }
 0x2c6   :  { %v969_v31 = vpop.f32.mrf.mxu1 }
 0x2c7   :  { %v970_v8 = vadd.f32 %v4309_v62, %v969_v31  ;;  %v1308_v56 = vmax.f32 %v1287_v0, 0.0  ;;  %v4357_v31 = vpop.f32.mrf.mxu2 }
 0x2c8   :  { %4979 = vst [vmem:[#allocation31_spill] sm:$0xff] %v4357_v31 }
 0x2c9   :  { %v993_v40 = vmax.f32 %v970_v8, 0.0 }
 0x2cb   :  { %v1019_v1 = vpack.c.bf16 %v993_v40, %v992_v41 }
 0x2cc   :  { %v1288_v20 = vpop.f32.mrf.mxu0 }
 0x2cd   :  { %v1289_v21 = vadd.f32 %v4302_v36, %v1288_v20  ;;  %1107 = vmatmul.bf16.gmra.mxu2 %v1019_v1 }
 0x2ce   :  { %v972_v33 = vpop.f32.mrf.mxu1 }
 0x2cf   :  { %v1309_v17 = vmax.f32 %v1289_v21, 0.0  ;;  %v973_v60 = vadd.f32 %v4309_v62, %v972_v33  ;;  %v4359_v41 = vpop.f32.mrf.mxu2 }
 0x2d0   :  { %4980 = vst [vmem:[#allocation32_spill] sm:$0xff] %v4359_v41 }
 0x2d1   :  { %v1334_v18 = vpack.c.bf16 %v1309_v17, %v1308_v56  ;;  %v994_v10 = vmax.f32 %v973_v60, 0.0 }
 0x2d3   :  { %1426 = vmatmul.bf16.gmra.mxu1 %v1334_v18 }
 0x2d4   :  { %v1291_v35 = vpop.f32.mrf.mxu0 }
 0x2d5   :  { %v1292_v37 = vadd.f32 %v4302_v36, %v1291_v35 }
 0x2d6   :  { %v974_v57 = vpop.f32.mrf.mxu1 }
 0x2d7   :  { %v975_v29 = vadd.f32 %v4309_v62, %v974_v57  ;;  %v1310_v48 = vmax.f32 %v1292_v37, 0.0  ;;  %v3609_v57 = vld [vmem:[%s4935_s14] ss:$0 sm:$0xff] }
 0x2d9   :  { %v995_v11 = vmax.f32 %v975_v29, 0.0 }
 0x2db   :  { %v1020_v9 = vpack.c.bf16 %v995_v11, %v994_v10 }
 0x2dc   :  { %v1293_v14 = vpop.f32.mrf.mxu0 }
 0x2dd   :  { %v1294_v13 = vadd.f32 %v4302_v36, %v1293_v14  ;;  %1112 = vmatmul.bf16.gmra.mxu2 %v1020_v9 }
 0x2de   :  { %v977_v22 = vpop.f32.mrf.mxu1 }
 0x2df   :  { %v1311_v54 = vmax.f32 %v1294_v13, 0.0  ;;  %v978_v58 = vadd.f32 %v4309_v62, %v977_v22 }
 0x2e1   :  { %v1335_v6 = vpack.c.bf16 %v1311_v54, %v1310_v48  ;;  %v996_v47 = vmax.f32 %v978_v58, 0.0 }
 0x2e3   :  { %1431 = vmatmul.bf16.gmra.mxu1 %v1335_v6 }
 0x2e6   :  { %v979_v39 = vpop.f32.mrf.mxu1 }
 0x2e7   :  { %v980_v25 = vadd.f32 %v4309_v62, %v979_v39  ;;  %v4361_v62 = vpop.f32.mrf.mxu2 }
 0x2e8   :  { %4981 = vst [vmem:[#allocation33_spill] sm:$0xff] %v4361_v62  ;;  %v3481_v62 = vld [vmem:[%s4922_s1 + $0x38] sm:$0xff] }
 0x2e9   :  { %v997_v38 = vmax.f32 %v980_v25, 0.0 }
 0x2eb   :  { %v1021_v26 = vpack.c.bf16 %v997_v38, %v996_v47 }
 0x2ed   :  { %1117 = vmatmul.bf16.gmra.mxu2 %v1021_v26 }
 0x2ef   :  { %v4363_v1 = vpop.f32.mrf.mxu2 }
 0x2f0   :  { %v1397_v36 = vpop.f32.mrf.mxu1  ;;  %4982 = vst [vmem:[#allocation34_spill] sm:$0xff] %v4363_v1  ;;  %v4461_v1 = vld [vmem:[%s4931_s10] ss:$0 sm:$0xff] }
 0x2f7   :  { %v4365_v33 = vpop.f32.mrf.mxu2 }
 0x2f8   :  { %v1399_v28 = vpop.f32.mrf.mxu1  ;;  %4983 = vst [vmem:[#allocation35_spill] sm:$0xff] %v4365_v33 }
 0x2ff   :  { %v4367_v17 = vpop.f32.mrf.mxu2 }
 0x300   :  { %v1402_v53 = vpop.f32.mrf.mxu1  ;;  %4984 = vst [vmem:[#allocation36_spill] sm:$0xff] %v4367_v17  ;;  %v3617_v17 = vld [vmem:[#allocation2] sm:$0xff] }
 0x307   :  { %v4369_v35 = vpop.f32.mrf.mxu2 }
 0x308   :  { %v1404_v49 = vpop.f32.mrf.mxu1  ;;  %4985 = vst [vmem:[#allocation37_spill] sm:$0xff] %v4369_v35 }
 0x30f   :  { %v4374_v29 = vpop.f32.mrf.mxu2 }
 0x310   :  { %v1407_v51 = vpop.f32.mrf.mxu1  ;;  %4986 = vst [vmem:[#allocation38_spill] sm:$0xff] %v4374_v29 }
 0x317   :  { %v1083_v54 = vpop.f32.mrf.mxu2 }
 0x318   :  { %v1409_v46 = vpop.f32.mrf.mxu1 }
 0x320   :  { %v1412_v24 = vpop.f32.mrf.mxu1 }
 0x321   :  { %v4402_v26 = vadd.f32 %v3609_v57, %v1412_v24  ;;  %v4418_v24 = vadd.f32 %v3609_v57, %v1399_v28  ;;  %v3475_v28 = vld [vmem:[%s4922_s1 + $0x8] sm:$0xff] }
 0x323   :  { %4996 = vst [vmem:[#allocation48_spill] sm:$0xff] %v4402_v26 }
 0x328   :  { %v1414_v8 = vpop.f32.mrf.mxu1 }
 0x329   :  { %v4398_v47 = vadd.f32 %v3609_v57, %v1414_v8 }
 0x32b   :  { %4995 = vst [vmem:[#allocation47_spill] sm:$0xff] %v4398_v47 }
 0x330   :  { %v1417_v40 = vpop.f32.mrf.mxu1 }
 0x331   :  { %v4396_v25 = vadd.f32 %v3609_v57, %v1417_v40  ;;  %v4412_v40 = vadd.f32 %v3609_v57, %v1404_v49  ;;  %v3474_v49 = vld [vmem:[%s4922_s1] sm:$0xff] }
 0x333   :  { %4994 = vst [vmem:[#allocation46_spill] sm:$0xff] %v4396_v25 }
 0x338   :  { %v1419_v0 = vpop.f32.mrf.mxu1 }
 0x339   :  { %v4392_v58 = vadd.f32 %v3609_v57, %v1419_v0  ;;  %v1440_v0 = vpack.c.bf16 %v4398_v47, %v4402_v26 }
 0x33b   :  { %4993 = vst [vmem:[#allocation45_spill] sm:$0xff] %v4392_v58  ;;  %v1441_v38 = vpack.c.bf16 %v4392_v58, %v4396_v25  ;;  %v3623_v58 = vld [vmem:[#allocation2 + $0x78] sm:$0xff] }
 0x340   :  { %v1422_v20 = vpop.f32.mrf.mxu1 }
 0x341   :  { %v4390_v6 = vadd.f32 %v3609_v57, %v1422_v20  ;;  %v4406_v20 = vadd.f32 %v3609_v57, %v1409_v46 }
 0x343   :  { %4992 = vst [vmem:[#allocation44_spill] sm:$0xff] %v4390_v6 }
 0x348   :  { %v1424_v21 = vpop.f32.mrf.mxu1 }
 0x349   :  { %v4386_v22 = vadd.f32 %v3609_v57, %v1424_v21  ;;  %v4404_v21 = vpop.f32.mrf.mxu2 }
 0x34b   :  { %4991 = vst [vmem:[#allocation43_spill] sm:$0xff] %v4386_v22  ;;  %v1442_v39 = vpack.c.bf16 %v4386_v22, %v4390_v6  ;;  %v3622_v22 = vld [vmem:[#allocation2 + $0x70] sm:$0xff] }
 0x350   :  { %v1427_v56 = vpop.f32.mrf.mxu1 }
 0x351   :  { %v4384_v13 = vadd.f32 %v3609_v57, %v1427_v56  ;;  %v4410_v56 = vadd.f32 %v3609_v57, %v1407_v51 }
 0x353   :  { %4990 = vst [vmem:[#allocation42_spill] sm:$0xff] %v4384_v13  ;;  %v1439_v8 = vpack.c.bf16 %v4406_v20, %v4410_v56 }
 0x354   :  { %4997 = vst [vmem:[#allocation49_spill] sm:$0xff] %v4410_v56 }
 0x358   :  { %v1429_v18 = vpop.f32.mrf.mxu1 }
 0x359   :  { %v4380_v9 = vadd.f32 %v3609_v57, %v1429_v18  ;;  %v4416_v18 = vadd.f32 %v3609_v57, %v1402_v53 }
 0x35b   :  { %4989 = vst [vmem:[#allocation41_spill] sm:$0xff] %v4380_v9  ;;  %v1443_v48 = vpack.c.bf16 %v4380_v9, %v4384_v13  ;;  %v1438_v46 = vpack.c.bf16 %v4412_v40, %v4416_v18 }
 0x360   :  { %v1432_v60 = vpop.f32.mrf.mxu1 }
 0x361   :  { %v4376_v11 = vadd.f32 %v3609_v57, %v1432_v60  ;;  %v4422_v60 = vadd.f32 %v3609_v57, %v1397_v36 }
 0x363   :  { %4987 = vst [vmem:[#allocation39_spill] sm:$0xff] %v4376_v11  ;;  %v1437_v51 = vpack.c.bf16 %v4418_v24, %v4422_v60 }
 0x368   :  { %v1434_v10 = vpop.f32.mrf.mxu1 }
 0x369   :  { %v4378_v37 = vadd.f32 %v3609_v57, %v1434_v10  ;;  %v1088_v10 = vpop.f32.mrf.mxu2  ;;  %v3476_v57 = vld [vmem:[%s4922_s1 + $0x10] sm:$0xff] }
 0x36a   :  { %v1089_v27 = vadd.f32 %v4461_v1, %v1088_v10 }
 0x36b   :  { %4988 = vst [vmem:[#allocation40_spill] sm:$0xff] %v4378_v37  ;;  %v1444_v14 = vpack.c.bf16 %v4378_v37, %v4376_v11  ;;  %v3620_v11 = vld [vmem:[#allocation2 + $0x30] sm:$0xff] }
 0x36d   :  { %1493 = vmatpush.bf16.msra.mxu2 %v1444_v14 }
 0x371   :  { %1494 = vmatpush.bf16.msra.mxu2 %v1443_v48  ;;  %v4429_v53 = vpop.f32.mrf.mxu2 }
 0x375   :  { %1495 = vmatpush.bf16.msra.mxu2 %v1442_v39 }
 0x379   :  { %1496 = vmatpush.bf16.msra.mxu2 %v1441_v38  ;;  %v1093_v14 = vpop.f32.mrf.mxu2  ;;  %v3477_v38 = vld [vmem:[%s4922_s1 + $0x18] sm:$0xff] }
 0x37a   :  { %v1094_v45 = vadd.f32 %v4461_v1, %v1093_v14 }
 0x37d   :  { %1497 = vmatpush.bf16.msra.mxu2 %v1440_v0 }
 0x381   :  { %1498 = vmatpush.bf16.msra.mxu2 %v1439_v8  ;;  %v4434_v36 = vpop.f32.mrf.mxu2  ;;  %v3478_v8 = vld [vmem:[%s4922_s1 + $0x20] sm:$0xff] }
 0x385   :  { %1499 = vmatpush.bf16.msra.mxu2 %v1438_v46 }
 0x389   :  { %1500 = vmatpush.bf16.msra.mxu2 %v1437_v51  ;;  %v1098_v48 = vpop.f32.mrf.mxu2 }
 0x38c   :  { %1501 = vmatmul.bf16.vlgmr.msra.gmra.mxu2 %v3474_v49  ;;  %v3479_v49 = vld [vmem:[%s4922_s1 + $0x28] sm:$0xff] }
 0x391   :  { %v4439_v39 = vpop.f32.mrf.mxu2 }
 0x399   :  { %v1103_v0 = vpop.f32.mrf.mxu2 }
 0x39c   :  { %1506 = vmatmul.bf16.gmra.mxu2 %v3475_v28 }
 0x3a1   :  { %v4447_v46 = vpop.f32.mrf.mxu2 }
 0x3a9   :  { %v1108_v51 = vpop.f32.mrf.mxu2 }
 0x3ac   :  { %1511 = vmatmul.bf16.gmra.mxu2 %v3476_v57  ;;  %v3480_v57 = vld [vmem:[%s4922_s1 + $0x30] sm:$0xff] }
 0x3b1   :  { %v1110_v28 = vpop.f32.mrf.mxu2 }
 0x3bc   :  { %1516 = vmatmul.bf16.gmra.mxu2 %v3477_v38  ;;  %v1113_v38 = vpop.f32.mrf.mxu2 }
 0x3c4   :  { %v1115_v41 = vpop.f32.mrf.mxu2 }
 0x3cc   :  { %1521 = vmatmul.bf16.gmra.mxu2 %v3478_v8  ;;  %v1118_v8 = vpop.f32.mrf.mxu2 }
 0x3d4   :  { %v1120_v33 = vpop.f32.mrf.mxu2 }
 0x3dc   :  { %1526 = vmatmul.bf16.gmra.mxu2 %v3479_v49  ;;  %v1084_v49 = vadd.f32 %v4461_v1, %v1083_v54 }
 0x3de   :  { %v1123_v29 = vmax.f32 %v1084_v49, 0.0  ;;  %v1127_v49 = vmax.f32 %v1094_v45, 0.0  ;;  %v3621_v45 = vld [vmem:[#allocation2 + $0x40] sm:$0xff] }
 0x3e0   :  { %v1139_v35 = vadd.f32 %v3617_v17, %v1123_v29  ;;  %v1143_v17 = vadd.f32 %v3619_v3, %v1127_v49 }
 0x3ec   :  { %1531 = vmatmul.bf16.gmra.mxu2 %v3480_v57 }
 0x3fc   :  { %1536 = vmatmul.bf16.gmra.mxu2 %v3481_v62  ;;  %v1125_v62 = vmax.f32 %v1089_v27, 0.0 }
 0x3fe   :  { %v1141_v2 = vadd.f32 %v3618_v5, %v1125_v62 }
 0x40f   :  { %v1502_v31 = vpop.f32.mrf.mxu2 }
 0x410   :  { %v4464_v57 = vadd.f32 %v1502_v31, %v1139_v35  ;;  %v1099_v35 = vadd.f32 %v4461_v1, %v1098_v48 }
 0x412   :  { %v1129_v27 = vmax.f32 %v1099_v35, 0.0  ;;  %v1119_v35 = vadd.f32 %v4461_v1, %v1118_v8 }
 0x414   :  { %v1145_v5 = vadd.f32 %v3620_v11, %v1129_v27  ;;  %v1121_v11 = vadd.f32 %v4461_v1, %v1120_v33  ;;  %v1106_v33 = vadd.f32 %v4461_v1, %v4447_v46 }
 0x416   :  { %v1132_v46 = vmax.f32 %v1106_v33, 0.0  ;;  %v3629_v33 = vld [vmem:[#allocation2 + $0x38] sm:$0xff] }
 0x417   :  { %v4467_v7 = vpop.f32.mrf.mxu2 }
 0x41f   :  { %v1507_v23 = vpop.f32.mrf.mxu2 }
 0x420   :  { %v4469_v52 = vadd.f32 %v1507_v23, %v1141_v2  ;;  %v1104_v2 = vadd.f32 %v4461_v1, %v1103_v0  ;;  %v1114_v0 = vadd.f32 %v4461_v1, %v1113_v38 }
 0x422   :  { %v1131_v37 = vmax.f32 %v1104_v2, 0.0  ;;  %v1138_v2 = vmax.f32 %v1121_v11, 0.0  ;;  %v3625_v11 = vld [vmem:[#allocation2 + $0x60] sm:$0xff] }
 0x424   :  { %v1147_v13 = vadd.f32 %v3621_v45, %v1131_v37  ;;  %v1111_v37 = vadd.f32 %v4461_v1, %v1110_v28  ;;  %v1109_v45 = vadd.f32 %v4461_v1, %v1108_v51  ;;  %v1154_v26 = vadd.f32 %v3623_v58, %v1138_v2 }
 0x425   :  { %v1101_v58 = vadd.f32 %v4461_v1, %v4439_v39 }
 0x426   :  { %v1134_v47 = vmax.f32 %v1111_v37, 0.0  ;;  %v1133_v28 = vmax.f32 %v1109_v45, 0.0 }
 0x427   :  { %v4472_v54 = vpop.f32.mrf.mxu2  ;;  %v1130_v37 = vmax.f32 %v1101_v58, 0.0  ;;  %v3631_v58 = vld [vmem:[#allocation2 + $0x18] sm:$0xff] }
 0x42f   :  { %v1512_v29 = vpop.f32.mrf.mxu2 }
 0x430   :  { %v4474_v31 = vadd.f32 %v1512_v29, %v1143_v17 }
 0x437   :  { %v4477_v10 = vpop.f32.mrf.mxu2 }
 0x43f   :  { %v1517_v62 = vpop.f32.mrf.mxu2 }
 0x440   :  { %v4479_v23 = vadd.f32 %v1517_v62, %v1145_v5  ;;  %v1116_v5 = vadd.f32 %v4461_v1, %v1115_v41  ;;  %v1137_v62 = vmax.f32 %v1119_v35, 0.0  ;;  %v3624_v41 = vld [vmem:[#allocation2 + $0x68] sm:$0xff] }
 0x442   :  { %v1153_v25 = vadd.f32 %v3622_v22, %v1137_v62 }
 0x447   :  { %v1519_v14 = vpop.f32.mrf.mxu2 }
 0x44f   :  { %v1522_v3 = vpop.f32.mrf.mxu2 }
 0x450   :  { %v4482_v49 = vadd.f32 %v1522_v3, %v1147_v13  ;;  %v1136_v13 = vmax.f32 %v1116_v5, 0.0  ;;  %v1135_v3 = vmax.f32 %v1114_v0, 0.0  ;;  %v3626_v0 = vld [vmem:[#allocation2 + $0x58] sm:$0xff] }
 0x451   :  { %v1150_v62 = vadd.f32 %v3626_v0, %v1134_v47 }
 0x452   :  { %v1152_v56 = vadd.f32 %v3624_v41, %v1136_v13  ;;  %v1151_v5 = vadd.f32 %v3625_v11, %v1135_v3  ;;  %v3628_v13 = vld [vmem:[#allocation2 + $0x48] sm:$0xff] }
 0x453   :  { %v1148_v45 = vadd.f32 %v3628_v13, %v1132_v46  ;;  %v3639_v13 = vld [vmem:[#allocation5 + $0x30] sm:$0xff] }
 0x457   :  { %v1524_v17 = vpop.f32.mrf.mxu2 }
 0x458   :  { %v4512_v47 = vadd.f32 %v1524_v17, %v1148_v45  ;;  %v3640_v45 = vld [vmem:[#allocation5 + $0x38] sm:$0xff] }
 0x45f   :  { %v1527_v29 = vpop.f32.mrf.mxu2 }
 0x467   :  { %v1529_v48 = vpop.f32.mrf.mxu2 }
 0x46f   :  { %v1532_v9 = vpop.f32.mrf.mxu2 }
 0x470   :  { %v4502_v2 = vadd.f32 %v1532_v9, %v1151_v5 }
 0x477   :  { %v1534_v6 = vpop.f32.mrf.mxu2 }
 0x478   :  { %v4496_v51 = vadd.f32 %v1534_v6, %v1152_v56  ;;  %v1096_v56 = vadd.f32 %v4461_v1, %v4434_v36  ;;  %v1562_v36 = vpack.c.bf16 %v4512_v47, %v4482_v49 }
 0x47a   :  { %v1564_v6 = vpack.c.bf16 %v4496_v51, %v4502_v2  ;;  %v1128_v3 = vmax.f32 %v1096_v56, 0.0  ;;  %v3636_v56 = vld [vmem:[#allocation5 + $0x18] sm:$0xff] }
 0x47f   :  { %v1537_v27 = vpop.f32.mrf.mxu2 }
 0x480   :  { %v4492_v38 = vadd.f32 %v1537_v27, %v1153_v25  ;;  %v3627_v25 = vld [vmem:[#allocation2 + $0x50] sm:$0xff]  ;;  %v4504_v27 = vadd.f32 %v1529_v48, %v1150_v62  ;;  %v1091_v48 = vadd.f32 %v4461_v1, %v4429_v53 }
 0x482   :  { %v1126_v17 = vmax.f32 %v1091_v48, 0.0 }
 0x487   :  { %v1539_v8 = vpop.f32.mrf.mxu2 }
 0x488   :  { %v4494_v35 = vadd.f32 %v1539_v8, %v1154_v26  ;;  %v1149_v26 = vadd.f32 %v3627_v25, %v1133_v28  ;;  %v1146_v8 = vadd.f32 %v3629_v33, %v1130_v37  ;;  %v3630_v28 = vld [vmem:[#allocation2 + $0x28] sm:$0xff]  ;;  %v3637_v37 = vld [vmem:[#allocation5 + $0x20] sm:$0xff] }
 0x489   :  { %v1144_v11 = vadd.f32 %v3630_v28, %v1128_v3  ;;  %v3642_v3 = vld [vmem:[#allocation5 + $0x40] sm:$0xff] }
 0x48a   :  { %v1565_v22 = vpack.c.bf16 %v4494_v35, %v4492_v38  ;;  %v4510_v39 = vadd.f32 %v1527_v29, %v1149_v26  ;;  %v4518_v41 = vadd.f32 %v1519_v14, %v1146_v8  ;;  %v1086_v29 = vadd.f32 %v4461_v1, %v4404_v21  ;;  %v3632_v21 = vld [vmem:[#allocation2 + $0x8] sm:$0xff]  ;;  %v3633_v26 = vld [vmem:[#allocation5] sm:$0xff] }
 0x48b   :  { %v4525_v5 = vadd.f32 %v4477_v10, %v1144_v11  ;;  %v1142_v14 = vadd.f32 %v3631_v58, %v1126_v17 }
 0x48c   :  { %1566 = vmatpush.bf16.msrb.mxu3 %v1565_v22  ;;  %v1563_v9 = vpack.c.bf16 %v4504_v27, %v4510_v39  ;;  %v1561_v53 = vpack.c.bf16 %v4518_v41, %v4479_v23  ;;  %v1124_v22 = vmax.f32 %v1086_v29, 0.0 }
 0x48d   :  { %v4530_v46 = vadd.f32 %v4472_v54, %v1142_v14  ;;  %v1560_v1 = vpack.c.bf16 %v4525_v5, %v4474_v31  ;;  %v3634_v54 = vld [vmem:[#allocation5 + $0x8] sm:$0xff] }
 0x48e   :  { %v1140_v0 = vadd.f32 %v3632_v21, %v1124_v22  ;;  %v3643_v22 = vld [vmem:[#allocation5 + $0x48] sm:$0xff] }
 0x48f   :  { %v1559_v10 = vpack.c.bf16 %v4530_v46, %v4469_v52 }
 0x490   :  { %1567 = vmatpush.bf16.msrb.mxu3 %v1564_v6  ;;  %v4535_v62 = vadd.f32 %v4467_v7, %v1140_v0  ;;  %v3635_v6 = vld [vmem:[#allocation5 + $0x10] sm:$0xff]  ;;  %v3638_v7 = vld [vmem:[#allocation5 + $0x28] sm:$0xff] }
 0x492   :  { %v1558_v25 = vpack.c.bf16 %v4535_v62, %v4464_v57 }
 0x494   :  { %1568 = vmatpush.bf16.msrb.mxu3 %v1563_v9  ;;  %v3641_v9 = vld [vmem:[%s4927_s6] sm:$0x7] }
 0x495   :  { %v4544_v48 = vperm.slane %v3641_v9, 1  ;;  %v3645_v9 = vld [vmem:[#allocation5 + $0x58] sm:$0xff] }
 0x497   :  { %v407_v33 = vadd.f32 %v4234_v16, %v4544_v48  ;;  %v409_v29 = vadd.f32 %v4237_v12, %v4544_v48  ;;  %v412_v14 = vadd.f32 %v4241_v59, %v4544_v48  ;;  %v414_v16 = vadd.f32 %v4247_v63, %v4544_v48 }
 0x498   :  { %1569 = vmatpush.bf16.msrb.mxu3 %v1562_v36  ;;  %v419_v59 = vadd.f32 %v4255_v42, %v4544_v48  ;;  %v3646_v42 = vld [vmem:[#allocation5 + $0x60] sm:$0xff] }
 0x49c   :  { %1570 = vmatpush.bf16.msrb.mxu3 %v1561_v53 }
 0x4a0   :  { %1571 = vmatpush.bf16.msrb.mxu3 %v1560_v1 }
 0x4a4   :  { %1572 = vmatpush.bf16.msrb.mxu3 %v1559_v10 }
 0x4a8   :  { %1573 = vmatpush.bf16.msrb.mxu3 %v1558_v25 }
 0x4ab   :  { %1574 = vmatmul.bf16.vlgmr.msrb.gmra.mxu3 %v3633_v26  ;;  %v3644_v26 = vld [vmem:[#allocation5 + $0x50] sm:$0xff] }
 0x4bb   :  { %1579 = vmatmul.bf16.gmra.mxu3 %v3634_v54 }
 0x4cb   :  { %1584 = vmatmul.bf16.gmra.mxu3 %v3635_v6  ;;  %v417_v6 = vadd.f32 %v4249_v44, %v4544_v48  ;;  %v424_v44 = vadd.f32 %v4263_v43, %v4544_v48 }
 0x4db   :  { %1589 = vmatmul.bf16.gmra.mxu3 %v3636_v56 }
 0x4eb   :  { %1594 = vmatmul.bf16.gmra.mxu3 %v3637_v37 }
 0x4fb   :  { %1599 = vmatmul.bf16.gmra.mxu3 %v3638_v7 }
 0x50b   :  { %1604 = vmatmul.bf16.gmra.mxu3 %v3639_v13 }
 0x51b   :  { %1609 = vmatmul.bf16.gmra.mxu3 %v3640_v45 }
 0x52b   :  { %1614 = vmatmul.bf16.gmra.mxu3 %v3642_v3 }
 0x52e   :  { %v1575_v8 = vpop.f32.mrf.mxu3 }
 0x52f   :  { %v1655_v36 = vadd.f32 %v1575_v8, %v407_v33  ;;  %v422_v33 = vadd.f32 %v4257_v30, %v4544_v48 }
 0x531   :  { %v1671_v11 = vmax.f32 %v1655_v36, 0.0 }
 0x536   :  { %v1577_v17 = vpop.f32.mrf.mxu3 }
 0x537   :  { %v1656_v28 = vadd.f32 %v1577_v17, %v409_v29 }
 0x539   :  { %v1672_v53 = vmax.f32 %v1656_v28, 0.0 }
 0x53b   :  { %1619 = vmatmul.bf16.gmra.mxu3 %v3643_v22  ;;  %v4550_v58 = vpack.c.bf16 %v1672_v53, %v1671_v11  ;;  %v427_v22 = vadd.f32 %v4269_v4, %v4544_v48  ;;  %v439_v4 = vadd.f32 %v4291_v55, %v4544_v48 }
 0x53e   :  { %v1580_v1 = vpop.f32.mrf.mxu3 }
 0x53f   :  { %v1657_v21 = vadd.f32 %v1580_v1, %v412_v14 }
 0x541   :  { %v1673_v25 = vmax.f32 %v1657_v21, 0.0 }
 0x546   :  { %v1582_v0 = vpop.f32.mrf.mxu3 }
 0x547   :  { %v1658_v10 = vadd.f32 %v1582_v0, %v414_v16  ;;  %v3647_v16 = vld [vmem:[#allocation5 + $0x68] sm:$0xff] }
 0x549   :  { %v1674_v12 = vmax.f32 %v1658_v10, 0.0  ;;  %v3648_v10 = vld [vmem:[#allocation5 + $0x70] sm:$0xff] }
 0x54b   :  { %1624 = vmatmul.bf16.gmra.mxu3 %v3644_v26  ;;  %v4556_v54 = vpack.c.bf16 %v1674_v12, %v1673_v25  ;;  %v3649_v12 = vld [vmem:[#allocation5 + $0x78] sm:$0xff] }
 0x54e   :  { %v1585_v56 = vpop.f32.mrf.mxu3 }
 0x54f   :  { %v1659_v37 = vadd.f32 %v1585_v56, %v417_v6  ;;  %v442_v6 = vadd.f32 %v4293_v34, %v4544_v48  ;;  %v444_v56 = vadd.f32 %v4297_v19, %v4544_v48  ;;  %v432_v34 = vadd.f32 %v4277_v61, %v4544_v48  ;;  %v3651_v61 = vld [vmem:[#allocation7 + $0x8] sm:$0xff] }
 0x550   :  { %v429_v19 = vadd.f32 %v4271_v32, %v4544_v48  ;;  %v3650_v32 = vld [vmem:[#allocation7] sm:$0xff] }
 0x551   :  { %v1675_v45 = vmax.f32 %v1659_v37, 0.0 }
 0x556   :  { %v1587_v7 = vpop.f32.mrf.mxu3 }
 0x557   :  { %v1660_v13 = vadd.f32 %v1587_v7, %v419_v59  ;;  %v437_v7 = vadd.f32 %v4285_v15, %v4544_v48 }
 0x559   :  { %v1676_v63 = vmax.f32 %v1660_v13, 0.0 }
 0x55b   :  { %1629 = vmatmul.bf16.gmra.mxu3 %v3645_v9  ;;  %v1689_v3 = vpack.c.bf16 %v1676_v63, %v1675_v45  ;;  %v434_v63 = vadd.f32 %v4283_v50, %v4544_v48  ;;  %v3652_v48 = vld [vmem:[#allocation7 + $0x10] sm:$0xff] }
 0x55e   :  { %v1590_v8 = vpop.f32.mrf.mxu3 }
 0x55f   :  { %v1661_v36 = vadd.f32 %v1590_v8, %v422_v33 }
 0x561   :  { %v1677_v28 = vmax.f32 %v1661_v36, 0.0 }
 0x566   :  { %v1592_v29 = vpop.f32.mrf.mxu3 }
 0x567   :  { %v1662_v17 = vadd.f32 %v1592_v29, %v424_v44 }
 0x569   :  { %v1678_v11 = vmax.f32 %v1662_v17, 0.0 }
 0x56b   :  { %1634 = vmatmul.bf16.gmra.mxu3 %v3646_v42  ;;  %v1690_v53 = vpack.c.bf16 %v1678_v11, %v1677_v28 }
 0x56e   :  { %v1595_v14 = vpop.f32.mrf.mxu3 }
 0x56f   :  { %v1663_v1 = vadd.f32 %v1595_v14, %v427_v22 }
 0x571   :  { %v1679_v14 = vmax.f32 %v1663_v1, 0.0  ;;  %v3553_v1 = vld [vmem:[#allocation10 + $0x78] sm:$0xff] }
 0x572   :  { %1838 = vmatpush.bf16.msrb.mxu1 %v3553_v1  ;;  %v4998_v1 = vld [vmem:[#allocation49_spill] sm:$0xff] }
 0x576   :  { %v1597_v21 = vpop.f32.mrf.mxu3 }
 0x577   :  { %v1664_v15 = vadd.f32 %v1597_v21, %v429_v19  ;;  %v3653_v21 = vld [vmem:[#allocation7 + $0x18] sm:$0xff] }
 0x579   :  { %v1680_v50 = vmax.f32 %v1664_v15, 0.0 }
 0x57b   :  { %1639 = vmatmul.bf16.gmra.mxu3 %v3647_v16  ;;  %v1691_v16 = vpack.c.bf16 %v1680_v50, %v1679_v14 }
 0x57e   :  { %v1600_v30 = vpop.f32.mrf.mxu3 }
 0x57f   :  { %v1665_v29 = vadd.f32 %v1600_v30, %v432_v34  ;;  %v3569_v30 = vld [vmem:[#allocation13 + $0x78] sm:$0xff] }
 0x581   :  { %v1681_v42 = vmax.f32 %v1665_v29, 0.0 }
 0x586   :  { %v1602_v0 = vpop.f32.mrf.mxu3 }
 0x587   :  { %v1666_v55 = vadd.f32 %v1602_v0, %v434_v63  ;;  %v3654_v0 = vld [vmem:[#allocation7 + $0x20] sm:$0xff] }
 0x589   :  { %v1682_v28 = vmax.f32 %v1666_v55, 0.0 }
 0x58b   :  { %1644 = vmatmul.bf16.gmra.mxu3 %v3648_v10  ;;  %v1692_v22 = vpack.c.bf16 %v1682_v28, %v1681_v42  ;;  %v3568_v10 = vld [vmem:[#allocation13 + $0x70] sm:$0xff] }
 0x58e   :  { %v1605_v43 = vpop.f32.mrf.mxu3 }
 0x58f   :  { %v1667_v9 = vadd.f32 %v1605_v43, %v437_v7  ;;  %v3655_v43 = vld [vmem:[#allocation7 + $0x28] sm:$0xff]  ;;  %v3548_v7 = vld [vmem:[#allocation10 + $0x50] sm:$0xff] }
 0x591   :  { %v1683_v17 = vmax.f32 %v1667_v9, 0.0  ;;  %v3546_v9 = vld [vmem:[#allocation10 + $0x40] sm:$0xff] }
 0x596   :  { %v1607_v25 = vpop.f32.mrf.mxu3 }
 0x597   :  { %v1668_v13 = vadd.f32 %v1607_v25, %v439_v4  ;;  %v3551_v25 = vld [vmem:[#allocation10 + $0x68] sm:$0xff] }
 0x598   :  { %v3563_v4 = vld [vmem:[#allocation13 + $0x48] sm:$0xff] }
 0x599   :  { %v1684_v36 = vmax.f32 %v1668_v13, 0.0  ;;  %v3656_v13 = vld [vmem:[#allocation7 + $0x30] sm:$0xff] }
 0x59b   :  { %1649 = vmatmul.bf16.gmra.mxu3 %v3649_v12  ;;  %v1693_v11 = vpack.c.bf16 %v1684_v36, %v1683_v17 }
 0x59e   :  { %v1610_v26 = vpop.f32.mrf.mxu3 }
 0x59f   :  { %v1669_v37 = vadd.f32 %v1610_v26, %v442_v6  ;;  %v3564_v26 = vld [vmem:[#allocation13 + $0x50] sm:$0xff]  ;;  %v3550_v6 = vld [vmem:[#allocation10 + $0x60] sm:$0xff] }
 0x5a1   :  { %v1685_v33 = vmax.f32 %v1669_v37, 0.0 }
 0x5a6   :  { %v1612_v59 = vpop.f32.mrf.mxu3 }
 0x5a7   :  { %v1670_v45 = vadd.f32 %v1612_v59, %v444_v56  ;;  %v3549_v56 = vld [vmem:[#allocation10 + $0x58] sm:$0xff]  ;;  %v3562_v59 = vld [vmem:[#allocation13 + $0x40] sm:$0xff] }
 0x5a9   :  { %v1686_v8 = vmax.f32 %v1670_v45, 0.0  ;;  %v3547_v45 = vld [vmem:[#allocation10 + $0x48] sm:$0xff] }
 0x5ab   :  { %v1694_v44 = vpack.c.bf16 %v1686_v8, %v1685_v33  ;;  %v3657_v8 = vld [vmem:[#allocation7 + $0x38] sm:$0xff] }
 0x5ad   :  { %1695 = vmatpush.bf16.msrb.mxu0 %v1694_v44 }
 0x5ae   :  { %v1615_v12 = vpop.f32.mrf.mxu3 }
 0x5af   :  { %v2062_v36 = vadd.f32 %v1615_v12, %v4422_v60 }
 0x5b1   :  { %1696 = vmatpush.bf16.msrb.mxu0 %v1693_v11 }
 0x5b5   :  { %1697 = vmatpush.bf16.msrb.mxu0 %v1692_v22 }
 0x5b6   :  { %v1617_v37 = vpop.f32.mrf.mxu3 }
 0x5b7   :  { %v2063_v55 = vadd.f32 %v1617_v37, %v4418_v24 }
 0x5b9   :  { %1698 = vmatpush.bf16.msrb.mxu0 %v1691_v16  ;;  %v2095_v19 = vpack.c.bf16 %v2063_v55, %v2062_v36  ;;  %v5002_v55 = vld [vmem:[#allocation46_spill] sm:$0xff] }
 0x5bd   :  { %1699 = vmatpush.bf16.msrb.mxu0 %v1690_v53  ;;  %v3565_v53 = vld [vmem:[#allocation13 + $0x58] sm:$0xff] }
 0x5be   :  { %v1620_v63 = vpop.f32.mrf.mxu3 }
 0x5bf   :  { %v2064_v50 = vadd.f32 %v1620_v63, %v4416_v18 }
 0x5c1   :  { %1700 = vmatpush.bf16.msrb.mxu0 %v1689_v3  ;;  %v3552_v3 = vld [vmem:[#allocation10 + $0x70] sm:$0xff] }
 0x5c2   :  { %1839 = vmatpush.bf16.msrb.mxu1 %v3552_v3 }
 0x5c5   :  { %1701 = vmatpush.bf16.msrb.mxu0 %v4556_v54  ;;  %v3567_v54 = vld [vmem:[#allocation13 + $0x68] sm:$0xff] }
 0x5c6   :  { %1840 = vmatpush.bf16.msrb.mxu1 %v3551_v25  ;;  %v1622_v33 = vpop.f32.mrf.mxu3 }
 0x5c7   :  { %v2065_v42 = vadd.f32 %v1622_v33, %v4412_v40 }
 0x5c9   :  { %1702 = vmatpush.bf16.msrb.mxu0 %v4550_v58  ;;  %v3566_v58 = vld [vmem:[#allocation13 + $0x60] sm:$0xff]  ;;  %v2096_v16 = vpack.c.bf16 %v2065_v42, %v2064_v50 }
 0x5ca   :  { %1841 = vmatpush.bf16.msrb.mxu1 %v3550_v6  ;;  %v5003_v50 = vld [vmem:[#allocation43_spill] sm:$0xff] }
 0x5cc   :  { %1703 = vmatmul.bf16.vlgmr.msrb.gmra.mxu0 %v3650_v32 }
 0x5cd   :  { %2156 = vmatpush.bf16.msra.mxu0 %v3569_v30 }
 0x5ce   :  { %1842 = vmatpush.bf16.msrb.mxu1 %v3549_v56  ;;  %v1625_v34 = vpop.f32.mrf.mxu3  ;;  %v5000_v56 = vld [vmem:[#allocation48_spill] sm:$0xff] }
 0x5d1   :  { %2157 = vmatpush.bf16.msra.mxu0 %v3568_v10  ;;  %v2066_v10 = vadd.f32 %v1625_v34, %v4998_v1 }
 0x5d2   :  { %1843 = vmatpush.bf16.msrb.mxu1 %v3548_v7 }
 0x5d5   :  { %2158 = vmatpush.bf16.msra.mxu0 %v3567_v54 }
 0x5d6   :  { %1844 = vmatpush.bf16.msrb.mxu1 %v3547_v45  ;;  %v1627_v29 = vpop.f32.mrf.mxu3 }
 0x5d9   :  { %2159 = vmatpush.bf16.msra.mxu0 %v3566_v58 }
 0x5da   :  { %1845 = vmatpush.bf16.msrb.mxu1 %v3546_v9 }
 0x5dc   :  { %1708 = vmatmul.bf16.gmra.mxu0 %v3651_v61 }
 0x5dd   :  { %2160 = vmatpush.bf16.msra.mxu0 %v3565_v53 }
 0x5de   :  { %v1630_v22 = vpop.f32.mrf.mxu3 }
 0x5df   :  { %v2068_v37 = vadd.f32 %v1630_v22, %v5000_v56 }
 0x5e1   :  { %2161 = vmatpush.bf16.msra.mxu0 %v3564_v26  ;;  %v4999_v26 = vld [vmem:[#allocation47_spill] sm:$0xff] }
 0x5e5   :  { %2162 = vmatpush.bf16.msra.mxu0 %v3563_v4 }
 0x5e9   :  { %2163 = vmatpush.bf16.msra.mxu0 %v3562_v59 }
 0x5ec   :  { %1713 = vmatmul.bf16.gmra.mxu0 %v3652_v48 }
 0x5fc   :  { %1718 = vmatmul.bf16.gmra.mxu0 %v3653_v21  ;;  %v1632_v21 = vpop.f32.mrf.mxu3 }
 0x5fd   :  { %v2069_v6 = vadd.f32 %v1632_v21, %v4999_v26  ;;  %v3576_v21 = vld [vmem:[#allocation14 + $0x70] sm:$0xff] }
 0x5ff   :  { %v2098_v7 = vpack.c.bf16 %v2069_v6, %v2068_v37  ;;  %v5006_v37 = vld [vmem:[#allocation42_spill] sm:$0xff] }
 0x604   :  { %v1635_v58 = vpop.f32.mrf.mxu3 }
 0x605   :  { %v2070_v36 = vadd.f32 %v1635_v58, %v5002_v55 }
 0x60c   :  { %1723 = vmatmul.bf16.gmra.mxu0 %v3654_v0  ;;  %v2067_v0 = vadd.f32 %v1627_v29, %v4406_v20  ;;  %v1637_v4 = vpop.f32.mrf.mxu3 }
 0x60e   :  { %v2097_v54 = vpack.c.bf16 %v2067_v0, %v2066_v10  ;;  %v3575_v0 = vld [vmem:[#allocation14 + $0x68] sm:$0xff] }
 0x61c   :  { %1728 = vmatmul.bf16.gmra.mxu0 %v3655_v43 }
 0x62c   :  { %1733 = vmatmul.bf16.gmra.mxu0 %v3656_v13  ;;  %v1640_v13 = vpop.f32.mrf.mxu3 }
 0x634   :  { %v1642_v29 = vpop.f32.mrf.mxu3 }
 0x635   :  { %v2073_v22 = vadd.f32 %v1642_v29, %v5003_v50 }
 0x63c   :  { %1738 = vmatmul.bf16.gmra.mxu0 %v3657_v8  ;;  %v5001_v8 = vld [vmem:[#allocation45_spill] sm:$0xff]  ;;  %v1645_v42 = vpop.f32.mrf.mxu3 }
 0x63d   :  { %v2071_v34 = vadd.f32 %v1637_v4, %v5001_v8  ;;  %v3573_v4 = vld [vmem:[#allocation14 + $0x58] sm:$0xff] }
 0x649   :  { %v1704_v44 = vpop.f32.mrf.mxu0 }
 0x64a   :  { %v1744_v15 = vadd.f32 %v1704_v44, %v4464_v57 }
 0x64c   :  { %2164 = vmatmul.bf16.vlgmr.msra.gmra.mxu0 %v2095_v19  ;;  %v2099_v19 = vpack.c.bf16 %v2071_v34, %v2070_v36  ;;  %v3571_v34 = vld [vmem:[#allocation14 + $0x48] sm:$0xff] }
 0x651   :  { %v1706_v17 = vpop.f32.mrf.mxu0 }
 0x652   :  { %v1745_v28 = vadd.f32 %v1706_v17, %v4535_v62 }
 0x654   :  { %v1777_v11 = vpack.c.bf16 %v1745_v28, %v1744_v15 }
 0x656   :  { %1846 = vmatmul.bf16.vlgmr.msrb.gmra.mxu1 %v1777_v11 }
 0x659   :  { %v1709_v14 = vpop.f32.mrf.mxu0 }
 0x65a   :  { %v1746_v61 = vadd.f32 %v1709_v14, %v4469_v52  ;;  %v3577_v14 = vld [vmem:[#allocation14 + $0x78] sm:$0xff] }
 0x65b   :  { %2294 = vmatpush.bf16.msra.mxu1 %v3577_v14  ;;  %v5008_v14 = vld [vmem:[#allocation39_spill] sm:$0xff] }
 0x65c   :  { %2169 = vmatmul.bf16.gmra.mxu0 %v2096_v16  ;;  %v5004_v16 = vld [vmem:[#allocation44_spill] sm:$0xff] }
 0x65f   :  { %2295 = vmatpush.bf16.msra.mxu1 %v3576_v21 }
 0x661   :  { %v1711_v32 = vpop.f32.mrf.mxu0 }
 0x662   :  { %v1747_v48 = vadd.f32 %v1711_v32, %v4530_v46  ;;  %v2072_v32 = vadd.f32 %v1640_v13, %v5004_v16 }
 0x663   :  { %2296 = vmatpush.bf16.msra.mxu1 %v3575_v0 }
 0x664   :  { %v1778_v30 = vpack.c.bf16 %v1747_v48, %v1746_v61  ;;  %v2100_v48 = vpack.c.bf16 %v2073_v22, %v2072_v32 }
 0x666   :  { %1851 = vmatmul.bf16.gmra.mxu1 %v1778_v30  ;;  %v1647_v30 = vpop.f32.mrf.mxu3 }
 0x669   :  { %v1714_v3 = vpop.f32.mrf.mxu0 }
 0x66a   :  { %v1748_v43 = vadd.f32 %v1714_v3, %v4474_v31  ;;  %v3561_v3 = vld [vmem:[#allocation11 + $0x78] sm:$0xff] }
 0x66b   :  { %1981 = vmatpush.bf16.msrb.mxu2 %v3561_v3 }
 0x66c   :  { %2174 = vmatmul.bf16.gmra.mxu0 %v2097_v54 }
 0x671   :  { %v1716_v53 = vpop.f32.mrf.mxu0 }
 0x672   :  { %v1749_v25 = vadd.f32 %v1716_v53, %v4525_v5  ;;  %v3574_v53 = vld [vmem:[#allocation14 + $0x60] sm:$0xff] }
 0x673   :  { %2297 = vmatpush.bf16.msra.mxu1 %v3574_v53  ;;  %v4619_v53 = vld [vmem:[%s4933_s12 + $0x1] ss:$0 sm:$0xff] }
 0x674   :  { %v1779_v12 = vpack.c.bf16 %v1749_v25, %v1748_v43  ;;  %v3560_v25 = vld [vmem:[#allocation11 + $0x70] sm:$0xff] }
 0x675   :  { %1982 = vmatpush.bf16.msrb.mxu2 %v3560_v25 }
 0x676   :  { %1856 = vmatmul.bf16.gmra.mxu1 %v1779_v12  ;;  %v5005_v12 = vld [vmem:[#allocation41_spill] sm:$0xff] }
 0x677   :  { %v2075_v6 = vadd.f32 %v1647_v30, %v5005_v12  ;;  %2298 = vmatpush.bf16.msra.mxu1 %v3573_v4  ;;  %v3554_v30 = vld [vmem:[#allocation11 + $0x40] sm:$0xff] }
 0x679   :  { %v1719_v59 = vpop.f32.mrf.mxu0 }
 0x67a   :  { %v1750_v63 = vadd.f32 %v1719_v59, %v4479_v23  ;;  %v2074_v59 = vadd.f32 %v1645_v42, %v5006_v37  ;;  %v5007_v42 = vld [vmem:[#allocation40_spill] sm:$0xff] }
 0x67c   :  { %2179 = vmatmul.bf16.gmra.mxu0 %v2098_v7  ;;  %v1650_v7 = vpop.f32.mrf.mxu3 }
 0x67d   :  { %v2076_v32 = vadd.f32 %v1650_v7, %v5008_v14 }
 0x681   :  { %v1721_v45 = vpop.f32.mrf.mxu0 }
 0x682   :  { %v1751_v9 = vadd.f32 %v1721_v45, %v4518_v41  ;;  %v3559_v45 = vld [vmem:[#allocation11 + $0x68] sm:$0xff] }
 0x683   :  { %1983 = vmatpush.bf16.msrb.mxu2 %v3559_v45  ;;  %v4626_v45 = vld [vmem:[%s4929_s8 + $0x1] ss:$0 sm:$0xff] }
 0x684   :  { %v1780_v33 = vpack.c.bf16 %v1751_v9, %v1750_v63  ;;  %v2101_v63 = vpack.c.bf16 %v2075_v6, %v2074_v59  ;;  %v3572_v9 = vld [vmem:[#allocation14 + $0x50] sm:$0xff] }
 0x685   :  { %2299 = vmatpush.bf16.msra.mxu1 %v3572_v9 }
 0x686   :  { %1861 = vmatmul.bf16.gmra.mxu1 %v1780_v33  ;;  %v3558_v33 = vld [vmem:[#allocation11 + $0x60] sm:$0xff] }
 0x687   :  { %1984 = vmatpush.bf16.msrb.mxu2 %v3558_v33 }
 0x689   :  { %v1724_v44 = vpop.f32.mrf.mxu0  ;;  %2300 = vmatpush.bf16.msra.mxu1 %v3571_v34 }
 0x68a   :  { %v1752_v15 = vadd.f32 %v1724_v44, %v4482_v49  ;;  %v3557_v44 = vld [vmem:[#allocation11 + $0x58] sm:$0xff] }
 0x68b   :  { %1985 = vmatpush.bf16.msrb.mxu2 %v3557_v44 }
 0x68c   :  { %2184 = vmatmul.bf16.gmra.mxu0 %v2099_v19 }
 0x691   :  { %v1726_v17 = vpop.f32.mrf.mxu0 }
 0x692   :  { %v1753_v28 = vadd.f32 %v1726_v17, %v4512_v47  ;;  %v1652_v17 = vpop.f32.mrf.mxu3 }
 0x693   :  { %v2077_v22 = vadd.f32 %v1652_v17, %v5007_v42 }
 0x694   :  { %v1781_v11 = vpack.c.bf16 %v1753_v28, %v1752_v15  ;;  %v3570_v15 = vld [vmem:[#allocation14 + $0x40] sm:$0xff] }
 0x695   :  { %2301 = vmatpush.bf16.msra.mxu1 %v3570_v15  ;;  %v2102_v21 = vpack.c.bf16 %v2077_v22, %v2076_v32 }
 0x696   :  { %1866 = vmatmul.bf16.gmra.mxu1 %v1781_v11  ;;  %v3556_v11 = vld [vmem:[#allocation11 + $0x50] sm:$0xff] }
 0x697   :  { %1986 = vmatpush.bf16.msrb.mxu2 %v3556_v11 }
 0x699   :  { %v1729_v61 = vpop.f32.mrf.mxu0 }
 0x69a   :  { %v1754_v54 = vadd.f32 %v1729_v61, %v4510_v39 }
 0x69c   :  { %2189 = vmatmul.bf16.gmra.mxu0 %v2100_v48  ;;  %v3555_v48 = vld [vmem:[#allocation11 + $0x48] sm:$0xff] }
 0x69d   :  { %1987 = vmatpush.bf16.msrb.mxu2 %v3555_v48 }
 0x6a1   :  { %v1731_v10 = vpop.f32.mrf.mxu0  ;;  %1988 = vmatpush.bf16.msrb.mxu2 %v3554_v30 }
 0x6a2   :  { %v1755_v58 = vadd.f32 %v1731_v10, %v4504_v27 }
 0x6a4   :  { %v1782_v43 = vpack.c.bf16 %v1755_v58, %v1754_v54 }
 0x6a6   :  { %1871 = vmatmul.bf16.gmra.mxu1 %v1782_v43 }
 0x6a9   :  { %v1734_v13 = vpop.f32.mrf.mxu0 }
 0x6aa   :  { %v1756_v19 = vadd.f32 %v1734_v13, %v4502_v2 }
 0x6ac   :  { %2194 = vmatmul.bf16.gmra.mxu0 %v2101_v63 }
 0x6b1   :  { %v1736_v36 = vpop.f32.mrf.mxu0 }
 0x6b2   :  { %v1757_v29 = vadd.f32 %v1736_v36, %v4496_v51 }
 0x6b4   :  { %v1783_v28 = vpack.c.bf16 %v1757_v29, %v1756_v19 }
 0x6b6   :  { %1876 = vmatmul.bf16.gmra.mxu1 %v1783_v28 }
 0x6b9   :  { %v1739_v61 = vpop.f32.mrf.mxu0 }
 0x6ba   :  { %v1758_v10 = vadd.f32 %v1739_v61, %v4492_v38 }
 0x6bc   :  { %2199 = vmatmul.bf16.gmra.mxu0 %v2102_v21 }
 0x6c1   :  { %v1741_v0 = vpop.f32.mrf.mxu0 }
 0x6c2   :  { %v1759_v3 = vadd.f32 %v1741_v0, %v4494_v35 }
 0x6c4   :  { %v1784_v54 = vpack.c.bf16 %v1759_v3, %v1758_v10 }
 0x6c6   :  { %1881 = vmatmul.bf16.gmra.mxu1 %v1784_v54 }
 0x6c9   :  { %v2165_v58 = vpop.f32.mrf.mxu0 }
 0x6ca   :  { %v2166_v43 = vadd.f32 %v4619_v53, %v2165_v58 }
 0x6cc   :  { %v2205_v59 = vmax.f32 %v2166_v43, 0.0 }
 0x6d1   :  { %v2167_v25 = vpop.f32.mrf.mxu0 }
 0x6d2   :  { %v2168_v6 = vadd.f32 %v4619_v53, %v2167_v25 }
 0x6d3   :  { %v1847_v4 = vpop.f32.mrf.mxu1 }
 0x6d4   :  { %v2206_v7 = vmax.f32 %v2168_v6, 0.0  ;;  %v1848_v9 = vadd.f32 %v4626_v45, %v1847_v4 }
 0x6d6   :  { %v2238_v13 = vpack.c.bf16 %v2206_v7, %v2205_v59  ;;  %v1887_v36 = vmax.f32 %v1848_v9, 0.0 }
 0x6d8   :  { %2302 = vmatmul.bf16.vlgmr.msra.gmra.mxu1 %v2238_v13 }
 0x6d9   :  { %v2170_v63 = vpop.f32.mrf.mxu0 }
 0x6da   :  { %v2171_v19 = vadd.f32 %v4619_v53, %v2170_v63 }
 0x6db   :  { %v1849_v33 = vpop.f32.mrf.mxu1 }
 0x6dc   :  { %v1850_v34 = vadd.f32 %v4626_v45, %v1849_v33  ;;  %v2207_v11 = vmax.f32 %v2171_v19, 0.0 }
 0x6de   :  { %v1888_v44 = vmax.f32 %v1850_v34, 0.0 }
 0x6e0   :  { %v1920_v29 = vpack.c.bf16 %v1888_v44, %v1887_v36 }
 0x6e1   :  { %v2172_v17 = vpop.f32.mrf.mxu0 }
 0x6e2   :  { %v2173_v15 = vadd.f32 %v4619_v53, %v2172_v17  ;;  %1989 = vmatmul.bf16.vlgmr.msrb.gmra.mxu2 %v1920_v29 }
 0x6e3   :  { %v1852_v28 = vpop.f32.mrf.mxu1 }
 0x6e4   :  { %v2208_v22 = vmax.f32 %v2173_v15, 0.0  ;;  %v1853_v48 = vadd.f32 %v4626_v45, %v1852_v28 }
 0x6e6   :  { %v2239_v32 = vpack.c.bf16 %v2208_v22, %v2207_v11  ;;  %v1889_v0 = vmax.f32 %v1853_v48, 0.0 }
 0x6e8   :  { %2307 = vmatmul.bf16.gmra.mxu1 %v2239_v32 }
 0x6e9   :  { %v2175_v61 = vpop.f32.mrf.mxu0 }
 0x6ea   :  { %v2176_v3 = vadd.f32 %v4619_v53, %v2175_v61 }
 0x6eb   :  { %v1854_v21 = vpop.f32.mrf.mxu1 }
 0x6ec   :  { %v1855_v30 = vadd.f32 %v4626_v45, %v1854_v21  ;;  %v2209_v6 = vmax.f32 %v2176_v3, 0.0 }
 0x6ee   :  { %v1890_v10 = vmax.f32 %v1855_v30, 0.0 }
 0x6f0   :  { %v1921_v54 = vpack.c.bf16 %v1890_v10, %v1889_v0 }
 0x6f1   :  { %v2177_v58 = vpop.f32.mrf.mxu0 }
 0x6f2   :  { %v2178_v43 = vadd.f32 %v4619_v53, %v2177_v58  ;;  %1994 = vmatmul.bf16.gmra.mxu2 %v1921_v54 }
 0x6f3   :  { %v1857_v25 = vpop.f32.mrf.mxu1 }
 0x6f4   :  { %v2210_v4 = vmax.f32 %v2178_v43, 0.0  ;;  %v1858_v13 = vadd.f32 %v4626_v45, %v1857_v25 }
 0x6f6   :  { %v2240_v59 = vpack.c.bf16 %v2210_v4, %v2209_v6  ;;  %v1891_v33 = vmax.f32 %v1858_v13, 0.0 }
 0x6f8   :  { %2312 = vmatmul.bf16.gmra.mxu1 %v2240_v59 }
 0x6f9   :  { %v2180_v7 = vpop.f32.mrf.mxu0 }
 0x6fa   :  { %v2181_v36 = vadd.f32 %v4619_v53, %v2180_v7 }
 0x6fb   :  { %v1859_v63 = vpop.f32.mrf.mxu1 }
 0x6fc   :  { %v1860_v9 = vadd.f32 %v4626_v45, %v1859_v63  ;;  %v2211_v15 = vmax.f32 %v2181_v36, 0.0 }
 0x6fe   :  { %v1892_v34 = vmax.f32 %v1860_v9, 0.0 }
 0x700   :  { %v1922_v44 = vpack.c.bf16 %v1892_v34, %v1891_v33 }
 0x701   :  { %v2182_v19 = vpop.f32.mrf.mxu0 }
 0x702   :  { %v2183_v29 = vadd.f32 %v4619_v53, %v2182_v19  ;;  %1999 = vmatmul.bf16.gmra.mxu2 %v1922_v44 }
 0x703   :  { %v1862_v17 = vpop.f32.mrf.mxu1 }
 0x704   :  { %v2212_v28 = vmax.f32 %v2183_v29, 0.0  ;;  %v1863_v32 = vadd.f32 %v4626_v45, %v1862_v17 }
 0x706   :  { %v2241_v11 = vpack.c.bf16 %v2212_v28, %v2211_v15  ;;  %v1893_v21 = vmax.f32 %v1863_v32, 0.0 }
 0x708   :  { %2317 = vmatmul.bf16.gmra.mxu1 %v2241_v11 }
 0x709   :  { %v2185_v22 = vpop.f32.mrf.mxu0 }
 0x70a   :  { %v2186_v0 = vadd.f32 %v4619_v53, %v2185_v22 }
 0x70b   :  { %v1864_v61 = vpop.f32.mrf.mxu1 }
 0x70c   :  { %v1865_v48 = vadd.f32 %v4626_v45, %v1864_v61  ;;  %v2213_v43 = vmax.f32 %v2186_v0, 0.0 }
 0x70e   :  { %v1894_v30 = vmax.f32 %v1865_v48, 0.0 }
 0x710   :  { %v1923_v10 = vpack.c.bf16 %v1894_v30, %v1893_v21 }
 0x711   :  { %v2187_v3 = vpop.f32.mrf.mxu0 }
 0x712   :  { %v2188_v54 = vadd.f32 %v4619_v53, %v2187_v3  ;;  %2004 = vmatmul.bf16.gmra.mxu2 %v1923_v10 }
 0x713   :  { %v1867_v58 = vpop.f32.mrf.mxu1 }
 0x714   :  { %v2214_v25 = vmax.f32 %v2188_v54, 0.0  ;;  %v1868_v59 = vadd.f32 %v4626_v45, %v1867_v58 }
 0x716   :  { %v2242_v6 = vpack.c.bf16 %v2214_v25, %v2213_v43  ;;  %v1895_v63 = vmax.f32 %v1868_v59, 0.0 }
 0x718   :  { %2322 = vmatmul.bf16.gmra.mxu1 %v2242_v6 }
 0x719   :  { %v2190_v4 = vpop.f32.mrf.mxu0 }
 0x71a   :  { %v2191_v33 = vadd.f32 %v4619_v53, %v2190_v4 }
 0x71b   :  { %v1869_v7 = vpop.f32.mrf.mxu1 }
 0x71c   :  { %v1870_v13 = vadd.f32 %v4626_v45, %v1869_v7  ;;  %v2215_v29 = vmax.f32 %v2191_v33, 0.0 }
 0x71e   :  { %v1896_v9 = vmax.f32 %v1870_v13, 0.0 }
 0x720   :  { %v1924_v34 = vpack.c.bf16 %v1896_v9, %v1895_v63 }
 0x721   :  { %v2192_v36 = vpop.f32.mrf.mxu0 }
 0x722   :  { %v2193_v44 = vadd.f32 %v4619_v53, %v2192_v36  ;;  %2009 = vmatmul.bf16.gmra.mxu2 %v1924_v34 }
 0x723   :  { %v1872_v19 = vpop.f32.mrf.mxu1 }
 0x724   :  { %v2216_v17 = vmax.f32 %v2193_v44, 0.0  ;;  %v1873_v11 = vadd.f32 %v4626_v45, %v1872_v19 }
 0x726   :  { %v2243_v15 = vpack.c.bf16 %v2216_v17, %v2215_v29  ;;  %v1897_v61 = vmax.f32 %v1873_v11, 0.0 }
 0x728   :  { %2327 = vmatmul.bf16.gmra.mxu1 %v2243_v15 }
 0x729   :  { %v2195_v28 = vpop.f32.mrf.mxu0 }
 0x72a   :  { %v2196_v21 = vadd.f32 %v4619_v53, %v2195_v28 }
 0x72b   :  { %v1874_v22 = vpop.f32.mrf.mxu1 }
 0x72c   :  { %v1875_v32 = vadd.f32 %v4626_v45, %v1874_v22  ;;  %v2217_v54 = vmax.f32 %v2196_v21, 0.0 }
 0x72e   :  { %v1898_v48 = vmax.f32 %v1875_v32, 0.0 }
 0x730   :  { %v1925_v30 = vpack.c.bf16 %v1898_v48, %v1897_v61 }
 0x731   :  { %v2197_v0 = vpop.f32.mrf.mxu0 }
 0x732   :  { %v2198_v10 = vadd.f32 %v4619_v53, %v2197_v0  ;;  %2014 = vmatmul.bf16.gmra.mxu2 %v1925_v30 }
 0x733   :  { %v1877_v3 = vpop.f32.mrf.mxu1 }
 0x734   :  { %v2218_v58 = vmax.f32 %v2198_v10, 0.0  ;;  %v1878_v6 = vadd.f32 %v4626_v45, %v1877_v3 }
 0x736   :  { %v2244_v43 = vpack.c.bf16 %v2218_v58, %v2217_v54  ;;  %v1899_v7 = vmax.f32 %v1878_v6, 0.0 }
 0x738   :  { %2332 = vmatmul.bf16.gmra.mxu1 %v2244_v43 }
 0x739   :  { %v2200_v25 = vpop.f32.mrf.mxu0 }
 0x73a   :  { %v2201_v63 = vadd.f32 %v4619_v53, %v2200_v25 }
 0x73b   :  { %v1879_v4 = vpop.f32.mrf.mxu1 }
 0x73c   :  { %v1880_v59 = vadd.f32 %v4626_v45, %v1879_v4  ;;  %v2219_v44 = vmax.f32 %v2201_v63, 0.0 }
 0x73e   :  { %v1900_v13 = vmax.f32 %v1880_v59, 0.0 }
 0x740   :  { %v1926_v9 = vpack.c.bf16 %v1900_v13, %v1899_v7  ;;  %v3613_v13 = vld [vmem:[%s4935_s14 + $0x1] ss:$0 sm:$0xff]  ;;  %s2947_s14 = sshll.u32 %s4936_s15, 4  ;;  %s2948_s14 = int_to_ptr.hbm [resolvable:$true] %s2947_s14 }
 0x741   :  { %v2202_v33 = vpop.f32.mrf.mxu0 }
 0x742   :  { %v2203_v34 = vadd.f32 %v4619_v53, %v2202_v33  ;;  %2019 = vmatmul.bf16.gmra.mxu2 %v1926_v9 }
 0x743   :  { %v1882_v36 = vpop.f32.mrf.mxu1 }
 0x744   :  { %v2220_v19 = vmax.f32 %v2203_v34, 0.0  ;;  %v1883_v17 = vadd.f32 %v4626_v45, %v1882_v36 }
 0x746   :  { %v2245_v29 = vpack.c.bf16 %v2220_v19, %v2219_v44  ;;  %v1901_v11 = vmax.f32 %v1883_v17, 0.0 }
 0x748   :  { %2337 = vmatmul.bf16.gmra.mxu1 %v2245_v29 }
 0x74b   :  { %v1884_v15 = vpop.f32.mrf.mxu1 }
 0x74c   :  { %v1885_v28 = vadd.f32 %v4626_v45, %v1884_v15 }
 0x74e   :  { %v1902_v22 = vmax.f32 %v1885_v28, 0.0 }
 0x750   :  { %v1927_v32 = vpack.c.bf16 %v1902_v22, %v1901_v11 }
 0x752   :  { %2024 = vmatmul.bf16.gmra.mxu2 %v1927_v32 }
 0x755   :  { %v2303_v61 = vpop.f32.mrf.mxu1 }
 0x75d   :  { %v2305_v48 = vpop.f32.mrf.mxu1 }
 0x765   :  { %v2308_v21 = vpop.f32.mrf.mxu1  ;;  %v4668_v22 = vpop.f32.mrf.mxu2 }
 0x76d   :  { %v2310_v30 = vpop.f32.mrf.mxu1 }
 0x775   :  { %v2313_v53 = vpop.f32.mrf.mxu1 }
 0x77d   :  { %v2315_v0 = vpop.f32.mrf.mxu1 }
 0x785   :  { %v2318_v10 = vpop.f32.mrf.mxu1 }
 0x78d   :  { %v2320_v3 = vpop.f32.mrf.mxu1 }
 0x795   :  { %v2323_v54 = vpop.f32.mrf.mxu1 }
 0x79d   :  { %v2325_v58 = vpop.f32.mrf.mxu1 }
 0x79e   :  { %v2352_v15 = vadd.f32 %v2325_v58, %v5001_v8  ;;  %v2347_v58 = vadd.f32 %v2313_v53, %v4998_v1 }
 0x7a0   :  { %v2373_v32 = vadd.f32 %v3613_v13, %v2352_v15  ;;  %v3664_v15 = vld [vmem:[%s4922_s1 + $0x30] sm:$0xff] }
 0x7a5   :  { %v2328_v43 = vpop.f32.mrf.mxu1 }
 0x7a6   :  { %v2353_v17 = vadd.f32 %v2328_v43, %v5004_v16  ;;  %v2348_v16 = vadd.f32 %v2315_v0, %v4406_v20  ;;  %v2343_v0 = vadd.f32 %v2303_v61, %v4422_v60  ;;  %v3659_v60 = vld [vmem:[%s4922_s1 + $0x8] sm:$0xff] }
 0x7ad   :  { %v2330_v25 = vpop.f32.mrf.mxu1 }
 0x7ae   :  { %v2354_v44 = vadd.f32 %v2330_v25, %v5003_v50  ;;  %v2349_v25 = vadd.f32 %v2318_v10, %v5000_v56  ;;  %v2344_v56 = vadd.f32 %v2305_v48, %v4418_v24  ;;  %v3660_v48 = vld [vmem:[%s4922_s1 + $0x10] sm:$0xff] }
 0x7b0   :  { %v2375_v28 = vadd.f32 %v3613_v13, %v2354_v44  ;;  %v2365_v1 = vadd.f32 %v3613_v13, %v2344_v56  ;;  %v3662_v44 = vld [vmem:[%s4922_s1 + $0x20] sm:$0xff] }
 0x7b5   :  { %v2333_v6 = vpop.f32.mrf.mxu1 }
 0x7b6   :  { %v2355_v33 = vadd.f32 %v2333_v6, %v5006_v37  ;;  %v2350_v37 = vadd.f32 %v2320_v3, %v4999_v26  ;;  %v2345_v3 = vadd.f32 %v2308_v21, %v4416_v18  ;;  %v3658_v18 = vld [vmem:[%s4922_s1] sm:$0xff] }
 0x7b8   :  { %v2371_v43 = vadd.f32 %v3613_v13, %v2350_v37 }
 0x7bd   :  { %v2335_v4 = vpop.f32.mrf.mxu1 }
 0x7be   :  { %v2356_v63 = vadd.f32 %v2335_v4, %v5005_v12  ;;  %v2351_v12 = vadd.f32 %v2323_v54, %v5002_v55  ;;  %v2370_v4 = vadd.f32 %v3613_v13, %v2349_v25  ;;  %v2346_v55 = vadd.f32 %v2310_v30, %v4412_v40 }
 0x7bf   :  { %v2369_v54 = vadd.f32 %v3613_v13, %v2348_v16 }
 0x7c0   :  { %v2377_v19 = vadd.f32 %v3613_v13, %v2356_v63  ;;  %v2372_v6 = vadd.f32 %v3613_v13, %v2351_v12  ;;  %v2383_v26 = vpack.c.bf16 %v2371_v43, %v2370_v4  ;;  %v2367_v10 = vadd.f32 %v3613_v13, %v2346_v55 }
 0x7c1   :  { %v2364_v63 = vadd.f32 %v3613_v13, %v2343_v0 }
 0x7c2   :  { %v2384_v8 = vpack.c.bf16 %v2373_v32, %v2372_v6 }
 0x7c3   :  { %v2380_v40 = vpack.c.bf16 %v2365_v1, %v2364_v63 }
 0x7c5   :  { %v2338_v59 = vpop.f32.mrf.mxu1 }
 0x7c6   :  { %v2357_v45 = vadd.f32 %v2338_v59, %v5008_v14  ;;  %v2376_v14 = vadd.f32 %v3613_v13, %v2355_v33  ;;  %v4675_v59 = vpop.f32.mrf.mxu2  ;;  %v3661_v33 = vld [vmem:[%s4922_s1 + $0x18] sm:$0xff] }
 0x7c8   :  { %v2378_v34 = vadd.f32 %v3613_v13, %v2357_v45  ;;  %v2386_v11 = vpack.c.bf16 %v2377_v19, %v2376_v14  ;;  %v2368_v45 = vadd.f32 %v3613_v13, %v2347_v58 }
 0x7ca   :  { %v2382_v20 = vpack.c.bf16 %v2369_v54, %v2368_v45 }
 0x7cd   :  { %v2340_v7 = vpop.f32.mrf.mxu1 }
 0x7ce   :  { %v2358_v9 = vadd.f32 %v2340_v7, %v5007_v42  ;;  %v2374_v42 = vadd.f32 %v3613_v13, %v2353_v17  ;;  %v2366_v7 = vadd.f32 %v3613_v13, %v2345_v3 }
 0x7d0   :  { %v2379_v36 = vadd.f32 %v3613_v13, %v2358_v9  ;;  %v2385_v50 = vpack.c.bf16 %v2375_v28, %v2374_v42  ;;  %v2381_v53 = vpack.c.bf16 %v2367_v10, %v2366_v7  ;;  %v1995_v9 = vpop.f32.mrf.mxu2  ;;  %v4716_v42 = vld [vmem:[%s4931_s10 + $0x1] ss:$0 sm:$0xff] }
 0x7d1   :  { %v1991_v37 = vadd.f32 %v4716_v42, %v4668_v22  ;;  %v1996_v43 = vadd.f32 %v4716_v42, %v1995_v9 }
 0x7d2   :  { %v2387_v29 = vpack.c.bf16 %v2379_v36, %v2378_v34 }
 0x7d3   :  { %v2032_v58 = vmax.f32 %v1996_v43, 0.0 }
 0x7d4   :  { %2388 = vmatpush.bf16.msra.mxu2 %v2387_v29  ;;  %v3663_v29 = vld [vmem:[%s4922_s1 + $0x28] sm:$0xff] }
 0x7d5   :  { %v2048_v4 = vadd.f32 %v2032_v58, %v4469_v52 }
 0x7d8   :  { %2389 = vmatpush.bf16.msra.mxu2 %v2386_v11  ;;  %v4684_v21 = vpop.f32.mrf.mxu2  ;;  %v3665_v11 = vld [vmem:[%s4922_s1 + $0x38] sm:$0xff] }
 0x7dc   :  { %2390 = vmatpush.bf16.msra.mxu2 %v2385_v50  ;;  %v2030_v50 = vmax.f32 %v1991_v37, 0.0 }
 0x7de   :  { %v2046_v25 = vadd.f32 %v2030_v50, %v4464_v57 }
 0x7e0   :  { %2391 = vmatpush.bf16.msra.mxu2 %v2384_v8  ;;  %v2000_v24 = vpop.f32.mrf.mxu2 }
 0x7e4   :  { %2392 = vmatpush.bf16.msra.mxu2 %v2383_v26  ;;  %v2001_v26 = vadd.f32 %v4716_v42, %v2000_v24 }
 0x7e6   :  { %v2034_v3 = vmax.f32 %v2001_v26, 0.0 }
 0x7e8   :  { %2393 = vmatpush.bf16.msra.mxu2 %v2382_v20  ;;  %v4689_v61 = vpop.f32.mrf.mxu2  ;;  %v2050_v57 = vadd.f32 %v2034_v3, %v4474_v31 }
 0x7ec   :  { %2394 = vmatpush.bf16.msra.mxu2 %v2381_v53 }
 0x7f0   :  { %2395 = vmatpush.bf16.msra.mxu2 %v2380_v40  ;;  %v2005_v30 = vpop.f32.mrf.mxu2 }
 0x7f1   :  { %v2006_v10 = vadd.f32 %v4716_v42, %v2005_v30 }
 0x7f3   :  { %2396 = vmatmul.bf16.vlgmr.msra.gmra.mxu2 %v3658_v18  ;;  %v2036_v0 = vmax.f32 %v2006_v10, 0.0  ;;  %v2003_v10 = vadd.f32 %v4716_v42, %v4689_v61  ;;  %v1993_v61 = vadd.f32 %v4716_v42, %v4675_v59 }
 0x7f5   :  { %v2052_v52 = vadd.f32 %v2036_v0, %v4479_v23 }
 0x7f8   :  { %v4694_v13 = vpop.f32.mrf.mxu2 }
 0x800   :  { %v2010_v34 = vpop.f32.mrf.mxu2 }
 0x801   :  { %v2011_v53 = vadd.f32 %v4716_v42, %v2010_v34 }
 0x803   :  { %2401 = vmatmul.bf16.gmra.mxu2 %v3659_v60  ;;  %v2038_v9 = vmax.f32 %v2011_v53, 0.0  ;;  %v2035_v53 = vmax.f32 %v2003_v10, 0.0 }
 0x805   :  { %v2054_v40 = vadd.f32 %v2038_v9, %v4482_v49 }
 0x808   :  { %v4699_v36 = vpop.f32.mrf.mxu2 }
 0x810   :  { %v2015_v19 = vpop.f32.mrf.mxu2 }
 0x813   :  { %2406 = vmatmul.bf16.gmra.mxu2 %v3660_v48 }
 0x818   :  { %v2017_v17 = vpop.f32.mrf.mxu2 }
 0x819   :  { %v2018_v49 = vadd.f32 %v4716_v42, %v2017_v17 }
 0x820   :  { %v2020_v14 = vpop.f32.mrf.mxu2 }
 0x821   :  { %v2021_v34 = vadd.f32 %v4716_v42, %v2020_v14 }
 0x823   :  { %2411 = vmatmul.bf16.gmra.mxu2 %v3661_v33 }
 0x828   :  { %v2022_v28 = vpop.f32.mrf.mxu2 }
 0x830   :  { %v2025_v12 = vpop.f32.mrf.mxu2 }
 0x833   :  { %2416 = vmatmul.bf16.gmra.mxu2 %v3662_v44  ;;  %v2026_v44 = vadd.f32 %v4716_v42, %v2025_v12  ;;  %v2013_v12 = vadd.f32 %v4716_v42, %v4699_v36 }
 0x835   :  { %v2039_v36 = vmax.f32 %v2013_v12, 0.0 }
 0x838   :  { %v2027_v32 = vpop.f32.mrf.mxu2 }
 0x839   :  { %v2028_v23 = vadd.f32 %v4716_v42, %v2027_v32 }
 0x83b   :  { %v2045_v37 = vmax.f32 %v2028_v23, 0.0  ;;  %v3672_v23 = vld [vmem:[#allocation5 + $0x30] sm:$0xff] }
 0x83d   :  { %v2061_v58 = vadd.f32 %v2045_v37, %v4494_v35  ;;  %v2008_v35 = vadd.f32 %v4716_v42, %v4694_v13  ;;  %v5009_v37 = vld [vmem:[#allocation25_spill] sm:$0xff] }
 0x83f   :  { %v2037_v0 = vmax.f32 %v2008_v35, 0.0 }
 0x841   :  { %v2053_v9 = vadd.f32 %v2037_v0, %v4518_v41  ;;  %v2031_v41 = vmax.f32 %v1993_v61, 0.0 }
 0x843   :  { %2421 = vmatmul.bf16.gmra.mxu2 %v3663_v29 }
 0x853   :  { %2426 = vmatmul.bf16.gmra.mxu2 %v3664_v15  ;;  %v2023_v15 = vadd.f32 %v4716_v42, %v2022_v28 }
 0x855   :  { %v2043_v50 = vmax.f32 %v2023_v15, 0.0  ;;  %v3674_v15 = vld [vmem:[%s4927_s6] sm:$0x7] }
 0x857   :  { %v2059_v28 = vadd.f32 %v2043_v50, %v4496_v51 }
 0x863   :  { %2431 = vmatmul.bf16.gmra.mxu2 %v3665_v11  ;;  %v2044_v11 = vmax.f32 %v2026_v44, 0.0  ;;  %v3669_v44 = vld [vmem:[#allocation5 + $0x18] sm:$0xff] }
 0x865   :  { %v2060_v43 = vadd.f32 %v2044_v11, %v4492_v38  ;;  %v3675_v11 = vld [vmem:[#allocation5 + $0x40] sm:$0xff] }
 0x876   :  { %v2397_v6 = vpop.f32.mrf.mxu2 }
 0x877   :  { %v4721_v16 = vadd.f32 %v2397_v6, %v2046_v25  ;;  %v2016_v25 = vadd.f32 %v4716_v42, %v2015_v19  ;;  %v2042_v6 = vmax.f32 %v2021_v34, 0.0  ;;  %v4816_v34 = vperm.slane %v3674_v15, 2 }
 0x879   :  { %v2040_v17 = vmax.f32 %v2016_v25, 0.0  ;;  %v2058_v26 = vadd.f32 %v2042_v6, %v4502_v2  ;;  %v5010_v6 = vld [vmem:[#allocation26_spill] sm:$0xff] }
 0x87b   :  { %v2056_v51 = vadd.f32 %v2040_v17, %v4510_v39  ;;  %v1998_v39 = vadd.f32 %v4716_v42, %v4684_v21  ;;  %v2047_v42 = vadd.f32 %v2031_v41, %v4535_v62  ;;  %v3670_v62 = vld [vmem:[#allocation5 + $0x20] sm:$0xff]  ;;  %v3676_v17 = vld [vmem:[#allocation5 + $0x48] sm:$0xff] }
 0x87e   :  { %v4724_v8 = vpop.f32.mrf.mxu2 }
 0x886   :  { %v2402_v55 = vpop.f32.mrf.mxu2 }
 0x887   :  { %v4727_v54 = vadd.f32 %v2402_v55, %v2048_v4  ;;  %v2041_v4 = vmax.f32 %v2018_v49, 0.0  ;;  %v456_v49 = vadd.f32 %v5009_v37, %v4816_v34  ;;  %v3679_v37 = vld [vmem:[#allocation5 + $0x60] sm:$0xff] }
 0x889   :  { %v2057_v3 = vadd.f32 %v2041_v4, %v4504_v27 }
 0x88e   :  { %v4730_v22 = vpop.f32.mrf.mxu2 }
 0x896   :  { %v2407_v45 = vpop.f32.mrf.mxu2 }
 0x897   :  { %v4733_v56 = vadd.f32 %v2407_v45, %v2050_v57 }
 0x89e   :  { %v4736_v20 = vpop.f32.mrf.mxu2 }
 0x8a6   :  { %v2412_v7 = vpop.f32.mrf.mxu2 }
 0x8a7   :  { %v4739_v1 = vadd.f32 %v2412_v7, %v2052_v52  ;;  %v2055_v52 = vadd.f32 %v2039_v36, %v4512_v47 }
 0x8ae   :  { %v2414_v63 = vpop.f32.mrf.mxu2 }
 0x8b6   :  { %v2417_v31 = vpop.f32.mrf.mxu2 }
 0x8b7   :  { %v4743_v18 = vadd.f32 %v2417_v31, %v2054_v40  ;;  %v4787_v40 = vadd.f32 %v2414_v63, %v2053_v9  ;;  %v2033_v31 = vmax.f32 %v1998_v39, 0.0  ;;  %v3677_v39 = vld [vmem:[#allocation5 + $0x50] sm:$0xff] }
 0x8b9   :  { %v2456_v21 = vpack.c.bf16 %v4787_v40, %v4739_v1  ;;  %v2049_v63 = vadd.f32 %v2033_v31, %v4530_v46  ;;  %v5014_v31 = vld [vmem:[#allocation28_spill] sm:$0xff] }
 0x8be   :  { %v2419_v24 = vpop.f32.mrf.mxu2 }
 0x8bf   :  { %v4780_v27 = vadd.f32 %v2419_v24, %v2055_v52  ;;  %v2051_v24 = vadd.f32 %v2035_v53, %v4525_v5  ;;  %v4807_v5 = vadd.f32 %v4724_v8, %v2047_v42  ;;  %v3671_v8 = vld [vmem:[#allocation5 + $0x28] sm:$0xff] }
 0x8c0   :  { %v5013_v53 = vld [vmem:[#allocation27_spill] sm:$0xff] }
 0x8c1   :  { %v2457_v47 = vpack.c.bf16 %v4780_v27, %v4743_v18  ;;  %v2453_v46 = vpack.c.bf16 %v4807_v5, %v4721_v16  ;;  %v466_v9 = vadd.f32 %v5013_v53, %v4816_v34  ;;  %v5021_v53 = vld [vmem:[#allocation35_spill] sm:$0xff] }
 0x8c6   :  { %v2422_v60 = vpop.f32.mrf.mxu2 }
 0x8c7   :  { %v4778_v13 = vadd.f32 %v2422_v60, %v2056_v51  ;;  %v4795_v60 = vadd.f32 %v4736_v20, %v2051_v24  ;;  %v468_v24 = vadd.f32 %v5014_v31, %v4816_v34  ;;  %v5022_v31 = vld [vmem:[#allocation34_spill] sm:$0xff] }
 0x8c9   :  { %v2455_v59 = vpack.c.bf16 %v4795_v60, %v4733_v56 }
 0x8ce   :  { %v2424_v48 = vpop.f32.mrf.mxu2 }
 0x8cf   :  { %v4771_v45 = vadd.f32 %v2424_v48, %v2057_v3  ;;  %v4801_v48 = vadd.f32 %v4730_v22, %v2049_v63  ;;  %v3667_v22 = vld [vmem:[#allocation5 + $0x8] sm:$0xff]  ;;  %v5012_v3 = vld [vmem:[#allocation24_spill] sm:$0xff] }
 0x8d0   :  { %v463_v51 = vadd.f32 %v5012_v3, %v4816_v34 }
 0x8d1   :  { %v2458_v7 = vpack.c.bf16 %v4771_v45, %v4778_v13  ;;  %v2454_v20 = vpack.c.bf16 %v4801_v48, %v4727_v54 }
 0x8d6   :  { %v2427_v30 = vpop.f32.mrf.mxu2 }
 0x8d7   :  { %v4768_v57 = vadd.f32 %v2427_v30, %v2058_v26  ;;  %v3666_v30 = vld [vmem:[#allocation5] sm:$0xff]  ;;  %v5011_v26 = vld [vmem:[#allocation23_spill] sm:$0xff] }
 0x8de   :  { %v2429_v33 = vpop.f32.mrf.mxu2 }
 0x8df   :  { %v4761_v19 = vadd.f32 %v2429_v33, %v2059_v28  ;;  %v3668_v33 = vld [vmem:[#allocation5 + $0x10] sm:$0xff] }
 0x8e1   :  { %v2459_v2 = vpack.c.bf16 %v4761_v19, %v4768_v57 }
 0x8e6   :  { %v2432_v29 = vpop.f32.mrf.mxu2 }
 0x8e7   :  { %v4756_v14 = vadd.f32 %v2432_v29, %v2060_v43  ;;  %v3673_v29 = vld [vmem:[#allocation5 + $0x38] sm:$0xff]  ;;  %v458_v43 = vadd.f32 %v5010_v6, %v4816_v34 }
 0x8ee   :  { %v2434_v32 = vpop.f32.mrf.mxu2 }
 0x8ef   :  { %v4758_v55 = vadd.f32 %v2434_v32, %v2061_v58 }
 0x8f1   :  { %v2460_v38 = vpack.c.bf16 %v4758_v55, %v4756_v14 }
 0x8f3   :  { %2461 = vmatpush.bf16.msra.mxu3 %v2460_v38  ;;  %v461_v38 = vadd.f32 %v5011_v26, %v4816_v34 }
 0x8f7   :  { %2462 = vmatpush.bf16.msra.mxu3 %v2459_v2 }
 0x8fb   :  { %2463 = vmatpush.bf16.msra.mxu3 %v2458_v7 }
 0x8ff   :  { %2464 = vmatpush.bf16.msra.mxu3 %v2457_v47 }
 0x903   :  { %2465 = vmatpush.bf16.msra.mxu3 %v2456_v21 }
 0x907   :  { %2466 = vmatpush.bf16.msra.mxu3 %v2455_v59 }
 0x90b   :  { %2467 = vmatpush.bf16.msra.mxu3 %v2454_v20  ;;  %v3678_v20 = vld [vmem:[#allocation5 + $0x58] sm:$0xff] }
 0x90f   :  { %2468 = vmatpush.bf16.msra.mxu3 %v2453_v46  ;;  %v5015_v46 = vld [vmem:[#allocation29_spill] sm:$0xff] }
 0x912   :  { %2469 = vmatmul.bf16.vlgmr.msra.gmra.mxu3 %v3666_v30  ;;  %v471_v30 = vadd.f32 %v5015_v46, %v4816_v34 }
 0x922   :  { %2474 = vmatmul.bf16.gmra.mxu3 %v3667_v22 }
 0x932   :  { %2479 = vmatmul.bf16.gmra.mxu3 %v3668_v33 }
 0x942   :  { %2484 = vmatmul.bf16.gmra.mxu3 %v3669_v44  ;;  %v5016_v44 = vld [vmem:[#allocation30_spill] sm:$0xff] }
 0x952   :  { %2489 = vmatmul.bf16.gmra.mxu3 %v3670_v62  ;;  %v473_v62 = vadd.f32 %v5016_v44, %v4816_v34 }
 0x962   :  { %2494 = vmatmul.bf16.gmra.mxu3 %v3671_v8 }
 0x972   :  { %2499 = vmatmul.bf16.gmra.mxu3 %v3672_v23 }
 0x982   :  { %2504 = vmatmul.bf16.gmra.mxu3 %v3673_v29 }
 0x992   :  { %2509 = vmatmul.bf16.gmra.mxu3 %v3675_v11 }
 0x995   :  { %v2470_v50 = vpop.f32.mrf.mxu3 }
 0x996   :  { %v2534_v25 = vadd.f32 %v2470_v50, %v456_v49  ;;  %v5017_v49 = vld [vmem:[#allocation31_spill] sm:$0xff] }
 0x997   :  { %v476_v50 = vadd.f32 %v5017_v49, %v4816_v34 }
 0x998   :  { %v2550_v32 = vmax.f32 %v2534_v25, 0.0 }
 0x99d   :  { %v2472_v58 = vpop.f32.mrf.mxu3 }
 0x99e   :  { %v2535_v12 = vadd.f32 %v2472_v58, %v458_v43  ;;  %v3680_v58 = vld [vmem:[#allocation5 + $0x68] sm:$0xff] }
 0x9a0   :  { %v2551_v4 = vmax.f32 %v2535_v12, 0.0 }
 0x9a2   :  { %v4822_v28 = vpack.c.bf16 %v2551_v4, %v2550_v32  ;;  %2512 = vmatmul.bf16.gmra.mxu3 %v3676_v17  ;;  %v3681_v4 = vld [vmem:[#allocation5 + $0x70] sm:$0xff] }
 0x9a5   :  { %v2475_v35 = vpop.f32.mrf.mxu3 }
 0x9a6   :  { %v2536_v36 = vadd.f32 %v2475_v35, %v461_v38  ;;  %v3682_v38 = vld [vmem:[#allocation5 + $0x78] sm:$0xff] }
 0x9a8   :  { %v2552_v0 = vmax.f32 %v2536_v36, 0.0  ;;  %v5018_v36 = vld [vmem:[#allocation37_spill] sm:$0xff] }
 0x9a9   :  { %v491_v3 = vadd.f32 %v5018_v36, %v4816_v34  ;;  %v3685_v36 = vld [vmem:[#allocation7 + $0x10] sm:$0xff] }
 0x9ad   :  { %v2477_v2 = vpop.f32.mrf.mxu3 }
 0x9ae   :  { %v2537_v10 = vadd.f32 %v2477_v2, %v463_v51  ;;  %v5019_v51 = vld [vmem:[#allocation36_spill] sm:$0xff] }
 0x9af   :  { %v488_v2 = vadd.f32 %v5019_v51, %v4816_v34  ;;  %v3686_v51 = vld [vmem:[#allocation7 + $0x18] sm:$0xff] }
 0x9b0   :  { %v2553_v52 = vmax.f32 %v2537_v10, 0.0  ;;  %v5020_v10 = vld [vmem:[#allocation38_spill] sm:$0xff] }
 0x9b2   :  { %v4828_v7 = vpack.c.bf16 %v2553_v52, %v2552_v0  ;;  %2515 = vmatmul.bf16.gmra.mxu3 %v3677_v39  ;;  %v493_v0 = vadd.f32 %v5020_v10, %v4816_v34  ;;  %v3585_v10 = vld [vmem:[#allocation10 + $0xb8] sm:$0xff] }
 0x9b3   :  { %2717 = vmatpush.bf16.msrb.mxu1 %v3585_v10 }
 0x9b5   :  { %v2480_v47 = vpop.f32.mrf.mxu3 }
 0x9b6   :  { %v2538_v61 = vadd.f32 %v2480_v47, %v466_v9  ;;  %v486_v9 = vadd.f32 %v5021_v53, %v4816_v34  ;;  %v3583_v53 = vld [vmem:[#allocation10 + $0xa8] sm:$0xff] }
 0x9b8   :  { %v2554_v63 = vmax.f32 %v2538_v61, 0.0 }
 0x9bd   :  { %v2482_v21 = vpop.f32.mrf.mxu3 }
 0x9be   :  { %v2539_v41 = vadd.f32 %v2482_v21, %v468_v24  ;;  %v483_v24 = vadd.f32 %v5022_v31, %v4816_v34 }
 0x9c0   :  { %v2555_v59 = vmax.f32 %v2539_v41, 0.0 }
 0x9c2   :  { %v4834_v42 = vpack.c.bf16 %v2555_v59, %v2554_v63  ;;  %2518 = vmatmul.bf16.gmra.mxu3 %v3678_v20  ;;  %v5023_v59 = vld [vmem:[#allocation33_spill] sm:$0xff] }
 0x9c3   :  { %v481_v20 = vadd.f32 %v5023_v59, %v4816_v34  ;;  %v3690_v59 = vld [vmem:[#allocation7 + $0x38] sm:$0xff] }
 0x9c5   :  { %v2485_v22 = vpop.f32.mrf.mxu3 }
 0x9c6   :  { %v2540_v33 = vadd.f32 %v2485_v22, %v471_v30 }
 0x9c8   :  { %v2556_v29 = vmax.f32 %v2540_v33, 0.0  ;;  %v5024_v33 = vld [vmem:[#allocation32_spill] sm:$0xff] }
 0x9c9   :  { %v478_v44 = vadd.f32 %v5024_v33, %v4816_v34 }
 0x9cd   :  { %v2487_v8 = vpop.f32.mrf.mxu3 }
 0x9ce   :  { %v2541_v23 = vadd.f32 %v2487_v8, %v473_v62 }
 0x9d0   :  { %v2557_v15 = vmax.f32 %v2541_v23, 0.0 }
 0x9d2   :  { %v2569_v11 = vpack.c.bf16 %v2557_v15, %v2556_v29  ;;  %2521 = vmatmul.bf16.gmra.mxu3 %v3679_v37 }
 0x9d5   :  { %v2490_v25 = vpop.f32.mrf.mxu3 }
 0x9d6   :  { %v2542_v6 = vadd.f32 %v2490_v25, %v476_v50 }
 0x9dd   :  { %v2492_v43 = vpop.f32.mrf.mxu3 }
 0x9de   :  { %v2543_v29 = vadd.f32 %v2492_v43, %v478_v44  ;;  %v3683_v43 = vld [vmem:[#allocation7] sm:$0xff] }
 0x9e0   :  { %v2559_v50 = vmax.f32 %v2543_v29, 0.0 }
 0x9e2   :  { %2524 = vmatmul.bf16.gmra.mxu3 %v3680_v58  ;;  %v2558_v58 = vmax.f32 %v2542_v6, 0.0 }
 0x9e5   :  { %v2495_v12 = vpop.f32.mrf.mxu3 }
 0x9e6   :  { %v2544_v62 = vadd.f32 %v2495_v12, %v481_v20 }
 0x9e8   :  { %v2560_v49 = vmax.f32 %v2544_v62, 0.0 }
 0x9ed   :  { %v2497_v32 = vpop.f32.mrf.mxu3 }
 0x9ee   :  { %v2545_v46 = vadd.f32 %v2497_v32, %v483_v24  ;;  %v2570_v32 = vpack.c.bf16 %v2559_v50, %v2558_v58  ;;  %v3580_v24 = vld [vmem:[#allocation10 + $0x90] sm:$0xff] }
 0x9f0   :  { %v2561_v15 = vmax.f32 %v2545_v46, 0.0 }
 0x9f2   :  { %2527 = vmatmul.bf16.gmra.mxu3 %v3681_v4  ;;  %v2571_v25 = vpack.c.bf16 %v2561_v15, %v2560_v49 }
 0x9f5   :  { %v2500_v17 = vpop.f32.mrf.mxu3 }
 0x9f6   :  { %v2546_v21 = vadd.f32 %v2500_v17, %v486_v9  ;;  %v3582_v9 = vld [vmem:[#allocation10 + $0xa0] sm:$0xff] }
 0x9f8   :  { %v2562_v8 = vmax.f32 %v2546_v21, 0.0  ;;  %v3579_v21 = vld [vmem:[#allocation10 + $0x88] sm:$0xff] }
 0x9fd   :  { %v2502_v26 = vpop.f32.mrf.mxu3 }
 0x9fe   :  { %v2547_v47 = vadd.f32 %v2502_v26, %v488_v2 }
 0xa00   :  { %v2563_v30 = vmax.f32 %v2547_v47, 0.0 }
 0xa02   :  { %2530 = vmatmul.bf16.gmra.mxu3 %v3682_v38  ;;  %v2572_v37 = vpack.c.bf16 %v2563_v30, %v2562_v8  ;;  %v3684_v38 = vld [vmem:[#allocation7 + $0x8] sm:$0xff] }
 0xa05   :  { %v2505_v35 = vpop.f32.mrf.mxu3 }
 0xa06   :  { %v2548_v52 = vadd.f32 %v2505_v35, %v491_v3 }
 0xa08   :  { %v2564_v41 = vmax.f32 %v2548_v52, 0.0 }
 0xa0d   :  { %v2507_v39 = vpop.f32.mrf.mxu3 }
 0xa0e   :  { %v2549_v61 = vadd.f32 %v2507_v39, %v493_v0  ;;  %v3688_v39 = vld [vmem:[#allocation7 + $0x28] sm:$0xff] }
 0xa10   :  { %v2565_v63 = vmax.f32 %v2549_v61, 0.0  ;;  %v3581_v61 = vld [vmem:[#allocation10 + $0x98] sm:$0xff] }
 0xa12   :  { %v2573_v22 = vpack.c.bf16 %v2565_v63, %v2564_v41  ;;  %v3689_v41 = vld [vmem:[#allocation7 + $0x30] sm:$0xff] }
 0xa13   :  { %v3578_v63 = vld [vmem:[#allocation10 + $0x80] sm:$0xff] }
 0xa14   :  { %2574 = vmatpush.bf16.msrb.mxu0 %v2573_v22 }
 0xa15   :  { %v2510_v23 = vpop.f32.mrf.mxu3 }
 0xa18   :  { %2575 = vmatpush.bf16.msrb.mxu0 %v2572_v37 }
 0xa1c   :  { %2576 = vmatpush.bf16.msrb.mxu0 %v2571_v25 }
 0xa1d   :  { %v2511_v4 = vpop.f32.mrf.mxu3 }
 0xa20   :  { %2577 = vmatpush.bf16.msrb.mxu0 %v2570_v32 }
 0xa24   :  { %2578 = vmatpush.bf16.msrb.mxu0 %v2569_v11 }
 0xa25   :  { %v2513_v17 = vpop.f32.mrf.mxu3 }
 0xa28   :  { %2579 = vmatpush.bf16.msrb.mxu0 %v4834_v42 }
 0xa2c   :  { %2580 = vmatpush.bf16.msrb.mxu0 %v4828_v7  ;;  %v3687_v7 = vld [vmem:[#allocation7 + $0x20] sm:$0xff] }
 0xa2d   :  { %v2514_v34 = vpop.f32.mrf.mxu3 }
 0xa30   :  { %2581 = vmatpush.bf16.msrb.mxu0 %v4822_v28  ;;  %v3584_v28 = vld [vmem:[#allocation10 + $0xb0] sm:$0xff] }
 0xa31   :  { %2718 = vmatpush.bf16.msrb.mxu1 %v3584_v28  ;;  %v3590_v28 = vld [vmem:[#allocation11 + $0xa0] sm:$0xff] }
 0xa33   :  { %2582 = vmatmul.bf16.vlgmr.msrb.gmra.mxu0 %v3683_v43 }
 0xa35   :  { %v2516_v12 = vpop.f32.mrf.mxu3  ;;  %2719 = vmatpush.bf16.msrb.mxu1 %v3583_v53 }
 0xa39   :  { %2720 = vmatpush.bf16.msrb.mxu1 %v3582_v9 }
 0xa3d   :  { %v2517_v26 = vpop.f32.mrf.mxu3  ;;  %2721 = vmatpush.bf16.msrb.mxu1 %v3581_v61 }
 0xa41   :  { %2722 = vmatpush.bf16.msrb.mxu1 %v3580_v24  ;;  %v3586_v24 = vld [vmem:[#allocation11 + $0x80] sm:$0xff] }
 0xa43   :  { %2587 = vmatmul.bf16.gmra.mxu0 %v3684_v38 }
 0xa45   :  { %v2519_v6 = vpop.f32.mrf.mxu3  ;;  %2723 = vmatpush.bf16.msrb.mxu1 %v3579_v21 }
 0xa49   :  { %2724 = vmatpush.bf16.msrb.mxu1 %v3578_v63 }
 0xa4d   :  { %v2520_v35 = vpop.f32.mrf.mxu3 }
 0xa53   :  { %2592 = vmatmul.bf16.gmra.mxu0 %v3685_v36 }
 0xa55   :  { %v2522_v3 = vpop.f32.mrf.mxu3 }
 0xa56   :  { %v3593_v3 = vld [vmem:[#allocation11 + $0xb8] sm:$0xff] }
 0xa57   :  { %2860 = vmatpush.bf16.msrb.mxu2 %v3593_v3 }
 0xa5d   :  { %v2523_v11 = vpop.f32.mrf.mxu3 }
 0xa63   :  { %2597 = vmatmul.bf16.gmra.mxu0 %v3686_v51 }
 0xa65   :  { %v2525_v42 = vpop.f32.mrf.mxu3 }
 0xa6d   :  { %v2526_v2 = vpop.f32.mrf.mxu3 }
 0xa6e   :  { %v3592_v2 = vld [vmem:[#allocation11 + $0xb0] sm:$0xff] }
 0xa6f   :  { %2861 = vmatpush.bf16.msrb.mxu2 %v3592_v2 }
 0xa73   :  { %2602 = vmatmul.bf16.gmra.mxu0 %v3687_v7  ;;  %v3591_v7 = vld [vmem:[#allocation11 + $0xa8] sm:$0xff] }
 0xa74   :  { %2862 = vmatpush.bf16.msrb.mxu2 %v3591_v7 }
 0xa75   :  { %v2528_v0 = vpop.f32.mrf.mxu3 }
 0xa78   :  { %2863 = vmatpush.bf16.msrb.mxu2 %v3590_v28 }
 0xa7d   :  { %v2529_v52 = vpop.f32.mrf.mxu3 }
 0xa7e   :  { %v3589_v52 = vld [vmem:[#allocation11 + $0x98] sm:$0xff] }
 0xa7f   :  { %2864 = vmatpush.bf16.msrb.mxu2 %v3589_v52 }
 0xa83   :  { %2607 = vmatmul.bf16.gmra.mxu0 %v3688_v39 }
 0xa85   :  { %v2531_v47 = vpop.f32.mrf.mxu3 }
 0xa86   :  { %v3588_v47 = vld [vmem:[#allocation11 + $0x90] sm:$0xff] }
 0xa87   :  { %2865 = vmatpush.bf16.msrb.mxu2 %v3588_v47 }
 0xa8d   :  { %v2532_v31 = vpop.f32.mrf.mxu3 }
 0xa8e   :  { %v3587_v31 = vld [vmem:[#allocation11 + $0x88] sm:$0xff] }
 0xa8f   :  { %2866 = vmatpush.bf16.msrb.mxu2 %v3587_v31 }
 0xa93   :  { %2612 = vmatmul.bf16.gmra.mxu0 %v3689_v41  ;;  %2867 = vmatpush.bf16.msrb.mxu2 %v3586_v24 }
 0xaa3   :  { %2617 = vmatmul.bf16.gmra.mxu0 %v3690_v59 }
 0xab0   :  { %v2583_v20 = vpop.f32.mrf.mxu0 }
 0xab1   :  { %v2623_v30 = vadd.f32 %v2583_v20, %v4721_v16 }
 0xab8   :  { %v2585_v46 = vpop.f32.mrf.mxu0 }
 0xab9   :  { %v2624_v22 = vadd.f32 %v2585_v46, %v4807_v5  ;;  %v3615_v46 = vld [vmem:[%s4929_s8 + $0x2] ss:$0 sm:$0xff] }
 0xabb   :  { %v2656_v33 = vpack.c.bf16 %v2624_v22, %v2623_v30 }
 0xabd   :  { %2725 = vmatmul.bf16.vlgmr.msrb.gmra.mxu1 %v2656_v33 }
 0xac0   :  { %v2588_v44 = vpop.f32.mrf.mxu0 }
 0xac1   :  { %v2625_v8 = vadd.f32 %v2588_v44, %v4727_v54 }
 0xac8   :  { %v2590_v62 = vpop.f32.mrf.mxu0 }
 0xac9   :  { %v2626_v23 = vadd.f32 %v2590_v62, %v4801_v48 }
 0xacb   :  { %v2657_v29 = vpack.c.bf16 %v2626_v23, %v2625_v8 }
 0xacd   :  { %2730 = vmatmul.bf16.gmra.mxu1 %v2657_v29 }
 0xad0   :  { %v2593_v15 = vpop.f32.mrf.mxu0 }
 0xad1   :  { %v2627_v49 = vadd.f32 %v2593_v15, %v4733_v56 }
 0xad8   :  { %v2595_v37 = vpop.f32.mrf.mxu0 }
 0xad9   :  { %v2628_v50 = vadd.f32 %v2595_v37, %v4795_v60 }
 0xadb   :  { %v2658_v25 = vpack.c.bf16 %v2628_v50, %v2627_v49 }
 0xadd   :  { %2735 = vmatmul.bf16.gmra.mxu1 %v2658_v25 }
 0xae0   :  { %v2598_v58 = vpop.f32.mrf.mxu0 }
 0xae1   :  { %v2629_v32 = vadd.f32 %v2598_v58, %v4739_v1 }
 0xae8   :  { %v2600_v4 = vpop.f32.mrf.mxu0 }
 0xae9   :  { %v2630_v17 = vadd.f32 %v2600_v4, %v4787_v40 }
 0xaeb   :  { %v2659_v34 = vpack.c.bf16 %v2630_v17, %v2629_v32 }
 0xaed   :  { %2740 = vmatmul.bf16.gmra.mxu1 %v2659_v34 }
 0xaf0   :  { %v2603_v43 = vpop.f32.mrf.mxu0 }
 0xaf1   :  { %v2631_v26 = vadd.f32 %v2603_v43, %v4743_v18 }
 0xaf8   :  { %v2605_v12 = vpop.f32.mrf.mxu0 }
 0xaf9   :  { %v2632_v38 = vadd.f32 %v2605_v12, %v4780_v27 }
 0xafb   :  { %v2660_v6 = vpack.c.bf16 %v2632_v38, %v2631_v26 }
 0xafd   :  { %2745 = vmatmul.bf16.gmra.mxu1 %v2660_v6 }
 0xb00   :  { %v2608_v35 = vpop.f32.mrf.mxu0 }
 0xb01   :  { %v2633_v11 = vadd.f32 %v2608_v35, %v4778_v13 }
 0xb08   :  { %v2610_v36 = vpop.f32.mrf.mxu0 }
 0xb09   :  { %v2634_v51 = vadd.f32 %v2610_v36, %v4771_v45 }
 0xb0b   :  { %v2661_v42 = vpack.c.bf16 %v2634_v51, %v2633_v11 }
 0xb0d   :  { %2750 = vmatmul.bf16.gmra.mxu1 %v2661_v42 }
 0xb10   :  { %v2613_v10 = vpop.f32.mrf.mxu0 }
 0xb11   :  { %v2635_v39 = vadd.f32 %v2613_v10, %v4768_v57 }
 0xb18   :  { %v2615_v0 = vpop.f32.mrf.mxu0 }
 0xb19   :  { %v2636_v53 = vadd.f32 %v2615_v0, %v4761_v19 }
 0xb1b   :  { %v2662_v9 = vpack.c.bf16 %v2636_v53, %v2635_v39 }
 0xb1d   :  { %2755 = vmatmul.bf16.gmra.mxu1 %v2662_v9 }
 0xb20   :  { %v2618_v61 = vpop.f32.mrf.mxu0 }
 0xb21   :  { %v2637_v41 = vadd.f32 %v2618_v61, %v4756_v14 }
 0xb28   :  { %v2620_v21 = vpop.f32.mrf.mxu0 }
 0xb29   :  { %v2638_v63 = vadd.f32 %v2620_v21, %v4758_v55 }
 0xb2b   :  { %v2663_v59 = vpack.c.bf16 %v2638_v63, %v2637_v41 }
 0xb2d   :  { %2760 = vmatmul.bf16.gmra.mxu1 %v2663_v59 }
 0xb3a   :  { %v2726_v20 = vpop.f32.mrf.mxu1 }
 0xb3b   :  { %v2727_v30 = vadd.f32 %v3615_v46, %v2726_v20 }
 0xb3d   :  { %v2766_v44 = vmax.f32 %v2727_v30, 0.0 }
 0xb42   :  { %v2728_v22 = vpop.f32.mrf.mxu1 }
 0xb43   :  { %v2729_v33 = vadd.f32 %v3615_v46, %v2728_v22 }
 0xb45   :  { %v2767_v62 = vmax.f32 %v2729_v33, 0.0 }
 0xb47   :  { %v2799_v8 = vpack.c.bf16 %v2767_v62, %v2766_v44 }
 0xb49   :  { %2868 = vmatmul.bf16.vlgmr.msrb.gmra.mxu2 %v2799_v8 }
 0xb4a   :  { %v2731_v23 = vpop.f32.mrf.mxu1 }
 0xb4b   :  { %v2732_v29 = vadd.f32 %v3615_v46, %v2731_v23 }
 0xb4d   :  { %v2768_v49 = vmax.f32 %v2732_v29, 0.0 }
 0xb52   :  { %v2733_v15 = vpop.f32.mrf.mxu1 }
 0xb53   :  { %v2734_v37 = vadd.f32 %v3615_v46, %v2733_v15  ;;  %v4881_v15 = vld [vmem:[%s4931_s10 + $0x2] ss:$0 sm:$0xff]  ;;  %s3931_s10 = smov [#allocation16]  }
 0xb54   :  { %s2945_s0 = sshll.u32 %s3931_s10, 4  ;;  %s2946_s0 = int_to_ptr.vmem [resolvable:$true] %s2945_s0 }
 0xb55   :  { %v2769_v50 = vmax.f32 %v2734_v37, 0.0 }
 0xb57   :  { %v2800_v25 = vpack.c.bf16 %v2769_v50, %v2768_v49 }
 0xb59   :  { %2873 = vmatmul.bf16.gmra.mxu2 %v2800_v25 }
 0xb5a   :  { %v2736_v58 = vpop.f32.mrf.mxu1 }
 0xb5b   :  { %v2737_v4 = vadd.f32 %v3615_v46, %v2736_v58 }
 0xb5d   :  { %v2770_v34 = vmax.f32 %v2737_v4, 0.0 }
 0xb62   :  { %v2738_v32 = vpop.f32.mrf.mxu1 }
 0xb63   :  { %v2739_v17 = vadd.f32 %v3615_v46, %v2738_v32 }
 0xb65   :  { %v2771_v43 = vmax.f32 %v2739_v17, 0.0 }
 0xb67   :  { %v2801_v12 = vpack.c.bf16 %v2771_v43, %v2770_v34 }
 0xb69   :  { %2878 = vmatmul.bf16.gmra.mxu2 %v2801_v12 }
 0xb6a   :  { %v2741_v26 = vpop.f32.mrf.mxu1 }
 0xb6b   :  { %v2742_v38 = vadd.f32 %v3615_v46, %v2741_v26 }
 0xb6d   :  { %v2772_v36 = vmax.f32 %v2742_v38, 0.0 }
 0xb72   :  { %v2743_v6 = vpop.f32.mrf.mxu1 }
 0xb73   :  { %v2744_v35 = vadd.f32 %v3615_v46, %v2743_v6 }
 0xb75   :  { %v2773_v3 = vmax.f32 %v2744_v35, 0.0 }
 0xb77   :  { %v2802_v11 = vpack.c.bf16 %v2773_v3, %v2772_v36 }
 0xb79   :  { %2883 = vmatmul.bf16.gmra.mxu2 %v2802_v11 }
 0xb7a   :  { %v2746_v51 = vpop.f32.mrf.mxu1 }
 0xb7b   :  { %v2747_v42 = vadd.f32 %v3615_v46, %v2746_v51 }
 0xb7d   :  { %v2774_v10 = vmax.f32 %v2747_v42, 0.0 }
 0xb82   :  { %v2748_v2 = vpop.f32.mrf.mxu1 }
 0xb83   :  { %v2749_v7 = vadd.f32 %v3615_v46, %v2748_v2 }
 0xb85   :  { %v2775_v28 = vmax.f32 %v2749_v7, 0.0 }
 0xb87   :  { %v2803_v0 = vpack.c.bf16 %v2775_v28, %v2774_v10 }
 0xb89   :  { %2888 = vmatmul.bf16.gmra.mxu2 %v2803_v0 }
 0xb8a   :  { %v2751_v52 = vpop.f32.mrf.mxu1 }
 0xb8b   :  { %v2752_v39 = vadd.f32 %v3615_v46, %v2751_v52 }
 0xb8d   :  { %v2776_v47 = vmax.f32 %v2752_v39, 0.0 }
 0xb92   :  { %v2753_v53 = vpop.f32.mrf.mxu1 }
 0xb93   :  { %v2754_v9 = vadd.f32 %v3615_v46, %v2753_v53 }
 0xb95   :  { %v2777_v61 = vmax.f32 %v2754_v9, 0.0 }
 0xb97   :  { %v2804_v31 = vpack.c.bf16 %v2777_v61, %v2776_v47 }
 0xb99   :  { %2893 = vmatmul.bf16.gmra.mxu2 %v2804_v31 }
 0xb9a   :  { %v2756_v24 = vpop.f32.mrf.mxu1 }
 0xb9b   :  { %v2757_v21 = vadd.f32 %v3615_v46, %v2756_v24 }
 0xb9d   :  { %v2778_v59 = vmax.f32 %v2757_v21, 0.0 }
 0xba2   :  { %v2758_v41 = vpop.f32.mrf.mxu1 }
 0xba3   :  { %v2759_v63 = vadd.f32 %v3615_v46, %v2758_v41 }
 0xba5   :  { %v2779_v20 = vmax.f32 %v2759_v63, 0.0 }
 0xba7   :  { %v2805_v30 = vpack.c.bf16 %v2779_v20, %v2778_v59 }
 0xba9   :  { %2898 = vmatmul.bf16.gmra.mxu2 %v2805_v30 }
 0xbaa   :  { %v2761_v22 = vpop.f32.mrf.mxu1 }
 0xbab   :  { %v2762_v33 = vadd.f32 %v3615_v46, %v2761_v22 }
 0xbad   :  { %v2780_v8 = vmax.f32 %v2762_v33, 0.0 }
 0xbb2   :  { %v2763_v44 = vpop.f32.mrf.mxu1 }
 0xbb3   :  { %v2764_v62 = vadd.f32 %v3615_v46, %v2763_v44 }
 0xbb5   :  { %v2781_v23 = vmax.f32 %v2764_v62, 0.0 }
 0xbb7   :  { %v2806_v29 = vpack.c.bf16 %v2781_v23, %v2780_v8 }
 0xbb9   :  { %2903 = vmatmul.bf16.gmra.mxu2 %v2806_v29 }
 0xbcc   :  { %v2869_v37 = vpop.f32.mrf.mxu2 }
 0xbcd   :  { %v2870_v49 = vadd.f32 %v4881_v15, %v2869_v37 }
 0xbcf   :  { %v2909_v50 = vadd.f32 %v2870_v49, %v4721_v16 }
 0xbd1   :  { %2925 = vst [vmem:[#allocation16] sm:$0xff] %v2909_v50 }
 0xbd4   :  { %v2871_v25 = vpop.f32.mrf.mxu2 }
 0xbd5   :  { %v2872_v58 = vadd.f32 %v4881_v15, %v2871_v25 }
 0xbd7   :  { %v2910_v46 = vadd.f32 %v2872_v58, %v4807_v5 }
 0xbd9   :  { %2926 = vst [vmem:[#allocation16 + $0x8] sm:$0xff] %v2910_v46 }
 0xbdc   :  { %v2874_v4 = vpop.f32.mrf.mxu2 }
 0xbdd   :  { %v2875_v32 = vadd.f32 %v4881_v15, %v2874_v4 }
 0xbdf   :  { %v2911_v17 = vadd.f32 %v2875_v32, %v4727_v54 }
 0xbe1   :  { %2927 = vst [vmem:[#allocation16 + $0x10] sm:$0xff] %v2911_v17 }
 0xbe4   :  { %v2876_v34 = vpop.f32.mrf.mxu2 }
 0xbe5   :  { %v2877_v43 = vadd.f32 %v4881_v15, %v2876_v34 }
 0xbe7   :  { %v2912_v12 = vadd.f32 %v2877_v43, %v4801_v48 }
 0xbe9   :  { %2928 = vst [vmem:[#allocation16 + $0x18] sm:$0xff] %v2912_v12 }
 0xbec   :  { %v2879_v16 = vpop.f32.mrf.mxu2 }
 0xbed   :  { %v2880_v26 = vadd.f32 %v4881_v15, %v2879_v16 }
 0xbef   :  { %v2913_v38 = vadd.f32 %v2880_v26, %v4733_v56 }
 0xbf1   :  { %2929 = vst [vmem:[#allocation16 + $0x20] sm:$0xff] %v2913_v38 }
 0xbf4   :  { %v2881_v5 = vpop.f32.mrf.mxu2 }
 0xbf5   :  { %v2882_v6 = vadd.f32 %v4881_v15, %v2881_v5 }
 0xbf7   :  { %v2914_v35 = vadd.f32 %v2882_v6, %v4795_v60 }
 0xbf9   :  { %2930 = vst [vmem:[#allocation16 + $0x28] sm:$0xff] %v2914_v35 }
 0xbfc   :  { %v2884_v54 = vpop.f32.mrf.mxu2 }
 0xbfd   :  { %v2885_v36 = vadd.f32 %v4881_v15, %v2884_v54 }
 0xbff   :  { %v2915_v3 = vadd.f32 %v2885_v36, %v4739_v1 }
 0xc01   :  { %2931 = vst [vmem:[#allocation16 + $0x30] sm:$0xff] %v2915_v3 }
 0xc04   :  { %v2886_v48 = vpop.f32.mrf.mxu2 }
 0xc05   :  { %v2887_v11 = vadd.f32 %v4881_v15, %v2886_v48 }
 0xc07   :  { %v2916_v51 = vadd.f32 %v2887_v11, %v4787_v40 }
 0xc09   :  { %2932 = vst [vmem:[#allocation16 + $0x38] sm:$0xff] %v2916_v51 }
 0xc0c   :  { %v2889_v56 = vpop.f32.mrf.mxu2 }
 0xc0d   :  { %v2890_v42 = vadd.f32 %v4881_v15, %v2889_v56 }
 0xc0f   :  { %v2917_v2 = vadd.f32 %v2890_v42, %v4743_v18 }
 0xc11   :  { %2933 = vst [vmem:[#allocation16 + $0x40] sm:$0xff] %v2917_v2 }
 0xc14   :  { %v2891_v60 = vpop.f32.mrf.mxu2 }
 0xc15   :  { %v2892_v7 = vadd.f32 %v4881_v15, %v2891_v60 }
 0xc17   :  { %v2918_v10 = vadd.f32 %v2892_v7, %v4780_v27 }
 0xc19   :  { %2934 = vst [vmem:[#allocation16 + $0x48] sm:$0xff] %v2918_v10 }
 0xc1c   :  { %v2894_v1 = vpop.f32.mrf.mxu2 }
 0xc1d   :  { %v2895_v28 = vadd.f32 %v4881_v15, %v2894_v1 }
 0xc1f   :  { %v2919_v0 = vadd.f32 %v2895_v28, %v4778_v13 }
 0xc21   :  { %2935 = vst [vmem:[#allocation16 + $0x50] sm:$0xff] %v2919_v0 }
 0xc24   :  { %v2896_v40 = vpop.f32.mrf.mxu2 }
 0xc25   :  { %v2897_v52 = vadd.f32 %v4881_v15, %v2896_v40 }
 0xc27   :  { %v2920_v39 = vadd.f32 %v2897_v52, %v4771_v45 }
 0xc29   :  { %2936 = vst [vmem:[#allocation16 + $0x58] sm:$0xff] %v2920_v39 }
 0xc2c   :  { %v2899_v18 = vpop.f32.mrf.mxu2 }
 0xc2d   :  { %v2900_v53 = vadd.f32 %v4881_v15, %v2899_v18 }
 0xc2f   :  { %v2921_v9 = vadd.f32 %v2900_v53, %v4768_v57 }
 0xc31   :  { %2937 = vst [vmem:[#allocation16 + $0x60] sm:$0xff] %v2921_v9 }
 0xc34   :  { %v2901_v27 = vpop.f32.mrf.mxu2 }
 0xc35   :  { %v2902_v47 = vadd.f32 %v4881_v15, %v2901_v27 }
 0xc37   :  { %v2922_v61 = vadd.f32 %v2902_v47, %v4761_v19 }
 0xc39   :  { %2938 = vst [vmem:[#allocation16 + $0x68] sm:$0xff] %v2922_v61 }
 0xc3c   :  { %v2904_v13 = vpop.f32.mrf.mxu2 }
 0xc3d   :  { %v2905_v31 = vadd.f32 %v4881_v15, %v2904_v13 }
 0xc3f   :  { %v2923_v24 = vadd.f32 %v2905_v31, %v4756_v14 }
 0xc41   :  { %2939 = vst [vmem:[#allocation16 + $0x70] sm:$0xff] %v2923_v24 }
 0xc44   :  { %v2906_v45 = vpop.f32.mrf.mxu2 }
 0xc45   :  { %v2907_v57 = vadd.f32 %v4881_v15, %v2906_v45 }
 0xc47   :  { %v2924_v21 = vadd.f32 %v2907_v57, %v4758_v55 }
 0xc49   :  { %2940 = vst [vmem:[#allocation16 + $0x78] sm:$0xff] %v2924_v21 }
 0xc4a   :  { %2953 = dma.vmem_to_hbm [thread:$0]  %s2946_s0, 2048, %s2948_s14, [#allocation4], %s3925_s23, %s3925_s23, %s3926_s9  }
 0xc4b   :  { %3917 = dma.done.wait [#allocation4], 2048  }
 0xc4c   :  { %3918 = vsyncadd [#allocation4], 4294965248 }
 0xc4d   :  { %2958 = vsyncpa [#allocation3], 1 }
 0xc4e   :  { %2959 = vsyncpa [#allocation6], 1 }
 0xc4f   :  { %2960 = vsyncpa [#allocation9], 1 }
 0xc50   :  { %2961 = vsyncpa [#allocation12], 1 }
 0xc51   :  { %2962 = vsyncpa [#allocation15], 1 }
 0xc52   :  { %2963 = vsyncpa [#allocation4], 1 }

</bundles_post_ra>
